<compile_context>
chip_gen: v6e
topology: v6e:2x2x1
jax: 0.10.0
libtpu: 0.0.40
codegen_flags: <defaults>
</compile_context>

<pallas_src>
import functools
import math

import jax
import jax.numpy as jnp
from jax.experimental import pallas as pl
from jax.experimental.pallas import tpu as pltpu

# ----------------------------- configuration --------------------------------
QN_NUM = 3          # featureType['Qn']
QN_DIM = 4          # featureType['Qn_dim']
QL = (5, 7)         # featureType['Ql']  (class counts per categorical feature)
QL_DIM = 4          # featureType['Ql_dim']
QL_NUM = len(QL)
QL_CLASS = sum(QL)
INPUT_DIM = QN_NUM * QN_DIM + QL_NUM * QL_DIM   # 20
HIDDEN = 32         # modelType['hidden_dim']
OUTPUT_DIM = 6      # modelType['output_dim']
LAYER_NUM = 2       # modelType['layer_num']
BATCH = 2
SEQ = 8
LN_EPS = 1e-5
BN_EPS = 1e-5
OUT_PAD = 128       # lane-dense output slab width (>= OUTPUT_DIM)
NEG_BIG = -1e30     # logit filler for padded output lanes -> softmax prob 0


# ------------------------------- parameters ---------------------------------
def init_params(key):
    std = 1.0 / math.sqrt(HIDDEN)
    keys = jax.random.split(key, 10 + LAYER_NUM)
    params = {}
    params["QnV"] = 0.5 * jax.random.normal(keys[0], (QN_NUM, QN_DIM), jnp.float32)
    params["QlV"] = 0.5 * jax.random.normal(keys[1], (QL_CLASS, QL_DIM), jnp.float32)
    Wh, Wx, b = [], [], []
    for i in range(LAYER_NUM):
        in_dim = INPUT_DIM if i == 0 else HIDDEN
        k1, k2, k3 = jax.random.split(keys[2 + i], 3)
        # torch Linear(input+hidden, 4*hidden) acting on cat([h, x]) split as
        # [Wh ; Wx] so that cat([h,x]) @ W == h @ Wh + x @ Wx.
        Wh.append(jax.random.uniform(k1, (HIDDEN, 4 * HIDDEN), jnp.float32, -std, std))
        Wx.append(jax.random.uniform(k2, (in_dim, 4 * HIDDEN), jnp.float32, -std, std))
        b.append(jax.random.uniform(k3, (4 * HIDDEN,), jnp.float32, -std, std))
    params["Wh"] = Wh
    params["Wx"] = Wx
    params["b"] = jnp.stack(b)                                   # (L, 4H)
    params["ln_g"] = jax.random.uniform(
        keys[2 + LAYER_NUM], (LAYER_NUM, 4, HIDDEN), jnp.float32, -std, std)
    params["ln_b"] = jax.random.uniform(
        keys[3 + LAYER_NUM], (LAYER_NUM, 4, HIDDEN), jnp.float32, -std, std)
    params["fc_W"] = jax.random.uniform(
        keys[4 + LAYER_NUM], (HIDDEN, OUTPUT_DIM), jnp.float32, -std, std)
    params["fc_b"] = jax.random.uniform(
        keys[5 + LAYER_NUM], (1, OUTPUT_DIM), jnp.float32, -std, std)
    params["bn_g"] = jnp.ones((QN_NUM,), jnp.float32)
    params["bn_b"] = jnp.zeros((QN_NUM,), jnp.float32)
    return params


# -------------------------- data_trans (JAX glue) ----------------------------
def data_trans(x, params):
    """Replicates LSTMModel.data_trans.  x: (N, T, QN_NUM + QL_NUM) float."""
    n, t, _ = x.shape
    qn = x[:, :, :QN_NUM].astype(jnp.float32)
    ql = x[:, :, QN_NUM:].astype(jnp.int32)
    # BatchNorm1d in training mode (batch statistics, biased variance).
    flat = qn.reshape(-1, QN_NUM)
    mean = flat.mean(axis=0)
    var = flat.var(axis=0)
    qn = (qn - mean) * jax.lax.rsqrt(var + BN_EPS) * params["bn_g"] + params["bn_b"]
    qn = jnp.einsum("ijk,kd->ijkd", qn, params["QnV"])            # (N,T,QN_NUM,QN_DIM)
    offs, s = [], 0
    for c in QL:
        offs.append(s)
        s += c
    ql = ql + jnp.array(offs, jnp.int32).reshape(1, 1, -1)
    ql = params["QlV"][ql]                                        # (N,T,QL_NUM,QL_DIM)
    out = jnp.concatenate([qn, ql], axis=2)
    return out.reshape(n, t, -1)                                  # (N,T,INPUT_DIM)


# ------------------------------- Pallas kernel --------------------------------
def _lstm_kernel(layer_num, hidden, seq_len, batch, x_ref, *rest):
    wh_refs = rest[:layer_num]                     # each (H, 4H), LN-centered
    wx_refs = rest[layer_num:2 * layer_num]        # each (in_dim, 4H), LN-centered
    (b_ref, lng_ref, lnb_ref, m_ref, fcw_ref, fcb_ref,
     out_ref, xp_ref, hseq_ref) = rest[2 * layer_num:]

    n = batch
    h4 = 4 * hidden
    m_avg = m_ref[...]                             # (4H,4H) block-diag 1/H matrix

    for l in range(layer_num):
        # ---- loop-invariant loads / broadcasts, hoisted above the t loop ----
        wh = wh_refs[l][...]                                        # (H, 4H)
        wx = wx_refs[l][...]                                        # (in, 4H)
        bias = b_ref[l]                                             # (1, 4H)
        gamma = jnp.broadcast_to(lng_ref[l], (n, h4))               # (N, 4H)
        beta = jnp.broadcast_to(lnb_ref[l], (n, h4))                # (N, 4H)

        # ---- x-side projection for the WHOLE sequence: one batched MXU matmul
        # off the serial h->h chain.  Weights/bias were pre-multiplied by
        # (I - M) on the host, so the per-gate LN mean is already subtracted.
        xin_seq = x_ref[...] if l == 0 else hseq_ref[...]           # (T*N, in)
        xp_ref[...] = (jnp.dot(xin_seq, wx, preferred_element_type=jnp.float32)
                       + bias)

        # ---- serial recurrence (statically unrolled): only h @ Wh per cell --
        h = jnp.zeros((n, hidden), jnp.float32)
        c = jnp.zeros((n, hidden), jnp.float32)
        for t in range(seq_len):
            # Keep the xproj add textually adjacent to the dot so v7x's MRB can
            # accumulate in place.  `d` is the mean-centered gate tensor.
            d = (jnp.dot(h, wh, preferred_element_type=jnp.float32)
                 + xp_ref[pl.ds(t * n, n), :])                      # (N, 4H)

            # Per-gate LayerNorm variance via a block-diagonal averaging matmul:
            # stays in the natural (N,4H) lane layout, no sublane repack.
            var = jnp.dot(d * d, m_avg, preferred_element_type=jnp.float32)
            nrm = d * jax.lax.rsqrt(var + LN_EPS) * gamma + beta    # (N, 4H)

            # One fused sigmoid over all four gate slots (single EUP push);
            # the cell gate is taken pre-sigmoid from nrm.
            sig = jax.nn.sigmoid(nrm)
            ingate = sig[:, 0 * hidden:1 * hidden]
            forgetgate = sig[:, 1 * hidden:2 * hidden]
            cellgate = nrm[:, 2 * hidden:3 * hidden]
            outgate = sig[:, 3 * hidden:4 * hidden]

            c = c * forgetgate + ingate * jnp.tanh(cellgate)
            # Matches the PyTorch LSTMCell.forward exactly (verified):
            # h = outgate * tanh(c) + cellgate  (post-LN, pre-tanh cell gate).
            h = outgate * jnp.tanh(c) + cellgate

            # Stream this layer's h to VMEM scratch: feeds the next layer's
            # batched projection / the fc epilogue, keeps vreg pressure low.
            hseq_ref[pl.ds(t * n, n), :] = h

    # ---- fc + softmax epilogue: one matmul, one lane-dense (·,128) store ----
    logits = (jnp.dot(hseq_ref[...], fcw_ref[...],
                      preferred_element_type=jnp.float32)
              + fcb_ref[...])                                       # (T*N, 128)
    z = jnp.exp(logits - jnp.max(logits, axis=-1, keepdims=True))
    s = jnp.sum(z, axis=-1, keepdims=True)
    inv = pl.reciprocal(s, approx=True)
    inv = inv * (2.0 - s * inv)        # one Newton step -> ~f32 accuracy, VPU only
    out_ref[...] = z * inv


def lstm_forward_pallas(x_emb, params):
    """x_emb: (N, T, INPUT_DIM) -> (N, T, OUTPUT_DIM) softmax probabilities."""
    n, t, d = x_emb.shape
    h4 = 4 * HIDDEN
    # (T, N, D) -> flat (T*N, D), t-major rows.
    x_flat = jnp.transpose(x_emb, (1, 0, 2)).astype(jnp.float32).reshape(t * n, d)

    # Host-side weight packing (done once, outside the hot kernel).
    # Block-diagonal per-gate averaging matrix M (1/H within each HxH block).
    m_avg = jnp.kron(jnp.eye(4, dtype=jnp.float32),
                     jnp.full((HIDDEN, HIDDEN), 1.0 / HIDDEN, jnp.float32))
    center = jnp.eye(h4, dtype=jnp.float32) - m_avg   # folds LN mean-subtract
    wh_c = [params["Wh"][l] @ center for l in range(LAYER_NUM)]
    wx_c = [params["Wx"][l] @ center for l in range(LAYER_NUM)]
    b_c = (params["b"] @ center).reshape(LAYER_NUM, 1, h4)
    # gamma/beta as (1, 4H) lane vectors, gate-major order [in, forget, cell, out]
    # — must stay consistent with the 4H column order of Wh/Wx.
    ln_g = params["ln_g"].reshape(LAYER_NUM, 1, h4)
    ln_b = params["ln_b"].reshape(LAYER_NUM, 1, h4)
    fc_w_pad = jnp.zeros((HIDDEN, OUT_PAD), jnp.float32).at[:, :OUTPUT_DIM].set(
        params["fc_W"])
    fc_b_pad = jnp.full((1, OUT_PAD), NEG_BIG, jnp.float32).at[:, :OUTPUT_DIM].set(
        params["fc_b"])

    inputs = ([x_flat] + wh_c + wx_c
              + [b_c, ln_g, ln_b, m_avg, fc_w_pad, fc_b_pad])

    vmem = pl.BlockSpec(memory_space=pltpu.MemorySpace.VMEM)
    kernel = functools.partial(_lstm_kernel, LAYER_NUM, HIDDEN, t, n)
    out = pl.pallas_call(
        kernel,
        out_shape=jax.ShapeDtypeStruct((t * n, OUT_PAD), jnp.float32),
        in_specs=[vmem] * len(inputs),
        out_specs=vmem,
        scratch_shapes=[pltpu.VMEM((t * n, h4), jnp.float32),     # xproj per layer
                        pltpu.VMEM((t * n, HIDDEN), jnp.float32)],  # h sequence
    )(*inputs)

    probs = out.reshape(t, n, OUT_PAD)[:, :, :OUTPUT_DIM]          # (T, N, O)
    return jnp.transpose(probs, (1, 0, 2))                         # (N, T, O)


# ------------------------- pure-JAX reference forward -------------------------
def forward_ref(x, params):
    x_emb = data_trans(x, params)
    n, t, _ = x_emb.shape
    h = jnp.zeros((LAYER_NUM, n, HIDDEN), jnp.float32)
    c = jnp.zeros((LAYER_NUM, n, HIDDEN), jnp.float32)

    def ln(v, g, b):
        mu = v.mean(-1, keepdims=True)
        var = ((v - mu) ** 2).mean(-1, keepdims=True)
        return (v - mu) * jax.lax.rsqrt(var + LN_EPS) * g + b

    outs = []
    for step in range(t):
        xin = x_emb[:, step, :]
        new_h, new_c = [], []
        for i in range(LAYER_NUM):
            hx, cx = h[i], c[i]
            gates = hx @ params["Wh"][i] + xin @ params["Wx"][i] + params["b"][i]
            ig = jax.nn.sigmoid(ln(gates[:, :HIDDEN],
                                   params["ln_g"][i, 0], params["ln_b"][i, 0]))
            fg = jax.nn.sigmoid(ln(gates[:, HIDDEN:2 * HIDDEN],
                                   params["ln_g"][i, 1], params["ln_b"][i, 1]))
            cg = ln(gates[:, 2 * HIDDEN:3 * HIDDEN],
                    params["ln_g"][i, 2], params["ln_b"][i, 2])
            og = jax.nn.sigmoid(ln(gates[:, 3 * HIDDEN:4 * HIDDEN],
                                   params["ln_g"][i, 3], params["ln_b"][i, 3]))
            cc = cx * fg + ig * jnp.tanh(cg)
            hh = og * jnp.tanh(cc) + cg
            new_h.append(hh)
            new_c.append(cc)
            xin = hh
        h = jnp.stack(new_h)
        c = jnp.stack(new_c)
        outs.append(xin)
    o = jnp.stack(outs, axis=1)                                    # (N, T, H)
    logits = o @ params["fc_W"] + params["fc_b"][0]
    return jax.nn.softmax(logits, axis=-1)


# ------------------------------------ main ------------------------------------
if __name__ == "__main__":
    key = jax.random.PRNGKey(0)
    kp, kq, k0, k1 = jax.random.split(key, 4)
    params = init_params(kp)

    # Input: first QN_NUM columns are continuous, remaining QL_NUM are class ids.
    qn_part = jax.random.normal(kq, (BATCH, SEQ, QN_NUM), jnp.float32)
    ql0 = jax.random.randint(k0, (BATCH, SEQ, 1), 0, QL[0]).astype(jnp.float32)
    ql1 = jax.random.randint(k1, (BATCH, SEQ, 1), 0, QL[1]).astype(jnp.float32)
    x = jnp.concatenate([qn_part, ql0, ql1], axis=-1)              # (N, T, 5)

    x_emb = data_trans(x, params)                                  # (N, T, INPUT_DIM)
    out = lstm_forward_pallas(x_emb, params)                       # (N, T, OUTPUT_DIM)
    out = jax.block_until_ready(out)

    ref = forward_ref(x, params)
    # 1e-3: kernel folds the LN mean-subtract into the weights and uses the
    # EUP approx reciprocal (+ Newton step) in the epilogue, so the rounding
    # path differs slightly from the straightforward reference.
    if not jnp.allclose(out, ref, atol=1e-3, rtol=1e-3):
        raise AssertionError("Pallas output does not match pure-JAX reference")

    print("KERNEL_OK")
</pallas_src>

<mosaic_0001>
module attributes {stable_mosaic.version = 11 : i64} {
  func.func @_lstm_kernel(%arg0: memref<16x20xf32, #tpu.memory_space<vmem>>, %arg1: memref<32x128xf32, #tpu.memory_space<vmem>>, %arg2: memref<32x128xf32, #tpu.memory_space<vmem>>, %arg3: memref<20x128xf32, #tpu.memory_space<vmem>>, %arg4: memref<32x128xf32, #tpu.memory_space<vmem>>, %arg5: memref<2x1x128xf32, #tpu.memory_space<vmem>>, %arg6: memref<2x1x128xf32, #tpu.memory_space<vmem>>, %arg7: memref<2x1x128xf32, #tpu.memory_space<vmem>>, %arg8: memref<128x128xf32, #tpu.memory_space<vmem>>, %arg9: memref<32x128xf32, #tpu.memory_space<vmem>>, %arg10: memref<1x128xf32, #tpu.memory_space<vmem>>, %arg11: memref<16x128xf32, #tpu.memory_space<vmem>>, %arg12: memref<16x128xf32, #tpu.memory_space<vmem>>, %arg13: memref<16x32xf32, #tpu.memory_space<vmem>>) attributes {dimension_semantics = [], scalar_prefetch = 0 : i64, scratch_operands = 2 : i64, tpu.core_type = #tpu.core_type<tc>} {
    %c0 = arith.constant 0 : index
    %c0_0 = arith.constant 0 : index
    %0 = vector.load %arg8[%c0, %c0_0] : memref<128x128xf32, #tpu.memory_space<vmem>>, vector<128x128xf32>
    %c0_1 = arith.constant 0 : index
    %c0_2 = arith.constant 0 : index
    %1 = vector.load %arg1[%c0_1, %c0_2] : memref<32x128xf32, #tpu.memory_space<vmem>>, vector<32x128xf32>
    %c0_3 = arith.constant 0 : index
    %c0_4 = arith.constant 0 : index
    %2 = vector.load %arg3[%c0_3, %c0_4] : memref<20x128xf32, #tpu.memory_space<vmem>>, vector<20x128xf32>
    %c0_5 = arith.constant 0 : index
    %c0_6 = arith.constant 0 : index
    %c0_7 = arith.constant 0 : index
    %3 = vector.load %arg5[%c0_5, %c0_6, %c0_7] : memref<2x1x128xf32, #tpu.memory_space<vmem>>, vector<1x1x128xf32>
    %4 = vector.shape_cast %3 : vector<1x1x128xf32> to vector<1x128xf32>
    %c0_8 = arith.constant 0 : index
    %c0_9 = arith.constant 0 : index
    %c0_10 = arith.constant 0 : index
    %5 = vector.load %arg6[%c0_8, %c0_9, %c0_10] : memref<2x1x128xf32, #tpu.memory_space<vmem>>, vector<1x1x128xf32>
    %6 = vector.shape_cast %5 : vector<1x1x128xf32> to vector<1x128xf32>
    %7 = vector.shape_cast %6 : vector<1x128xf32> to vector<1x128xf32>
    %8 = vector.broadcast %7 : vector<1x128xf32> to vector<2x128xf32>
    %c0_11 = arith.constant 0 : index
    %c0_12 = arith.constant 0 : index
    %c0_13 = arith.constant 0 : index
    %9 = vector.load %arg7[%c0_11, %c0_12, %c0_13] : memref<2x1x128xf32, #tpu.memory_space<vmem>>, vector<1x1x128xf32>
    %10 = vector.shape_cast %9 : vector<1x1x128xf32> to vector<1x128xf32>
    %11 = vector.shape_cast %10 : vector<1x128xf32> to vector<1x128xf32>
    %12 = vector.broadcast %11 : vector<1x128xf32> to vector<2x128xf32>
    %c0_14 = arith.constant 0 : index
    %c0_15 = arith.constant 0 : index
    %13 = vector.load %arg0[%c0_14, %c0_15] : memref<16x20xf32, #tpu.memory_space<vmem>>, vector<16x20xf32>
    %cst = arith.constant dense<0.000000e+00> : vector<16x128xf32>
    %14 = tpu.matmul %13, %2, %cst {dimension_numbers = #tpu.dot_dimension_numbers<[1], [0], [0], [1], [0, 0, 1, 1], [], []>} : vector<16x20xf32>, vector<20x128xf32>, vector<16x128xf32> -> vector<16x128xf32>
    %15 = vector.broadcast %4 : vector<1x128xf32> to vector<16x128xf32>
    %16 = arith.addf %14, %15 : vector<16x128xf32>
    %c0_16 = arith.constant 0 : index
    %c0_17 = arith.constant 0 : index
    %17 = vector.load %arg12[%c0_16, %c0_17] : memref<16x128xf32, #tpu.memory_space<vmem>>, vector<16x128xf32>
    tpu.vector_store %arg12[%c0_16, %c0_17], %16 {strides = array<i32>} : memref<16x128xf32, #tpu.memory_space<vmem>>, vector<16x128xf32>,
    %cst_18 = arith.constant 0.000000e+00 : f32
    %18 = vector.broadcast %cst_18 : f32 to vector<2x32xf32>
    %cst_19 = arith.constant 0.000000e+00 : f32
    %19 = vector.broadcast %cst_19 : f32 to vector<2x32xf32>
    %cst_20 = arith.constant dense<0.000000e+00> : vector<2x128xf32>
    %20 = tpu.matmul %18, %1, %cst_20 {dimension_numbers = #tpu.dot_dimension_numbers<[1], [0], [0], [1], [0, 0, 1, 1], [], []>} : vector<2x32xf32>, vector<32x128xf32>, vector<2x128xf32> -> vector<2x128xf32>
    %c0_21 = arith.constant 0 : index
    %c0_22 = arith.constant 0 : index
    %21 = vector.load %arg12[%c0_21, %c0_22] : memref<16x128xf32, #tpu.memory_space<vmem>>, vector<2x128xf32>
    %22 = arith.addf %20, %21 : vector<2x128xf32>
    %23 = arith.mulf %22, %22 : vector<2x128xf32>
    %cst_23 = arith.constant dense<0.000000e+00> : vector<2x128xf32>
    %24 = tpu.matmul %23, %0, %cst_23 {dimension_numbers = #tpu.dot_dimension_numbers<[1], [0], [0], [1], [0, 0, 1, 1], [], []>} : vector<2x128xf32>, vector<128x128xf32>, vector<2x128xf32> -> vector<2x128xf32>
    %cst_24 = arith.constant 9.99999974E-6 : f32
    %25 = vector.broadcast %cst_24 : f32 to vector<2x128xf32>
    %26 = arith.addf %24, %25 : vector<2x128xf32>
    %27 = math.rsqrt %26 : vector<2x128xf32>
    %28 = arith.mulf %22, %27 : vector<2x128xf32>
    %29 = arith.mulf %28, %8 : vector<2x128xf32>
    %30 = arith.addf %29, %12 : vector<2x128xf32>
    %31 = arith.negf %30 : vector<2x128xf32>
    %32 = math.exp %31 : vector<2x128xf32>
    %cst_25 = arith.constant 1.000000e+00 : f32
    %33 = vector.broadcast %cst_25 : f32 to vector<2x128xf32>
    %34 = arith.addf %33, %32 : vector<2x128xf32>
    %35 = arith.divf %33, %34 : vector<2x128xf32>
    %36 = vector.extract_strided_slice %35 {offsets = [0, 0], sizes = [2, 32], strides = [1, 1]} : vector<2x128xf32> to vector<2x32xf32>
    %37 = vector.extract_strided_slice %35 {offsets = [0, 32], sizes = [2, 32], strides = [1, 1]} : vector<2x128xf32> to vector<2x32xf32>
    %38 = vector.extract_strided_slice %30 {offsets = [0, 64], sizes = [2, 32], strides = [1, 1]} : vector<2x128xf32> to vector<2x32xf32>
    %39 = vector.extract_strided_slice %35 {offsets = [0, 96], sizes = [2, 32], strides = [1, 1]} : vector<2x128xf32> to vector<2x32xf32>
    %40 = arith.mulf %19, %37 : vector<2x32xf32>
    %41 = math.tanh %38 : vector<2x32xf32>
    %42 = arith.mulf %36, %41 : vector<2x32xf32>
    %43 = arith.addf %40, %42 : vector<2x32xf32>
    %44 = math.tanh %43 : vector<2x32xf32>
    %45 = arith.mulf %39, %44 : vector<2x32xf32>
    %46 = arith.addf %45, %38 : vector<2x32xf32>
    %c0_26 = arith.constant 0 : index
    %c0_27 = arith.constant 0 : index
    %47 = vector.load %arg13[%c0_26, %c0_27] : memref<16x32xf32, #tpu.memory_space<vmem>>, vector<2x32xf32>
    tpu.vector_store %arg13[%c0_26, %c0_27], %46 {strides = array<i32>} : memref<16x32xf32, #tpu.memory_space<vmem>>, vector<2x32xf32>,
    %cst_28 = arith.constant dense<0.000000e+00> : vector<2x128xf32>
    %48 = tpu.matmul %46, %1, %cst_28 {dimension_numbers = #tpu.dot_dimension_numbers<[1], [0], [0], [1], [0, 0, 1, 1], [], []>} : vector<2x32xf32>, vector<32x128xf32>, vector<2x128xf32> -> vector<2x128xf32>
    %c2 = arith.constant 2 : index
    %c0_29 = arith.constant 0 : index
    %49 = vector.load %arg12[%c2, %c0_29] : memref<16x128xf32, #tpu.memory_space<vmem>>, vector<2x128xf32>
    %50 = arith.addf %48, %49 : vector<2x128xf32>
    %51 = arith.mulf %50, %50 : vector<2x128xf32>
    %cst_30 = arith.constant dense<0.000000e+00> : vector<2x128xf32>
    %52 = tpu.matmul %51, %0, %cst_30 {dimension_numbers = #tpu.dot_dimension_numbers<[1], [0], [0], [1], [0, 0, 1, 1], [], []>} : vector<2x128xf32>, vector<128x128xf32>, vector<2x128xf32> -> vector<2x128xf32>
    %cst_31 = arith.constant 9.99999974E-6 : f32
    %53 = vector.broadcast %cst_31 : f32 to vector<2x128xf32>
    %54 = arith.addf %52, %53 : vector<2x128xf32>
    %55 = math.rsqrt %54 : vector<2x128xf32>
    %56 = arith.mulf %50, %55 : vector<2x128xf32>
    %57 = arith.mulf %56, %8 : vector<2x128xf32>
    %58 = arith.addf %57, %12 : vector<2x128xf32>
    %59 = arith.negf %58 : vector<2x128xf32>
    %60 = math.exp %59 : vector<2x128xf32>
    %cst_32 = arith.constant 1.000000e+00 : f32
    %61 = vector.broadcast %cst_32 : f32 to vector<2x128xf32>
    %62 = arith.addf %61, %60 : vector<2x128xf32>
    %63 = arith.divf %61, %62 : vector<2x128xf32>
    %64 = vector.extract_strided_slice %63 {offsets = [0, 0], sizes = [2, 32], strides = [1, 1]} : vector<2x128xf32> to vector<2x32xf32>
    %65 = vector.extract_strided_slice %63 {offsets = [0, 32], sizes = [2, 32], strides = [1, 1]} : vector<2x128xf32> to vector<2x32xf32>
    %66 = vector.extract_strided_slice %58 {offsets = [0, 64], sizes = [2, 32], strides = [1, 1]} : vector<2x128xf32> to vector<2x32xf32>
    %67 = vector.extract_strided_slice %63 {offsets = [0, 96], sizes = [2, 32], strides = [1, 1]} : vector<2x128xf32> to vector<2x32xf32>
    %68 = arith.mulf %43, %65 : vector<2x32xf32>
    %69 = math.tanh %66 : vector<2x32xf32>
    %70 = arith.mulf %64, %69 : vector<2x32xf32>
    %71 = arith.addf %68, %70 : vector<2x32xf32>
    %72 = math.tanh %71 : vector<2x32xf32>
    %73 = arith.mulf %67, %72 : vector<2x32xf32>
    %74 = arith.addf %73, %66 : vector<2x32xf32>
    %c2_33 = arith.constant 2 : index
    %c0_34 = arith.constant 0 : index
    %75 = vector.load %arg13[%c2_33, %c0_34] : memref<16x32xf32, #tpu.memory_space<vmem>>, vector<2x32xf32>
    tpu.vector_store %arg13[%c2_33, %c0_34], %74 {strides = array<i32>} : memref<16x32xf32, #tpu.memory_space<vmem>>, vector<2x32xf32>,
    %cst_35 = arith.constant dense<0.000000e+00> : vector<2x128xf32>
    %76 = tpu.matmul %74, %1, %cst_35 {dimension_numbers = #tpu.dot_dimension_numbers<[1], [0], [0], [1], [0, 0, 1, 1], [], []>} : vector<2x32xf32>, vector<32x128xf32>, vector<2x128xf32> -> vector<2x128xf32>
    %c4 = arith.constant 4 : index
    %c0_36 = arith.constant 0 : index
    %77 = vector.load %arg12[%c4, %c0_36] : memref<16x128xf32, #tpu.memory_space<vmem>>, vector<2x128xf32>
    %78 = arith.addf %76, %77 : vector<2x128xf32>
    %79 = arith.mulf %78, %78 : vector<2x128xf32>
    %cst_37 = arith.constant dense<0.000000e+00> : vector<2x128xf32>
    %80 = tpu.matmul %79, %0, %cst_37 {dimension_numbers = #tpu.dot_dimension_numbers<[1], [0], [0], [1], [0, 0, 1, 1], [], []>} : vector<2x128xf32>, vector<128x128xf32>, vector<2x128xf32> -> vector<2x128xf32>
    %cst_38 = arith.constant 9.99999974E-6 : f32
    %81 = vector.broadcast %cst_38 : f32 to vector<2x128xf32>
    %82 = arith.addf %80, %81 : vector<2x128xf32>
    %83 = math.rsqrt %82 : vector<2x128xf32>
    %84 = arith.mulf %78, %83 : vector<2x128xf32>
    %85 = arith.mulf %84, %8 : vector<2x128xf32>
    %86 = arith.addf %85, %12 : vector<2x128xf32>
    %87 = arith.negf %86 : vector<2x128xf32>
    %88 = math.exp %87 : vector<2x128xf32>
    %cst_39 = arith.constant 1.000000e+00 : f32
    %89 = vector.broadcast %cst_39 : f32 to vector<2x128xf32>
    %90 = arith.addf %89, %88 : vector<2x128xf32>
    %91 = arith.divf %89, %90 : vector<2x128xf32>
    %92 = vector.extract_strided_slice %91 {offsets = [0, 0], sizes = [2, 32], strides = [1, 1]} : vector<2x128xf32> to vector<2x32xf32>
    %93 = vector.extract_strided_slice %91 {offsets = [0, 32], sizes = [2, 32], strides = [1, 1]} : vector<2x128xf32> to vector<2x32xf32>
    %94 = vector.extract_strided_slice %86 {offsets = [0, 64], sizes = [2, 32], strides = [1, 1]} : vector<2x128xf32> to vector<2x32xf32>
    %95 = vector.extract_strided_slice %91 {offsets = [0, 96], sizes = [2, 32], strides = [1, 1]} : vector<2x128xf32> to vector<2x32xf32>
    %96 = arith.mulf %71, %93 : vector<2x32xf32>
    %97 = math.tanh %94 : vector<2x32xf32>
    %98 = arith.mulf %92, %97 : vector<2x32xf32>
    %99 = arith.addf %96, %98 : vector<2x32xf32>
    %100 = math.tanh %99 : vector<2x32xf32>
    %101 = arith.mulf %95, %100 : vector<2x32xf32>
    %102 = arith.addf %101, %94 : vector<2x32xf32>
    %c4_40 = arith.constant 4 : index
    %c0_41 = arith.constant 0 : index
    %103 = vector.load %arg13[%c4_40, %c0_41] : memref<16x32xf32, #tpu.memory_space<vmem>>, vector<2x32xf32>
    tpu.vector_store %arg13[%c4_40, %c0_41], %102 {strides = array<i32>} : memref<16x32xf32, #tpu.memory_space<vmem>>, vector<2x32xf32>,
    %cst_42 = arith.constant dense<0.000000e+00> : vector<2x128xf32>
    %104 = tpu.matmul %102, %1, %cst_42 {dimension_numbers = #tpu.dot_dimension_numbers<[1], [0], [0], [1], [0, 0, 1, 1], [], []>} : vector<2x32xf32>, vector<32x128xf32>, vector<2x128xf32> -> vector<2x128xf32>
    %c6 = arith.constant 6 : index
    %c0_43 = arith.constant 0 : index
    %105 = vector.load %arg12[%c6, %c0_43] : memref<16x128xf32, #tpu.memory_space<vmem>>, vector<2x128xf32>
    %106 = arith.addf %104, %105 : vector<2x128xf32>
    %107 = arith.mulf %106, %106 : vector<2x128xf32>
    %cst_44 = arith.constant dense<0.000000e+00> : vector<2x128xf32>
    %108 = tpu.matmul %107, %0, %cst_44 {dimension_numbers = #tpu.dot_dimension_numbers<[1], [0], [0], [1], [0, 0, 1, 1], [], []>} : vector<2x128xf32>, vector<128x128xf32>, vector<2x128xf32> -> vector<2x128xf32>
    %cst_45 = arith.constant 9.99999974E-6 : f32
    %109 = vector.broadcast %cst_45 : f32 to vector<2x128xf32>
    %110 = arith.addf %108, %109 : vector<2x128xf32>
    %111 = math.rsqrt %110 : vector<2x128xf32>
    %112 = arith.mulf %106, %111 : vector<2x128xf32>
    %113 = arith.mulf %112, %8 : vector<2x128xf32>
    %114 = arith.addf %113, %12 : vector<2x128xf32>
    %115 = arith.negf %114 : vector<2x128xf32>
    %116 = math.exp %115 : vector<2x128xf32>
    %cst_46 = arith.constant 1.000000e+00 : f32
    %117 = vector.broadcast %cst_46 : f32 to vector<2x128xf32>
    %118 = arith.addf %117, %116 : vector<2x128xf32>
    %119 = arith.divf %117, %118 : vector<2x128xf32>
    %120 = vector.extract_strided_slice %119 {offsets = [0, 0], sizes = [2, 32], strides = [1, 1]} : vector<2x128xf32> to vector<2x32xf32>
    %121 = vector.extract_strided_slice %119 {offsets = [0, 32], sizes = [2, 32], strides = [1, 1]} : vector<2x128xf32> to vector<2x32xf32>
    %122 = vector.extract_strided_slice %114 {offsets = [0, 64], sizes = [2, 32], strides = [1, 1]} : vector<2x128xf32> to vector<2x32xf32>
    %123 = vector.extract_strided_slice %119 {offsets = [0, 96], sizes = [2, 32], strides = [1, 1]} : vector<2x128xf32> to vector<2x32xf32>
    %124 = arith.mulf %99, %121 : vector<2x32xf32>
    %125 = math.tanh %122 : vector<2x32xf32>
    %126 = arith.mulf %120, %125 : vector<2x32xf32>
    %127 = arith.addf %124, %126 : vector<2x32xf32>
    %128 = math.tanh %127 : vector<2x32xf32>
    %129 = arith.mulf %123, %128 : vector<2x32xf32>
    %130 = arith.addf %129, %122 : vector<2x32xf32>
    %c6_47 = arith.constant 6 : index
    %c0_48 = arith.constant 0 : index
    %131 = vector.load %arg13[%c6_47, %c0_48] : memref<16x32xf32, #tpu.memory_space<vmem>>, vector<2x32xf32>
    tpu.vector_store %arg13[%c6_47, %c0_48], %130 {strides = array<i32>} : memref<16x32xf32, #tpu.memory_space<vmem>>, vector<2x32xf32>,
    %cst_49 = arith.constant dense<0.000000e+00> : vector<2x128xf32>
    %132 = tpu.matmul %130, %1, %cst_49 {dimension_numbers = #tpu.dot_dimension_numbers<[1], [0], [0], [1], [0, 0, 1, 1], [], []>} : vector<2x32xf32>, vector<32x128xf32>, vector<2x128xf32> -> vector<2x128xf32>
    %c8 = arith.constant 8 : index
    %c0_50 = arith.constant 0 : index
    %133 = vector.load %arg12[%c8, %c0_50] : memref<16x128xf32, #tpu.memory_space<vmem>>, vector<2x128xf32>
    %134 = arith.addf %132, %133 : vector<2x128xf32>
    %135 = arith.mulf %134, %134 : vector<2x128xf32>
    %cst_51 = arith.constant dense<0.000000e+00> : vector<2x128xf32>
    %136 = tpu.matmul %135, %0, %cst_51 {dimension_numbers = #tpu.dot_dimension_numbers<[1], [0], [0], [1], [0, 0, 1, 1], [], []>} : vector<2x128xf32>, vector<128x128xf32>, vector<2x128xf32> -> vector<2x128xf32>
    %cst_52 = arith.constant 9.99999974E-6 : f32
    %137 = vector.broadcast %cst_52 : f32 to vector<2x128xf32>
    %138 = arith.addf %136, %137 : vector<2x128xf32>
    %139 = math.rsqrt %138 : vector<2x128xf32>
    %140 = arith.mulf %134, %139 : vector<2x128xf32>
    %141 = arith.mulf %140, %8 : vector<2x128xf32>
    %142 = arith.addf %141, %12 : vector<2x128xf32>
    %143 = arith.negf %142 : vector<2x128xf32>
    %144 = math.exp %143 : vector<2x128xf32>
    %cst_53 = arith.constant 1.000000e+00 : f32
    %145 = vector.broadcast %cst_53 : f32 to vector<2x128xf32>
    %146 = arith.addf %145, %144 : vector<2x128xf32>
    %147 = arith.divf %145, %146 : vector<2x128xf32>
    %148 = vector.extract_strided_slice %147 {offsets = [0, 0], sizes = [2, 32], strides = [1, 1]} : vector<2x128xf32> to vector<2x32xf32>
    %149 = vector.extract_strided_slice %147 {offsets = [0, 32], sizes = [2, 32], strides = [1, 1]} : vector<2x128xf32> to vector<2x32xf32>
    %150 = vector.extract_strided_slice %142 {offsets = [0, 64], sizes = [2, 32], strides = [1, 1]} : vector<2x128xf32> to vector<2x32xf32>
    %151 = vector.extract_strided_slice %147 {offsets = [0, 96], sizes = [2, 32], strides = [1, 1]} : vector<2x128xf32> to vector<2x32xf32>
    %152 = arith.mulf %127, %149 : vector<2x32xf32>
    %153 = math.tanh %150 : vector<2x32xf32>
    %154 = arith.mulf %148, %153 : vector<2x32xf32>
    %155 = arith.addf %152, %154 : vector<2x32xf32>
    %156 = math.tanh %155 : vector<2x32xf32>
    %157 = arith.mulf %151, %156 : vector<2x32xf32>
    %158 = arith.addf %157, %150 : vector<2x32xf32>
    %c8_54 = arith.constant 8 : index
    %c0_55 = arith.constant 0 : index
    %159 = vector.load %arg13[%c8_54, %c0_55] : memref<16x32xf32, #tpu.memory_space<vmem>>, vector<2x32xf32>
    tpu.vector_store %arg13[%c8_54, %c0_55], %158 {strides = array<i32>} : memref<16x32xf32, #tpu.memory_space<vmem>>, vector<2x32xf32>,
    %cst_56 = arith.constant dense<0.000000e+00> : vector<2x128xf32>
    %160 = tpu.matmul %158, %1, %cst_56 {dimension_numbers = #tpu.dot_dimension_numbers<[1], [0], [0], [1], [0, 0, 1, 1], [], []>} : vector<2x32xf32>, vector<32x128xf32>, vector<2x128xf32> -> vector<2x128xf32>
    %c10 = arith.constant 10 : index
    %c0_57 = arith.constant 0 : index
    %161 = vector.load %arg12[%c10, %c0_57] : memref<16x128xf32, #tpu.memory_space<vmem>>, vector<2x128xf32>
    %162 = arith.addf %160, %161 : vector<2x128xf32>
    %163 = arith.mulf %162, %162 : vector<2x128xf32>
    %cst_58 = arith.constant dense<0.000000e+00> : vector<2x128xf32>
    %164 = tpu.matmul %163, %0, %cst_58 {dimension_numbers = #tpu.dot_dimension_numbers<[1], [0], [0], [1], [0, 0, 1, 1], [], []>} : vector<2x128xf32>, vector<128x128xf32>, vector<2x128xf32> -> vector<2x128xf32>
    %cst_59 = arith.constant 9.99999974E-6 : f32
    %165 = vector.broadcast %cst_59 : f32 to vector<2x128xf32>
    %166 = arith.addf %164, %165 : vector<2x128xf32>
    %167 = math.rsqrt %166 : vector<2x128xf32>
    %168 = arith.mulf %162, %167 : vector<2x128xf32>
    %169 = arith.mulf %168, %8 : vector<2x128xf32>
    %170 = arith.addf %169, %12 : vector<2x128xf32>
    %171 = arith.negf %170 : vector<2x128xf32>
    %172 = math.exp %171 : vector<2x128xf32>
    %cst_60 = arith.constant 1.000000e+00 : f32
    %173 = vector.broadcast %cst_60 : f32 to vector<2x128xf32>
    %174 = arith.addf %173, %172 : vector<2x128xf32>
    %175 = arith.divf %173, %174 : vector<2x128xf32>
    %176 = vector.extract_strided_slice %175 {offsets = [0, 0], sizes = [2, 32], strides = [1, 1]} : vector<2x128xf32> to vector<2x32xf32>
    %177 = vector.extract_strided_slice %175 {offsets = [0, 32], sizes = [2, 32], strides = [1, 1]} : vector<2x128xf32> to vector<2x32xf32>
    %178 = vector.extract_strided_slice %170 {offsets = [0, 64], sizes = [2, 32], strides = [1, 1]} : vector<2x128xf32> to vector<2x32xf32>
    %179 = vector.extract_strided_slice %175 {offsets = [0, 96], sizes = [2, 32], strides = [1, 1]} : vector<2x128xf32> to vector<2x32xf32>
    %180 = arith.mulf %155, %177 : vector<2x32xf32>
    %181 = math.tanh %178 : vector<2x32xf32>
    %182 = arith.mulf %176, %181 : vector<2x32xf32>
    %183 = arith.addf %180, %182 : vector<2x32xf32>
    %184 = math.tanh %183 : vector<2x32xf32>
    %185 = arith.mulf %179, %184 : vector<2x32xf32>
    %186 = arith.addf %185, %178 : vector<2x32xf32>
    %c10_61 = arith.constant 10 : index
    %c0_62 = arith.constant 0 : index
    %187 = vector.load %arg13[%c10_61, %c0_62] : memref<16x32xf32, #tpu.memory_space<vmem>>, vector<2x32xf32>
    tpu.vector_store %arg13[%c10_61, %c0_62], %186 {strides = array<i32>} : memref<16x32xf32, #tpu.memory_space<vmem>>, vector<2x32xf32>,
    %cst_63 = arith.constant dense<0.000000e+00> : vector<2x128xf32>
    %188 = tpu.matmul %186, %1, %cst_63 {dimension_numbers = #tpu.dot_dimension_numbers<[1], [0], [0], [1], [0, 0, 1, 1], [], []>} : vector<2x32xf32>, vector<32x128xf32>, vector<2x128xf32> -> vector<2x128xf32>
    %c12 = arith.constant 12 : index
    %c0_64 = arith.constant 0 : index
    %189 = vector.load %arg12[%c12, %c0_64] : memref<16x128xf32, #tpu.memory_space<vmem>>, vector<2x128xf32>
    %190 = arith.addf %188, %189 : vector<2x128xf32>
    %191 = arith.mulf %190, %190 : vector<2x128xf32>
    %cst_65 = arith.constant dense<0.000000e+00> : vector<2x128xf32>
    %192 = tpu.matmul %191, %0, %cst_65 {dimension_numbers = #tpu.dot_dimension_numbers<[1], [0], [0], [1], [0, 0, 1, 1], [], []>} : vector<2x128xf32>, vector<128x128xf32>, vector<2x128xf32> -> vector<2x128xf32>
    %cst_66 = arith.constant 9.99999974E-6 : f32
    %193 = vector.broadcast %cst_66 : f32 to vector<2x128xf32>
    %194 = arith.addf %192, %193 : vector<2x128xf32>
    %195 = math.rsqrt %194 : vector<2x128xf32>
    %196 = arith.mulf %190, %195 : vector<2x128xf32>
    %197 = arith.mulf %196, %8 : vector<2x128xf32>
    %198 = arith.addf %197, %12 : vector<2x128xf32>
    %199 = arith.negf %198 : vector<2x128xf32>
    %200 = math.exp %199 : vector<2x128xf32>
    %cst_67 = arith.constant 1.000000e+00 : f32
    %201 = vector.broadcast %cst_67 : f32 to vector<2x128xf32>
    %202 = arith.addf %201, %200 : vector<2x128xf32>
    %203 = arith.divf %201, %202 : vector<2x128xf32>
    %204 = vector.extract_strided_slice %203 {offsets = [0, 0], sizes = [2, 32], strides = [1, 1]} : vector<2x128xf32> to vector<2x32xf32>
    %205 = vector.extract_strided_slice %203 {offsets = [0, 32], sizes = [2, 32], strides = [1, 1]} : vector<2x128xf32> to vector<2x32xf32>
    %206 = vector.extract_strided_slice %198 {offsets = [0, 64], sizes = [2, 32], strides = [1, 1]} : vector<2x128xf32> to vector<2x32xf32>
    %207 = vector.extract_strided_slice %203 {offsets = [0, 96], sizes = [2, 32], strides = [1, 1]} : vector<2x128xf32> to vector<2x32xf32>
    %208 = arith.mulf %183, %205 : vector<2x32xf32>
    %209 = math.tanh %206 : vector<2x32xf32>
    %210 = arith.mulf %204, %209 : vector<2x32xf32>
    %211 = arith.addf %208, %210 : vector<2x32xf32>
    %212 = math.tanh %211 : vector<2x32xf32>
    %213 = arith.mulf %207, %212 : vector<2x32xf32>
    %214 = arith.addf %213, %206 : vector<2x32xf32>
    %c12_68 = arith.constant 12 : index
    %c0_69 = arith.constant 0 : index
    %215 = vector.load %arg13[%c12_68, %c0_69] : memref<16x32xf32, #tpu.memory_space<vmem>>, vector<2x32xf32>
    tpu.vector_store %arg13[%c12_68, %c0_69], %214 {strides = array<i32>} : memref<16x32xf32, #tpu.memory_space<vmem>>, vector<2x32xf32>,
    %cst_70 = arith.constant dense<0.000000e+00> : vector<2x128xf32>
    %216 = tpu.matmul %214, %1, %cst_70 {dimension_numbers = #tpu.dot_dimension_numbers<[1], [0], [0], [1], [0, 0, 1, 1], [], []>} : vector<2x32xf32>, vector<32x128xf32>, vector<2x128xf32> -> vector<2x128xf32>
    %c14 = arith.constant 14 : index
    %c0_71 = arith.constant 0 : index
    %217 = vector.load %arg12[%c14, %c0_71] : memref<16x128xf32, #tpu.memory_space<vmem>>, vector<2x128xf32>
    %218 = arith.addf %216, %217 : vector<2x128xf32>
    %219 = arith.mulf %218, %218 : vector<2x128xf32>
    %cst_72 = arith.constant dense<0.000000e+00> : vector<2x128xf32>
    %220 = tpu.matmul %219, %0, %cst_72 {dimension_numbers = #tpu.dot_dimension_numbers<[1], [0], [0], [1], [0, 0, 1, 1], [], []>} : vector<2x128xf32>, vector<128x128xf32>, vector<2x128xf32> -> vector<2x128xf32>
    %cst_73 = arith.constant 9.99999974E-6 : f32
    %221 = vector.broadcast %cst_73 : f32 to vector<2x128xf32>
    %222 = arith.addf %220, %221 : vector<2x128xf32>
    %223 = math.rsqrt %222 : vector<2x128xf32>
    %224 = arith.mulf %218, %223 : vector<2x128xf32>
    %225 = arith.mulf %224, %8 : vector<2x128xf32>
    %226 = arith.addf %225, %12 : vector<2x128xf32>
    %227 = arith.negf %226 : vector<2x128xf32>
    %228 = math.exp %227 : vector<2x128xf32>
    %cst_74 = arith.constant 1.000000e+00 : f32
    %229 = vector.broadcast %cst_74 : f32 to vector<2x128xf32>
    %230 = arith.addf %229, %228 : vector<2x128xf32>
    %231 = arith.divf %229, %230 : vector<2x128xf32>
    %232 = vector.extract_strided_slice %231 {offsets = [0, 0], sizes = [2, 32], strides = [1, 1]} : vector<2x128xf32> to vector<2x32xf32>
    %233 = vector.extract_strided_slice %231 {offsets = [0, 32], sizes = [2, 32], strides = [1, 1]} : vector<2x128xf32> to vector<2x32xf32>
    %234 = vector.extract_strided_slice %226 {offsets = [0, 64], sizes = [2, 32], strides = [1, 1]} : vector<2x128xf32> to vector<2x32xf32>
    %235 = vector.extract_strided_slice %231 {offsets = [0, 96], sizes = [2, 32], strides = [1, 1]} : vector<2x128xf32> to vector<2x32xf32>
    %236 = arith.mulf %211, %233 : vector<2x32xf32>
    %237 = math.tanh %234 : vector<2x32xf32>
    %238 = arith.mulf %232, %237 : vector<2x32xf32>
    %239 = arith.addf %236, %238 : vector<2x32xf32>
    %240 = math.tanh %239 : vector<2x32xf32>
    %241 = arith.mulf %235, %240 : vector<2x32xf32>
    %242 = arith.addf %241, %234 : vector<2x32xf32>
    %c14_75 = arith.constant 14 : index
    %c0_76 = arith.constant 0 : index
    %243 = vector.load %arg13[%c14_75, %c0_76] : memref<16x32xf32, #tpu.memory_space<vmem>>, vector<2x32xf32>
    tpu.vector_store %arg13[%c14_75, %c0_76], %242 {strides = array<i32>} : memref<16x32xf32, #tpu.memory_space<vmem>>, vector<2x32xf32>,
    %c0_77 = arith.constant 0 : index
    %c0_78 = arith.constant 0 : index
    %244 = vector.load %arg2[%c0_77, %c0_78] : memref<32x128xf32, #tpu.memory_space<vmem>>, vector<32x128xf32>
    %c0_79 = arith.constant 0 : index
    %c0_80 = arith.constant 0 : index
    %245 = vector.load %arg4[%c0_79, %c0_80] : memref<32x128xf32, #tpu.memory_space<vmem>>, vector<32x128xf32>
    %c1 = arith.constant 1 : index
    %c0_81 = arith.constant 0 : index
    %c0_82 = arith.constant 0 : index
    %246 = vector.load %arg5[%c1, %c0_81, %c0_82] : memref<2x1x128xf32, #tpu.memory_space<vmem>>, vector<1x1x128xf32>
    %247 = vector.shape_cast %246 : vector<1x1x128xf32> to vector<1x128xf32>
    %c1_83 = arith.constant 1 : index
    %c0_84 = arith.constant 0 : index
    %c0_85 = arith.constant 0 : index
    %248 = vector.load %arg6[%c1_83, %c0_84, %c0_85] : memref<2x1x128xf32, #tpu.memory_space<vmem>>, vector<1x1x128xf32>
    %249 = vector.shape_cast %248 : vector<1x1x128xf32> to vector<1x128xf32>
    %250 = vector.shape_cast %249 : vector<1x128xf32> to vector<1x128xf32>
    %251 = vector.broadcast %250 : vector<1x128xf32> to vector<2x128xf32>
    %c1_86 = arith.constant 1 : index
    %c0_87 = arith.constant 0 : index
    %c0_88 = arith.constant 0 : index
    %252 = vector.load %arg7[%c1_86, %c0_87, %c0_88] : memref<2x1x128xf32, #tpu.memory_space<vmem>>, vector<1x1x128xf32>
    %253 = vector.shape_cast %252 : vector<1x1x128xf32> to vector<1x128xf32>
    %254 = vector.shape_cast %253 : vector<1x128xf32> to vector<1x128xf32>
    %255 = vector.broadcast %254 : vector<1x128xf32> to vector<2x128xf32>
    %c0_89 = arith.constant 0 : index
    %c0_90 = arith.constant 0 : index
    %256 = vector.load %arg13[%c0_89, %c0_90] : memref<16x32xf32, #tpu.memory_space<vmem>>, vector<16x32xf32>
    %cst_91 = arith.constant dense<0.000000e+00> : vector<16x128xf32>
    %257 = tpu.matmul %256, %245, %cst_91 {dimension_numbers = #tpu.dot_dimension_numbers<[1], [0], [0], [1], [0, 0, 1, 1], [], []>} : vector<16x32xf32>, vector<32x128xf32>, vector<16x128xf32> -> vector<16x128xf32>
    %258 = vector.broadcast %247 : vector<1x128xf32> to vector<16x128xf32>
    %259 = arith.addf %257, %258 : vector<16x128xf32>
    %c0_92 = arith.constant 0 : index
    %c0_93 = arith.constant 0 : index
    %260 = vector.load %arg12[%c0_92, %c0_93] : memref<16x128xf32, #tpu.memory_space<vmem>>, vector<16x128xf32>
    tpu.vector_store %arg12[%c0_92, %c0_93], %259 {strides = array<i32>} : memref<16x128xf32, #tpu.memory_space<vmem>>, vector<16x128xf32>,
    %cst_94 = arith.constant 0.000000e+00 : f32
    %261 = vector.broadcast %cst_94 : f32 to vector<2x32xf32>
    %cst_95 = arith.constant 0.000000e+00 : f32
    %262 = vector.broadcast %cst_95 : f32 to vector<2x32xf32>
    %cst_96 = arith.constant dense<0.000000e+00> : vector<2x128xf32>
    %263 = tpu.matmul %261, %244, %cst_96 {dimension_numbers = #tpu.dot_dimension_numbers<[1], [0], [0], [1], [0, 0, 1, 1], [], []>} : vector<2x32xf32>, vector<32x128xf32>, vector<2x128xf32> -> vector<2x128xf32>
    %c0_97 = arith.constant 0 : index
    %c0_98 = arith.constant 0 : index
    %264 = vector.load %arg12[%c0_97, %c0_98] : memref<16x128xf32, #tpu.memory_space<vmem>>, vector<2x128xf32>
    %265 = arith.addf %263, %264 : vector<2x128xf32>
    %266 = arith.mulf %265, %265 : vector<2x128xf32>
    %cst_99 = arith.constant dense<0.000000e+00> : vector<2x128xf32>
    %267 = tpu.matmul %266, %0, %cst_99 {dimension_numbers = #tpu.dot_dimension_numbers<[1], [0], [0], [1], [0, 0, 1, 1], [], []>} : vector<2x128xf32>, vector<128x128xf32>, vector<2x128xf32> -> vector<2x128xf32>
    %cst_100 = arith.constant 9.99999974E-6 : f32
    %268 = vector.broadcast %cst_100 : f32 to vector<2x128xf32>
    %269 = arith.addf %267, %268 : vector<2x128xf32>
    %270 = math.rsqrt %269 : vector<2x128xf32>
    %271 = arith.mulf %265, %270 : vector<2x128xf32>
    %272 = arith.mulf %271, %251 : vector<2x128xf32>
    %273 = arith.addf %272, %255 : vector<2x128xf32>
    %274 = arith.negf %273 : vector<2x128xf32>
    %275 = math.exp %274 : vector<2x128xf32>
    %cst_101 = arith.constant 1.000000e+00 : f32
    %276 = vector.broadcast %cst_101 : f32 to vector<2x128xf32>
    %277 = arith.addf %276, %275 : vector<2x128xf32>
    %278 = arith.divf %276, %277 : vector<2x128xf32>
    %279 = vector.extract_strided_slice %278 {offsets = [0, 0], sizes = [2, 32], strides = [1, 1]} : vector<2x128xf32> to vector<2x32xf32>
    %280 = vector.extract_strided_slice %278 {offsets = [0, 32], sizes = [2, 32], strides = [1, 1]} : vector<2x128xf32> to vector<2x32xf32>
    %281 = vector.extract_strided_slice %273 {offsets = [0, 64], sizes = [2, 32], strides = [1, 1]} : vector<2x128xf32> to vector<2x32xf32>
    %282 = vector.extract_strided_slice %278 {offsets = [0, 96], sizes = [2, 32], strides = [1, 1]} : vector<2x128xf32> to vector<2x32xf32>
    %283 = arith.mulf %262, %280 : vector<2x32xf32>
    %284 = math.tanh %281 : vector<2x32xf32>
    %285 = arith.mulf %279, %284 : vector<2x32xf32>
    %286 = arith.addf %283, %285 : vector<2x32xf32>
    %287 = math.tanh %286 : vector<2x32xf32>
    %288 = arith.mulf %282, %287 : vector<2x32xf32>
    %289 = arith.addf %288, %281 : vector<2x32xf32>
    %c0_102 = arith.constant 0 : index
    %c0_103 = arith.constant 0 : index
    %290 = vector.load %arg13[%c0_102, %c0_103] : memref<16x32xf32, #tpu.memory_space<vmem>>, vector<2x32xf32>
    tpu.vector_store %arg13[%c0_102, %c0_103], %289 {strides = array<i32>} : memref<16x32xf32, #tpu.memory_space<vmem>>, vector<2x32xf32>,
    %cst_104 = arith.constant dense<0.000000e+00> : vector<2x128xf32>
    %291 = tpu.matmul %289, %244, %cst_104 {dimension_numbers = #tpu.dot_dimension_numbers<[1], [0], [0], [1], [0, 0, 1, 1], [], []>} : vector<2x32xf32>, vector<32x128xf32>, vector<2x128xf32> -> vector<2x128xf32>
    %c2_105 = arith.constant 2 : index
    %c0_106 = arith.constant 0 : index
    %292 = vector.load %arg12[%c2_105, %c0_106] : memref<16x128xf32, #tpu.memory_space<vmem>>, vector<2x128xf32>
    %293 = arith.addf %291, %292 : vector<2x128xf32>
    %294 = arith.mulf %293, %293 : vector<2x128xf32>
    %cst_107 = arith.constant dense<0.000000e+00> : vector<2x128xf32>
    %295 = tpu.matmul %294, %0, %cst_107 {dimension_numbers = #tpu.dot_dimension_numbers<[1], [0], [0], [1], [0, 0, 1, 1], [], []>} : vector<2x128xf32>, vector<128x128xf32>, vector<2x128xf32> -> vector<2x128xf32>
    %cst_108 = arith.constant 9.99999974E-6 : f32
    %296 = vector.broadcast %cst_108 : f32 to vector<2x128xf32>
    %297 = arith.addf %295, %296 : vector<2x128xf32>
    %298 = math.rsqrt %297 : vector<2x128xf32>
    %299 = arith.mulf %293, %298 : vector<2x128xf32>
    %300 = arith.mulf %299, %251 : vector<2x128xf32>
    %301 = arith.addf %300, %255 : vector<2x128xf32>
    %302 = arith.negf %301 : vector<2x128xf32>
    %303 = math.exp %302 : vector<2x128xf32>
    %cst_109 = arith.constant 1.000000e+00 : f32
    %304 = vector.broadcast %cst_109 : f32 to vector<2x128xf32>
    %305 = arith.addf %304, %303 : vector<2x128xf32>
    %306 = arith.divf %304, %305 : vector<2x128xf32>
    %307 = vector.extract_strided_slice %306 {offsets = [0, 0], sizes = [2, 32], strides = [1, 1]} : vector<2x128xf32> to vector<2x32xf32>
    %308 = vector.extract_strided_slice %306 {offsets = [0, 32], sizes = [2, 32], strides = [1, 1]} : vector<2x128xf32> to vector<2x32xf32>
    %309 = vector.extract_strided_slice %301 {offsets = [0, 64], sizes = [2, 32], strides = [1, 1]} : vector<2x128xf32> to vector<2x32xf32>
    %310 = vector.extract_strided_slice %306 {offsets = [0, 96], sizes = [2, 32], strides = [1, 1]} : vector<2x128xf32> to vector<2x32xf32>
    %311 = arith.mulf %286, %308 : vector<2x32xf32>
    %312 = math.tanh %309 : vector<2x32xf32>
    %313 = arith.mulf %307, %312 : vector<2x32xf32>
    %314 = arith.addf %311, %313 : vector<2x32xf32>
    %315 = math.tanh %314 : vector<2x32xf32>
    %316 = arith.mulf %310, %315 : vector<2x32xf32>
    %317 = arith.addf %316, %309 : vector<2x32xf32>
    %c2_110 = arith.constant 2 : index
    %c0_111 = arith.constant 0 : index
    %318 = vector.load %arg13[%c2_110, %c0_111] : memref<16x32xf32, #tpu.memory_space<vmem>>, vector<2x32xf32>
    tpu.vector_store %arg13[%c2_110, %c0_111], %317 {strides = array<i32>} : memref<16x32xf32, #tpu.memory_space<vmem>>, vector<2x32xf32>,
    %cst_112 = arith.constant dense<0.000000e+00> : vector<2x128xf32>
    %319 = tpu.matmul %317, %244, %cst_112 {dimension_numbers = #tpu.dot_dimension_numbers<[1], [0], [0], [1], [0, 0, 1, 1], [], []>} : vector<2x32xf32>, vector<32x128xf32>, vector<2x128xf32> -> vector<2x128xf32>
    %c4_113 = arith.constant 4 : index
    %c0_114 = arith.constant 0 : index
    %320 = vector.load %arg12[%c4_113, %c0_114] : memref<16x128xf32, #tpu.memory_space<vmem>>, vector<2x128xf32>
    %321 = arith.addf %319, %320 : vector<2x128xf32>
    %322 = arith.mulf %321, %321 : vector<2x128xf32>
    %cst_115 = arith.constant dense<0.000000e+00> : vector<2x128xf32>
    %323 = tpu.matmul %322, %0, %cst_115 {dimension_numbers = #tpu.dot_dimension_numbers<[1], [0], [0], [1], [0, 0, 1, 1], [], []>} : vector<2x128xf32>, vector<128x128xf32>, vector<2x128xf32> -> vector<2x128xf32>
    %cst_116 = arith.constant 9.99999974E-6 : f32
    %324 = vector.broadcast %cst_116 : f32 to vector<2x128xf32>
    %325 = arith.addf %323, %324 : vector<2x128xf32>
    %326 = math.rsqrt %325 : vector<2x128xf32>
    %327 = arith.mulf %321, %326 : vector<2x128xf32>
    %328 = arith.mulf %327, %251 : vector<2x128xf32>
    %329 = arith.addf %328, %255 : vector<2x128xf32>
    %330 = arith.negf %329 : vector<2x128xf32>
    %331 = math.exp %330 : vector<2x128xf32>
    %cst_117 = arith.constant 1.000000e+00 : f32
    %332 = vector.broadcast %cst_117 : f32 to vector<2x128xf32>
    %333 = arith.addf %332, %331 : vector<2x128xf32>
    %334 = arith.divf %332, %333 : vector<2x128xf32>
    %335 = vector.extract_strided_slice %334 {offsets = [0, 0], sizes = [2, 32], strides = [1, 1]} : vector<2x128xf32> to vector<2x32xf32>
    %336 = vector.extract_strided_slice %334 {offsets = [0, 32], sizes = [2, 32], strides = [1, 1]} : vector<2x128xf32> to vector<2x32xf32>
    %337 = vector.extract_strided_slice %329 {offsets = [0, 64], sizes = [2, 32], strides = [1, 1]} : vector<2x128xf32> to vector<2x32xf32>
    %338 = vector.extract_strided_slice %334 {offsets = [0, 96], sizes = [2, 32], strides = [1, 1]} : vector<2x128xf32> to vector<2x32xf32>
    %339 = arith.mulf %314, %336 : vector<2x32xf32>
    %340 = math.tanh %337 : vector<2x32xf32>
    %341 = arith.mulf %335, %340 : vector<2x32xf32>
    %342 = arith.addf %339, %341 : vector<2x32xf32>
    %343 = math.tanh %342 : vector<2x32xf32>
    %344 = arith.mulf %338, %343 : vector<2x32xf32>
    %345 = arith.addf %344, %337 : vector<2x32xf32>
    %c4_118 = arith.constant 4 : index
    %c0_119 = arith.constant 0 : index
    %346 = vector.load %arg13[%c4_118, %c0_119] : memref<16x32xf32, #tpu.memory_space<vmem>>, vector<2x32xf32>
    tpu.vector_store %arg13[%c4_118, %c0_119], %345 {strides = array<i32>} : memref<16x32xf32, #tpu.memory_space<vmem>>, vector<2x32xf32>,
    %cst_120 = arith.constant dense<0.000000e+00> : vector<2x128xf32>
    %347 = tpu.matmul %345, %244, %cst_120 {dimension_numbers = #tpu.dot_dimension_numbers<[1], [0], [0], [1], [0, 0, 1, 1], [], []>} : vector<2x32xf32>, vector<32x128xf32>, vector<2x128xf32> -> vector<2x128xf32>
    %c6_121 = arith.constant 6 : index
    %c0_122 = arith.constant 0 : index
    %348 = vector.load %arg12[%c6_121, %c0_122] : memref<16x128xf32, #tpu.memory_space<vmem>>, vector<2x128xf32>
    %349 = arith.addf %347, %348 : vector<2x128xf32>
    %350 = arith.mulf %349, %349 : vector<2x128xf32>
    %cst_123 = arith.constant dense<0.000000e+00> : vector<2x128xf32>
    %351 = tpu.matmul %350, %0, %cst_123 {dimension_numbers = #tpu.dot_dimension_numbers<[1], [0], [0], [1], [0, 0, 1, 1], [], []>} : vector<2x128xf32>, vector<128x128xf32>, vector<2x128xf32> -> vector<2x128xf32>
    %cst_124 = arith.constant 9.99999974E-6 : f32
    %352 = vector.broadcast %cst_124 : f32 to vector<2x128xf32>
    %353 = arith.addf %351, %352 : vector<2x128xf32>
    %354 = math.rsqrt %353 : vector<2x128xf32>
    %355 = arith.mulf %349, %354 : vector<2x128xf32>
    %356 = arith.mulf %355, %251 : vector<2x128xf32>
    %357 = arith.addf %356, %255 : vector<2x128xf32>
    %358 = arith.negf %357 : vector<2x128xf32>
    %359 = math.exp %358 : vector<2x128xf32>
    %cst_125 = arith.constant 1.000000e+00 : f32
    %360 = vector.broadcast %cst_125 : f32 to vector<2x128xf32>
    %361 = arith.addf %360, %359 : vector<2x128xf32>
    %362 = arith.divf %360, %361 : vector<2x128xf32>
    %363 = vector.extract_strided_slice %362 {offsets = [0, 0], sizes = [2, 32], strides = [1, 1]} : vector<2x128xf32> to vector<2x32xf32>
    %364 = vector.extract_strided_slice %362 {offsets = [0, 32], sizes = [2, 32], strides = [1, 1]} : vector<2x128xf32> to vector<2x32xf32>
    %365 = vector.extract_strided_slice %357 {offsets = [0, 64], sizes = [2, 32], strides = [1, 1]} : vector<2x128xf32> to vector<2x32xf32>
    %366 = vector.extract_strided_slice %362 {offsets = [0, 96], sizes = [2, 32], strides = [1, 1]} : vector<2x128xf32> to vector<2x32xf32>
    %367 = arith.mulf %342, %364 : vector<2x32xf32>
    %368 = math.tanh %365 : vector<2x32xf32>
    %369 = arith.mulf %363, %368 : vector<2x32xf32>
    %370 = arith.addf %367, %369 : vector<2x32xf32>
    %371 = math.tanh %370 : vector<2x32xf32>
    %372 = arith.mulf %366, %371 : vector<2x32xf32>
    %373 = arith.addf %372, %365 : vector<2x32xf32>
    %c6_126 = arith.constant 6 : index
    %c0_127 = arith.constant 0 : index
    %374 = vector.load %arg13[%c6_126, %c0_127] : memref<16x32xf32, #tpu.memory_space<vmem>>, vector<2x32xf32>
    tpu.vector_store %arg13[%c6_126, %c0_127], %373 {strides = array<i32>} : memref<16x32xf32, #tpu.memory_space<vmem>>, vector<2x32xf32>,
    %cst_128 = arith.constant dense<0.000000e+00> : vector<2x128xf32>
    %375 = tpu.matmul %373, %244, %cst_128 {dimension_numbers = #tpu.dot_dimension_numbers<[1], [0], [0], [1], [0, 0, 1, 1], [], []>} : vector<2x32xf32>, vector<32x128xf32>, vector<2x128xf32> -> vector<2x128xf32>
    %c8_129 = arith.constant 8 : index
    %c0_130 = arith.constant 0 : index
    %376 = vector.load %arg12[%c8_129, %c0_130] : memref<16x128xf32, #tpu.memory_space<vmem>>, vector<2x128xf32>
    %377 = arith.addf %375, %376 : vector<2x128xf32>
    %378 = arith.mulf %377, %377 : vector<2x128xf32>
    %cst_131 = arith.constant dense<0.000000e+00> : vector<2x128xf32>
    %379 = tpu.matmul %378, %0, %cst_131 {dimension_numbers = #tpu.dot_dimension_numbers<[1], [0], [0], [1], [0, 0, 1, 1], [], []>} : vector<2x128xf32>, vector<128x128xf32>, vector<2x128xf32> -> vector<2x128xf32>
    %cst_132 = arith.constant 9.99999974E-6 : f32
    %380 = vector.broadcast %cst_132 : f32 to vector<2x128xf32>
    %381 = arith.addf %379, %380 : vector<2x128xf32>
    %382 = math.rsqrt %381 : vector<2x128xf32>
    %383 = arith.mulf %377, %382 : vector<2x128xf32>
    %384 = arith.mulf %383, %251 : vector<2x128xf32>
    %385 = arith.addf %384, %255 : vector<2x128xf32>
    %386 = arith.negf %385 : vector<2x128xf32>
    %387 = math.exp %386 : vector<2x128xf32>
    %cst_133 = arith.constant 1.000000e+00 : f32
    %388 = vector.broadcast %cst_133 : f32 to vector<2x128xf32>
    %389 = arith.addf %388, %387 : vector<2x128xf32>
    %390 = arith.divf %388, %389 : vector<2x128xf32>
    %391 = vector.extract_strided_slice %390 {offsets = [0, 0], sizes = [2, 32], strides = [1, 1]} : vector<2x128xf32> to vector<2x32xf32>
    %392 = vector.extract_strided_slice %390 {offsets = [0, 32], sizes = [2, 32], strides = [1, 1]} : vector<2x128xf32> to vector<2x32xf32>
    %393 = vector.extract_strided_slice %385 {offsets = [0, 64], sizes = [2, 32], strides = [1, 1]} : vector<2x128xf32> to vector<2x32xf32>
    %394 = vector.extract_strided_slice %390 {offsets = [0, 96], sizes = [2, 32], strides = [1, 1]} : vector<2x128xf32> to vector<2x32xf32>
    %395 = arith.mulf %370, %392 : vector<2x32xf32>
    %396 = math.tanh %393 : vector<2x32xf32>
    %397 = arith.mulf %391, %396 : vector<2x32xf32>
    %398 = arith.addf %395, %397 : vector<2x32xf32>
    %399 = math.tanh %398 : vector<2x32xf32>
    %400 = arith.mulf %394, %399 : vector<2x32xf32>
    %401 = arith.addf %400, %393 : vector<2x32xf32>
    %c8_134 = arith.constant 8 : index
    %c0_135 = arith.constant 0 : index
    %402 = vector.load %arg13[%c8_134, %c0_135] : memref<16x32xf32, #tpu.memory_space<vmem>>, vector<2x32xf32>
    tpu.vector_store %arg13[%c8_134, %c0_135], %401 {strides = array<i32>} : memref<16x32xf32, #tpu.memory_space<vmem>>, vector<2x32xf32>,
    %cst_136 = arith.constant dense<0.000000e+00> : vector<2x128xf32>
    %403 = tpu.matmul %401, %244, %cst_136 {dimension_numbers = #tpu.dot_dimension_numbers<[1], [0], [0], [1], [0, 0, 1, 1], [], []>} : vector<2x32xf32>, vector<32x128xf32>, vector<2x128xf32> -> vector<2x128xf32>
    %c10_137 = arith.constant 10 : index
    %c0_138 = arith.constant 0 : index
    %404 = vector.load %arg12[%c10_137, %c0_138] : memref<16x128xf32, #tpu.memory_space<vmem>>, vector<2x128xf32>
    %405 = arith.addf %403, %404 : vector<2x128xf32>
    %406 = arith.mulf %405, %405 : vector<2x128xf32>
    %cst_139 = arith.constant dense<0.000000e+00> : vector<2x128xf32>
    %407 = tpu.matmul %406, %0, %cst_139 {dimension_numbers = #tpu.dot_dimension_numbers<[1], [0], [0], [1], [0, 0, 1, 1], [], []>} : vector<2x128xf32>, vector<128x128xf32>, vector<2x128xf32> -> vector<2x128xf32>
    %cst_140 = arith.constant 9.99999974E-6 : f32
    %408 = vector.broadcast %cst_140 : f32 to vector<2x128xf32>
    %409 = arith.addf %407, %408 : vector<2x128xf32>
    %410 = math.rsqrt %409 : vector<2x128xf32>
    %411 = arith.mulf %405, %410 : vector<2x128xf32>
    %412 = arith.mulf %411, %251 : vector<2x128xf32>
    %413 = arith.addf %412, %255 : vector<2x128xf32>
    %414 = arith.negf %413 : vector<2x128xf32>
    %415 = math.exp %414 : vector<2x128xf32>
    %cst_141 = arith.constant 1.000000e+00 : f32
    %416 = vector.broadcast %cst_141 : f32 to vector<2x128xf32>
    %417 = arith.addf %416, %415 : vector<2x128xf32>
    %418 = arith.divf %416, %417 : vector<2x128xf32>
    %419 = vector.extract_strided_slice %418 {offsets = [0, 0], sizes = [2, 32], strides = [1, 1]} : vector<2x128xf32> to vector<2x32xf32>
    %420 = vector.extract_strided_slice %418 {offsets = [0, 32], sizes = [2, 32], strides = [1, 1]} : vector<2x128xf32> to vector<2x32xf32>
    %421 = vector.extract_strided_slice %413 {offsets = [0, 64], sizes = [2, 32], strides = [1, 1]} : vector<2x128xf32> to vector<2x32xf32>
    %422 = vector.extract_strided_slice %418 {offsets = [0, 96], sizes = [2, 32], strides = [1, 1]} : vector<2x128xf32> to vector<2x32xf32>
    %423 = arith.mulf %398, %420 : vector<2x32xf32>
    %424 = math.tanh %421 : vector<2x32xf32>
    %425 = arith.mulf %419, %424 : vector<2x32xf32>
    %426 = arith.addf %423, %425 : vector<2x32xf32>
    %427 = math.tanh %426 : vector<2x32xf32>
    %428 = arith.mulf %422, %427 : vector<2x32xf32>
    %429 = arith.addf %428, %421 : vector<2x32xf32>
    %c10_142 = arith.constant 10 : index
    %c0_143 = arith.constant 0 : index
    %430 = vector.load %arg13[%c10_142, %c0_143] : memref<16x32xf32, #tpu.memory_space<vmem>>, vector<2x32xf32>
    tpu.vector_store %arg13[%c10_142, %c0_143], %429 {strides = array<i32>} : memref<16x32xf32, #tpu.memory_space<vmem>>, vector<2x32xf32>,
    %cst_144 = arith.constant dense<0.000000e+00> : vector<2x128xf32>
    %431 = tpu.matmul %429, %244, %cst_144 {dimension_numbers = #tpu.dot_dimension_numbers<[1], [0], [0], [1], [0, 0, 1, 1], [], []>} : vector<2x32xf32>, vector<32x128xf32>, vector<2x128xf32> -> vector<2x128xf32>
    %c12_145 = arith.constant 12 : index
    %c0_146 = arith.constant 0 : index
    %432 = vector.load %arg12[%c12_145, %c0_146] : memref<16x128xf32, #tpu.memory_space<vmem>>, vector<2x128xf32>
    %433 = arith.addf %431, %432 : vector<2x128xf32>
    %434 = arith.mulf %433, %433 : vector<2x128xf32>
    %cst_147 = arith.constant dense<0.000000e+00> : vector<2x128xf32>
    %435 = tpu.matmul %434, %0, %cst_147 {dimension_numbers = #tpu.dot_dimension_numbers<[1], [0], [0], [1], [0, 0, 1, 1], [], []>} : vector<2x128xf32>, vector<128x128xf32>, vector<2x128xf32> -> vector<2x128xf32>
    %cst_148 = arith.constant 9.99999974E-6 : f32
    %436 = vector.broadcast %cst_148 : f32 to vector<2x128xf32>
    %437 = arith.addf %435, %436 : vector<2x128xf32>
    %438 = math.rsqrt %437 : vector<2x128xf32>
    %439 = arith.mulf %433, %438 : vector<2x128xf32>
    %440 = arith.mulf %439, %251 : vector<2x128xf32>
    %441 = arith.addf %440, %255 : vector<2x128xf32>
    %442 = arith.negf %441 : vector<2x128xf32>
    %443 = math.exp %442 : vector<2x128xf32>
    %cst_149 = arith.constant 1.000000e+00 : f32
    %444 = vector.broadcast %cst_149 : f32 to vector<2x128xf32>
    %445 = arith.addf %444, %443 : vector<2x128xf32>
    %446 = arith.divf %444, %445 : vector<2x128xf32>
    %447 = vector.extract_strided_slice %446 {offsets = [0, 0], sizes = [2, 32], strides = [1, 1]} : vector<2x128xf32> to vector<2x32xf32>
    %448 = vector.extract_strided_slice %446 {offsets = [0, 32], sizes = [2, 32], strides = [1, 1]} : vector<2x128xf32> to vector<2x32xf32>
    %449 = vector.extract_strided_slice %441 {offsets = [0, 64], sizes = [2, 32], strides = [1, 1]} : vector<2x128xf32> to vector<2x32xf32>
    %450 = vector.extract_strided_slice %446 {offsets = [0, 96], sizes = [2, 32], strides = [1, 1]} : vector<2x128xf32> to vector<2x32xf32>
    %451 = arith.mulf %426, %448 : vector<2x32xf32>
    %452 = math.tanh %449 : vector<2x32xf32>
    %453 = arith.mulf %447, %452 : vector<2x32xf32>
    %454 = arith.addf %451, %453 : vector<2x32xf32>
    %455 = math.tanh %454 : vector<2x32xf32>
    %456 = arith.mulf %450, %455 : vector<2x32xf32>
    %457 = arith.addf %456, %449 : vector<2x32xf32>
    %c12_150 = arith.constant 12 : index
    %c0_151 = arith.constant 0 : index
    %458 = vector.load %arg13[%c12_150, %c0_151] : memref<16x32xf32, #tpu.memory_space<vmem>>, vector<2x32xf32>
    tpu.vector_store %arg13[%c12_150, %c0_151], %457 {strides = array<i32>} : memref<16x32xf32, #tpu.memory_space<vmem>>, vector<2x32xf32>,
    %cst_152 = arith.constant dense<0.000000e+00> : vector<2x128xf32>
    %459 = tpu.matmul %457, %244, %cst_152 {dimension_numbers = #tpu.dot_dimension_numbers<[1], [0], [0], [1], [0, 0, 1, 1], [], []>} : vector<2x32xf32>, vector<32x128xf32>, vector<2x128xf32> -> vector<2x128xf32>
    %c14_153 = arith.constant 14 : index
    %c0_154 = arith.constant 0 : index
    %460 = vector.load %arg12[%c14_153, %c0_154] : memref<16x128xf32, #tpu.memory_space<vmem>>, vector<2x128xf32>
    %461 = arith.addf %459, %460 : vector<2x128xf32>
    %462 = arith.mulf %461, %461 : vector<2x128xf32>
    %cst_155 = arith.constant dense<0.000000e+00> : vector<2x128xf32>
    %463 = tpu.matmul %462, %0, %cst_155 {dimension_numbers = #tpu.dot_dimension_numbers<[1], [0], [0], [1], [0, 0, 1, 1], [], []>} : vector<2x128xf32>, vector<128x128xf32>, vector<2x128xf32> -> vector<2x128xf32>
    %cst_156 = arith.constant 9.99999974E-6 : f32
    %464 = vector.broadcast %cst_156 : f32 to vector<2x128xf32>
    %465 = arith.addf %463, %464 : vector<2x128xf32>
    %466 = math.rsqrt %465 : vector<2x128xf32>
    %467 = arith.mulf %461, %466 : vector<2x128xf32>
    %468 = arith.mulf %467, %251 : vector<2x128xf32>
    %469 = arith.addf %468, %255 : vector<2x128xf32>
    %470 = arith.negf %469 : vector<2x128xf32>
    %471 = math.exp %470 : vector<2x128xf32>
    %cst_157 = arith.constant 1.000000e+00 : f32
    %472 = vector.broadcast %cst_157 : f32 to vector<2x128xf32>
    %473 = arith.addf %472, %471 : vector<2x128xf32>
    %474 = arith.divf %472, %473 : vector<2x128xf32>
    %475 = vector.extract_strided_slice %474 {offsets = [0, 0], sizes = [2, 32], strides = [1, 1]} : vector<2x128xf32> to vector<2x32xf32>
    %476 = vector.extract_strided_slice %474 {offsets = [0, 32], sizes = [2, 32], strides = [1, 1]} : vector<2x128xf32> to vector<2x32xf32>
    %477 = vector.extract_strided_slice %469 {offsets = [0, 64], sizes = [2, 32], strides = [1, 1]} : vector<2x128xf32> to vector<2x32xf32>
    %478 = vector.extract_strided_slice %474 {offsets = [0, 96], sizes = [2, 32], strides = [1, 1]} : vector<2x128xf32> to vector<2x32xf32>
    %479 = arith.mulf %454, %476 : vector<2x32xf32>
    %480 = math.tanh %477 : vector<2x32xf32>
    %481 = arith.mulf %475, %480 : vector<2x32xf32>
    %482 = arith.addf %479, %481 : vector<2x32xf32>
    %483 = math.tanh %482 : vector<2x32xf32>
    %484 = arith.mulf %478, %483 : vector<2x32xf32>
    %485 = arith.addf %484, %477 : vector<2x32xf32>
    %c14_158 = arith.constant 14 : index
    %c0_159 = arith.constant 0 : index
    %486 = vector.load %arg13[%c14_158, %c0_159] : memref<16x32xf32, #tpu.memory_space<vmem>>, vector<2x32xf32>
    tpu.vector_store %arg13[%c14_158, %c0_159], %485 {strides = array<i32>} : memref<16x32xf32, #tpu.memory_space<vmem>>, vector<2x32xf32>,
    %c0_160 = arith.constant 0 : index
    %c0_161 = arith.constant 0 : index
    %487 = vector.load %arg13[%c0_160, %c0_161] : memref<16x32xf32, #tpu.memory_space<vmem>>, vector<16x32xf32>
    %c0_162 = arith.constant 0 : index
    %c0_163 = arith.constant 0 : index
    %488 = vector.load %arg9[%c0_162, %c0_163] : memref<32x128xf32, #tpu.memory_space<vmem>>, vector<32x128xf32>
    %cst_164 = arith.constant dense<0.000000e+00> : vector<16x128xf32>
    %489 = tpu.matmul %487, %488, %cst_164 {dimension_numbers = #tpu.dot_dimension_numbers<[1], [0], [0], [1], [0, 0, 1, 1], [], []>} : vector<16x32xf32>, vector<32x128xf32>, vector<16x128xf32> -> vector<16x128xf32>
    %c0_165 = arith.constant 0 : index
    %c0_166 = arith.constant 0 : index
    %490 = vector.load %arg10[%c0_165, %c0_166] : memref<1x128xf32, #tpu.memory_space<vmem>>, vector<1x128xf32>
    %491 = vector.broadcast %490 : vector<1x128xf32> to vector<16x128xf32>
    %492 = arith.addf %489, %491 : vector<16x128xf32>
    %cst_167 = arith.constant dense<0xFF800000> : vector<16xf32>
    %493 = vector.multi_reduction <maximumf>, %492, %cst_167 [1] : vector<16x128xf32> to vector<16xf32>
    %494 = vector.shape_cast %493 : vector<16xf32> to vector<16x1xf32>
    %495 = vector.broadcast %494 : vector<16x1xf32> to vector<16x128xf32>
    %496 = arith.subf %492, %495 : vector<16x128xf32>
    %497 = math.exp %496 : vector<16x128xf32>
    %cst_168 = arith.constant dense<0.000000e+00> : vector<16xf32>
    %498 = vector.multi_reduction <add>, %497, %cst_168 [1] : vector<16x128xf32> to vector<16xf32>
    %499 = vector.shape_cast %498 : vector<16xf32> to vector<16x1xf32>
    %500 = tpu.reciprocal %499 {approx = true} : vector<16x1xf32> -> vector<16x1xf32>
    %501 = arith.mulf %499, %500 : vector<16x1xf32>
    %cst_169 = arith.constant 2.000000e+00 : f32
    %502 = vector.broadcast %cst_169 : f32 to vector<16x1xf32>
    %503 = arith.subf %502, %501 : vector<16x1xf32>
    %504 = arith.mulf %500, %503 : vector<16x1xf32>
    %505 = vector.broadcast %504 : vector<16x1xf32> to vector<16x128xf32>
    %506 = arith.mulf %497, %505 : vector<16x128xf32>
    %c0_170 = arith.constant 0 : index
    %c0_171 = arith.constant 0 : index
    %507 = vector.load %arg11[%c0_170, %c0_171] : memref<16x128xf32, #tpu.memory_space<vmem>>, vector<16x128xf32>
    tpu.vector_store %arg11[%c0_170, %c0_171], %506 {strides = array<i32>} : memref<16x128xf32, #tpu.memory_space<vmem>>, vector<16x128xf32>,
    return
  }
}

</mosaic_0001>

<bundles_post_ra>
// kernel: tpu_custom_call.1
= control target key start
LH: loop header
LB: loop body
LE: loop exit
PB: predicated region body
PF: predicated region fallthrough
CT: control target
= control target key end

     0   :  { %16 = vsyncpa [#allocation5], 0  ;;  %s6190_s0 = inlined_call_operand.hbm [shape: f32[16,20], index: 0, kind: input, shape index: {}]   ;;  %s6191_s1 = inlined_call_operand.hbm [shape: f32[32,128], index: 1, kind: input, shape index: {}]   ;;  %s6192_s2 = inlined_call_operand.hbm [shape: f32[32,128], index: 2, kind: input, shape index: {}]   ;;  %s6193_s3 = inlined_call_operand.hbm [shape: f32[20,128], index: 3, kind: input, shape index: {}]   ;;  %s6194_s4 = inlined_call_operand.hbm [shape: f32[32,128], index: 4, kind: input, shape index: {}]   ;;  %s6195_s5 = inlined_call_operand.vmem [shape: f32[2,1,128], index: 5, kind: input, shape index: {}]   ;;  %s6196_s6 = inlined_call_operand.vmem [shape: f32[2,1,128], index: 6, kind: input, shape index: {}]   ;;  %s6197_s7 = inlined_call_operand.vmem [shape: f32[2,1,128], index: 7, kind: input, shape index: {}]   ;;  %s6198_s8 = inlined_call_operand.hbm [shape: f32[128,128], index: 8, kind: input, shape index: {}]   ;;  %s6199_s9 = inlined_call_operand.hbm [shape: f32[32,128], index: 9, kind: input, shape index: {}]   ;;  %s6200_s10 = inlined_call_operand.vmem [shape: f32[1,128], index: 10, kind: input, shape index: {}]   ;;  %s6201_s11 = inlined_call_operand.hbm [shape: f32[16,128], index: 11, kind: output, shape index: {}]  }
   0x1   :  { %17 = vsyncpa [#allocation8], 0 }
   0x2   :  { %18 = vsyncpa [#allocation11], 0 }
   0x3   :  { %19 = vsyncpa [#allocation14], 0 }
   0x4   :  { %20 = vsyncpa [#allocation6], 0  ;;  %s5011_s17 = smov [#allocation7]   ;;  %s5012_s19 = smov [#allocation10]  }
   0x5   :  { %s38_s18 = sshll.u32 %s5011_s17, 4  ;;  %s62_s20 = sshll.u32 %s5012_s19, 4  ;;  %s39_s18 = int_to_ptr.vmem [resolvable:$true] %s38_s18  ;;  %s63_s20 = int_to_ptr.vmem [resolvable:$true] %s62_s20 }
   0x6   :  { %s4849_s21 = scalar_lea.vmem %s39_s18, 512  ;;  %p4854_p1 = scmp.lt.s32.totalorder %s39_s18, %s39_s18 }
   0x7   :  { %p4850_p0 = scmp.ne.s32.totalorder %s39_s18, %s4849_s21  ;;  %p4855_p2 = scmp.lt.s32.totalorder %s4849_s21, %s4849_s21 }
   0x9   :  { %p4856_p3 = por %p4855_p2, %p4854_p1 }
   0xb   :  { %p4857_p4 = pnand %p4856_p3, %p4850_p0 }
   0xd   :  { %4860 = shalt.err (!%p4857_p4)
}
   0xe   :  { %s5013_s22 = smov 128   ;;  %s5014_s23 = smov 8  }
   0xf   :  { %44 = dma.hbm_to_vmem [thread:$0]  %s6191_s1, 512, %s39_s18, [#allocation8], %s5013_s22, %s5013_s22, %s5014_s23  }
  0x10   :  { %s4869_s26 = scalar_lea.vmem %s63_s20, 384  ;;  %p4874_p6 = scmp.lt.s32.totalorder %s63_s20, %s63_s20 }
  0x11   :  { %p4870_p5 = scmp.ne.s32.totalorder %s63_s20, %s4869_s26  ;;  %p4875_p7 = scmp.lt.s32.totalorder %s4869_s26, %s4869_s26 }
  0x13   :  { %p4876_p8 = por %p4875_p7, %p4874_p6 }
  0x15   :  { %p4877_p9 = pnand %p4876_p8, %p4870_p5 }
  0x17   :  { %4880 = shalt.err (!%p4877_p9)
}
  0x18   :  { %68 = dma.hbm_to_vmem [thread:$0]  %s6193_s3, 384, %s63_s20, [#allocation11], %s5013_s22, %s5013_s22, %s5014_s23  }
  0x19   :  { %s5015_s29 = smov [#allocation13]   ;;  %s5016_s12 = smov [#allocation4]  }
  0x1a   :  { %s92_s30 = sshll.u32 %s5015_s29, 4  ;;  %s26_s13 = sshll.u32 %s5016_s12, 4  ;;  %s93_s30 = int_to_ptr.vmem [resolvable:$true] %s92_s30  ;;  %s27_s13 = int_to_ptr.vmem [resolvable:$true] %s26_s13 }
  0x1b   :  { %s4889_s1 = scalar_lea.vmem %s93_s30, 2048  ;;  %p4894_p11 = scmp.lt.s32.totalorder %s93_s30, %s93_s30 }
  0x1c   :  { %p4890_p10 = scmp.ne.s32.totalorder %s93_s30, %s4889_s1  ;;  %p4895_p12 = scmp.lt.s32.totalorder %s4889_s1, %s4889_s1 }
  0x1e   :  { %p4896_p13 = por %p4895_p12, %p4894_p11 }
  0x20   :  { %p4897_p0 = pnand %p4896_p13, %p4890_p10 }
  0x22   :  { %4900 = shalt.err (!%p4897_p0)
}
  0x23   :  { %98 = dma.hbm_to_vmem [thread:$0]  %s6198_s8, 2048, %s93_s30, [#allocation14], %s5013_s22, %s5013_s22, %s5014_s23  }
  0x24   :  { %s4909_s3 = scalar_lea.vmem %s27_s13, 256  ;;  %p4914_p2 = scmp.lt.s32.totalorder %s27_s13, %s27_s13 }
  0x25   :  { %p4910_p1 = scmp.ne.s32.totalorder %s27_s13, %s4909_s3  ;;  %p4915_p3 = scmp.lt.s32.totalorder %s4909_s3, %s4909_s3 }
  0x27   :  { %p4916_p4 = por %p4915_p3, %p4914_p2 }
  0x29   :  { %p4917_p5 = pnand %p4916_p4, %p4910_p1 }
  0x2b   :  { %4920 = shalt.err (!%p4917_p5)
}
  0x2c   :  { %32 = dma.hbm_to_vmem [thread:$0]  %s6190_s0, 256, %s27_s13, [#allocation5], %s5013_s22, %s5013_s22, %s5014_s23  }
  0x2d   :  { %s5017_s18 = smov [#allocation9]   ;;  %s5018_s20 = smov [#allocation12]  }
  0x2e   :  { %s50_s19 = sshll.u32 %s5017_s18, 4  ;;  %s74_s21 = sshll.u32 %s5018_s20, 4  ;;  %s51_s19 = int_to_ptr.vmem [resolvable:$true] %s50_s19  ;;  %s75_s21 = int_to_ptr.vmem [resolvable:$true] %s74_s21 }
  0x2f   :  { %s4929_s8 = scalar_lea.vmem %s51_s19, 512  ;;  %p4934_p7 = scmp.lt.s32.totalorder %s51_s19, %s51_s19 }
  0x30   :  { %p4930_p6 = scmp.ne.s32.totalorder %s51_s19, %s4929_s8  ;;  %p4935_p8 = scmp.lt.s32.totalorder %s4929_s8, %s4929_s8 }
  0x32   :  { %p4936_p9 = por %p4935_p8, %p4934_p7 }
  0x34   :  { %p4937_p10 = pnand %p4936_p9, %p4930_p6 }
  0x36   :  { %4940 = shalt.err (!%p4937_p10)
}
  0x37   :  { %56 = dma.hbm_to_vmem [thread:$0]  %s6192_s2, 512, %s51_s19, [#allocation8], %s5013_s22, %s5013_s22, %s5014_s23  }
  0x38   :  { %s4949_s0 = scalar_lea.vmem %s75_s21, 512  ;;  %p4954_p12 = scmp.lt.s32.totalorder %s75_s21, %s75_s21 }
  0x39   :  { %p4950_p11 = scmp.ne.s32.totalorder %s75_s21, %s4949_s0  ;;  %p4955_p13 = scmp.lt.s32.totalorder %s4949_s0, %s4949_s0 }
  0x3b   :  { %p4956_p0 = por %p4955_p13, %p4954_p12 }
  0x3d   :  { %p4957_p1 = pnand %p4956_p0, %p4950_p11 }
  0x3f   :  { %4960 = shalt.err (!%p4957_p1)
}
  0x40   :  { %80 = dma.hbm_to_vmem [thread:$0]  %s6194_s4, 512, %s75_s21, [#allocation11], %s5013_s22, %s5013_s22, %s5014_s23  }
  0x41   :  { %s5019_s28 = smov [#allocation15]  }
  0x42   :  { %s104_s29 = sshll.u32 %s5019_s28, 4  ;;  %s105_s29 = int_to_ptr.vmem [resolvable:$true] %s104_s29 }
  0x43   :  { %s4969_s30 = scalar_lea.vmem %s105_s29, 512  ;;  %p4974_p3 = scmp.lt.s32.totalorder %s105_s29, %s105_s29 }
  0x44   :  { %p4970_p2 = scmp.ne.s32.totalorder %s105_s29, %s4969_s30  ;;  %p4975_p4 = scmp.lt.s32.totalorder %s4969_s30, %s4969_s30 }
  0x46   :  { %p4976_p5 = por %p4975_p4, %p4974_p3 }
  0x48   :  { %p4977_p6 = pnand %p4976_p5, %p4970_p2 }
  0x4a   :  { %4980 = shalt.err (!%p4977_p6)
}
  0x4b   :  { %110 = dma.hbm_to_vmem [thread:$0]  %s6199_s9, 512, %s105_s29, [#allocation14], %s5013_s22, %s5013_s22, %s5014_s23  }
  0x4c   :  { %5001 = dma.done.wait [#allocation5], 256  }
  0x4d   :  { %5002 = vsyncadd [#allocation5], 4294967040 }
  0x4e   :  { %5003 = dma.done.wait [#allocation8], 1024  }
  0x4f   :  { %5004 = vsyncadd [#allocation8], 4294966272 }
  0x50   :  { %5005 = dma.done.wait [#allocation11], 896  }
  0x51   :  { %5006 = vsyncadd [#allocation11], 4294966400 }
  0x52   :  { %5007 = dma.done.wait [#allocation14], 2560  }
  0x53   :  { %5008 = vsyncadd [#allocation14], 4294964736  ;;  %v5020_v0 = vmov 0.0   ;;  %vm5021_vm0 = vmmov 0   ;;  %vm187_vm1 = vcmask 1043456   ;;  %vm180_vm2 = vcmask 162816  }
  0x54   :  { %3863 = vmatprep.subr.mxu1 %v5020_v0  ;;  %3871 = vmatprep.mubr.msk.f32.mxu1 %vm5021_vm0, %v5020_v0  ;;  %v156_v1 = vld [vmem:[#allocation10 + $0x10] sm:$0xf]  ;;  %v155_v2 = vld [vmem:[#allocation10 + $0x8] sm:$0xff]  ;;  %v5130_v4 = vld [vmem:[#allocation7 + $0x18] sm:$0xff]  ;;  %s5022_s3 = smov 64   ;;  %s5023_s16 = smov 32  }
  0x55   :  { %3854 = vmatprep.subr.msk.mxu0 %vm187_vm1, %v156_v1  ;;  %v172_v3 = vld [vmem:[#allocation4] sm:$0xff]  ;;  %v154_v5 = vld [vmem:[#allocation10] sm:$0xff]  ;;  %3864 = vmatpush3.msra.mxu1 %v5130_v4  ;;  %v173_v7 = vld [vmem:[#allocation4 + $0x8] sm:$0xff]  ;;  %vm451_vm3 = vcmask 254976   ;;  %vm269_vm4 = vcmask 261120  }
  0x56   :  { %3855 = vmatpush3.msk.msra.mxu0 %vm187_vm1, %v156_v1  ;;  %3860 = vmatprep.mubr.msk.f32.mxu0 %vm180_vm2, %v172_v3  ;;  %v5133_v6 = vld [vmem:[#allocation7 + $0x10] sm:$0xff]  ;;  %v5137_v8 = vld [vmem:[#allocation7 + $0x8] sm:$0xff]  ;;  %v5141_v9 = vld [vmem:[#allocation7] sm:$0xff] }
  0x57   :  { %3856 = vmatprep.subr.mxu0 %v155_v2  ;;  %3865 = vmatprep.subr.mxu1 %v5020_v0  ;;  %v5143_v10 = vld [vmem:[#allocation13 + $0x78] sm:$0xff]  ;;  %v5149_v11 = vld [vmem:[#allocation13 + $0x70] sm:$0xff]  ;;  %v5155_v12 = vld [vmem:[#allocation13 + $0x68] sm:$0xff] }
  0x58   :  { %3857 = vmatpush3.msra.mxu0 %v155_v2  ;;  %3866 = vmatpush3.msra.mxu1 %v5133_v6  ;;  %v5161_v13 = vld [vmem:[#allocation13 + $0x60] sm:$0xff]  ;;  %v5167_v14 = vld [vmem:[#allocation13 + $0x58] sm:$0xff]  ;;  %v5173_v15 = vld [vmem:[#allocation13 + $0x50] sm:$0xff] }
  0x59   :  { %3858 = vmatprep.subr.mxu0 %v154_v5  ;;  %3867 = vmatprep.subr.mxu1 %v5020_v0  ;;  %v5179_v16 = vld [vmem:[#allocation13 + $0x48] sm:$0xff]  ;;  %v5190_v17 = vld [vmem:[#allocation13 + $0x40] sm:$0xff]  ;;  %v5194_v18 = vld [vmem:[#allocation13 + $0x38] sm:$0xff] }
  0x5a   :  { %3859 = vmatpush3.msra.mxu0 %v154_v5  ;;  %3868 = vmatpush3.msra.mxu1 %v5137_v8  ;;  %v5198_v19 = vld [vmem:[#allocation13 + $0x30] sm:$0xff]  ;;  %v5202_v20 = vld [vmem:[#allocation13 + $0x28] sm:$0xff]  ;;  %v5204_v21 = vld [vmem:[#allocation13 + $0x20] sm:$0xff] }
  0x5b   :  { %3861 = vmatmul.mubr.msk.f32.vlgmr.msra.gmra.mxu0 %vm180_vm2, %v173_v7  ;;  %3869 = vmatprep.subr.mxu1 %v5020_v0  ;;  %v5210_v22 = vld [vmem:[#allocation13 + $0x18] sm:$0xff]  ;;  %v5214_v23 = vld [vmem:[#allocation13 + $0x10] sm:$0xff]  ;;  %v5218_v24 = vld [vmem:[#allocation13 + $0x8] sm:$0xff] }
  0x5c   :  { %3874 = vmatprep.subr.mxu0 %v5020_v0  ;;  %3870 = vmatpush3.msra.mxu1 %v5141_v9  ;;  %v5222_v25 = vld [vmem:[#allocation13] sm:$0xff]  ;;  %v3440_v26 = vld [vmem:[%s6195_s5] ss:$0 sm:$0xff] }
  0x5d   :  { %3875 = vmatpush3.msra.mxu0 %v5143_v10  ;;  %3872 = vmatmul.mubr.f32.vlgmr.msra.gmra.mxu1 %v5020_v0  ;;  %v5242_v40 = vld [vmem:[%s6196_s6] ss:$0 sm:$0xff] }
  0x5e   :  { %3876 = vmatprep.subr.mxu0 %v5020_v0  ;;  %3906 = vmatprep.mubr.msk.f32.mxu0 %vm5021_vm0, %v5020_v0  ;;  %v5247_v42 = vld [vmem:[%s6197_s7] ss:$0 sm:$0xff] }
  0x5f   :  { %3877 = vmatpush3.msra.mxu0 %v5149_v11  ;;  %3909 = vmatprep.subr.mxu1 %v5020_v0 }
  0x60   :  { %3878 = vmatprep.subr.mxu0 %v5020_v0  ;;  %3910 = vmatpush3.msra.mxu1 %v5130_v4 }
  0x61   :  { %3879 = vmatpush3.msra.mxu0 %v5155_v12  ;;  %3911 = vmatprep.subr.mxu1 %v5020_v0 }
  0x62   :  { %3880 = vmatprep.subr.mxu0 %v5020_v0  ;;  %3912 = vmatpush3.msra.mxu1 %v5133_v6 }
  0x63   :  { %3881 = vmatpush3.msra.mxu0 %v5161_v13  ;;  %3913 = vmatprep.subr.mxu1 %v5020_v0 }
  0x64   :  { %3882 = vmatprep.subr.mxu0 %v5020_v0  ;;  %3914 = vmatpush3.msra.mxu1 %v5137_v8 }
  0x65   :  { %3883 = vmatpush3.msra.mxu0 %v5167_v14  ;;  %3915 = vmatprep.subr.mxu1 %v5020_v0 }
  0x66   :  { %3884 = vmatprep.subr.mxu0 %v5020_v0  ;;  %3916 = vmatpush3.msra.mxu1 %v5141_v9 }
  0x67   :  { %3885 = vmatpush3.msra.mxu0 %v5173_v15  ;;  %3917 = vmatprep.mubr.msk.f32.mxu1 %vm5021_vm0, %v5020_v0 }
  0x68   :  { %3886 = vmatprep.subr.mxu0 %v5020_v0  ;;  %3920 = vmatprep.subr.mxu1 %v5020_v0 }
  0x69   :  { %3887 = vmatpush3.msra.mxu0 %v5179_v16 }
  0x6a   :  { %3888 = vmatprep.subr.mxu0 %v5020_v0 }
  0x6b   :  { %3889 = vmatpush3.msra.mxu0 %v5190_v17 }
  0x6c   :  { %3890 = vmatprep.subr.mxu0 %v5020_v0 }
  0x6d   :  { %3891 = vmatpush3.msra.mxu0 %v5194_v18 }
  0x6e   :  { %3892 = vmatprep.subr.mxu0 %v5020_v0 }
  0x6f   :  { %3893 = vmatpush3.msra.mxu0 %v5198_v19 }
  0x70   :  { %3894 = vmatprep.subr.mxu0 %v5020_v0 }
  0x71   :  { %3895 = vmatpush3.msra.mxu0 %v5202_v20 }
  0x72   :  { %3896 = vmatprep.subr.mxu0 %v5020_v0 }
  0x73   :  { %3897 = vmatpush3.msra.mxu0 %v5204_v21 }
  0x74   :  { %3898 = vmatprep.subr.mxu0 %v5020_v0 }
  0x75   :  { %3899 = vmatpush3.msra.mxu0 %v5210_v22 }
  0x76   :  { %3900 = vmatprep.subr.mxu0 %v5020_v0 }
  0x77   :  { %3901 = vmatpush3.msra.mxu0 %v5214_v23 }
  0x78   :  { %3902 = vmatprep.subr.mxu0 %v5020_v0 }
  0x79   :  { %3903 = vmatpush3.msra.mxu0 %v5218_v24 }
  0x7a   :  { %3904 = vmatprep.subr.mxu0 %v5020_v0 }
  0x7b   :  { %3905 = vmatpush3.msra.mxu0 %v5222_v25 }
  0x7c   :  { %3955 = vmatprep.subr.mxu0 %v5020_v0 }
 0x11b   :  { %v3862_v27 = vpop.f32.mrf.mxu0 }
 0x11c   :  { %v263_v28 = vadd.f32 %v3862_v27, %v3440_v26 }
 0x11d   :  { %v257_v29 = vpop.f32.mrf.mxu0  ;;  %v339_v31 = vpop.f32.mrf.mxu1 }
 0x11e   :  { %267 = vst [vmem:[#allocation2 + $0x8] sm:$0xff] %v263_v28  ;;  %v258_v30 = vadd.f32 %v3440_v26, %v257_v29 }
 0x11f   :  { %v3873_v32 = vpop.f32.mrf.mxu1 }
 0x120   :  { %266 = vst [vmem:[#allocation2] sm:$0xff] %v258_v30 }
 0x127   :  { %v268_v33 = vld [vmem:[#allocation2] sm:$0x3]  ;;  %v453_v61 = vld [vmem:[#allocation2 + $0x2] sm:$0x3] }
 0x128   :  { %v340_v34 = vadd.f32 %v339_v31, %v268_v33 }
 0x12a   :  { %v343_v35 = vmul.f32 %v340_v34, %v340_v34 }
 0x12c   :  { %3907 = vmatmul.mubr.f32.vlgmr.msra.gmra.mxu0 %v343_v35 }
 0x12d   :  { %3956 = vmatpush3.msra.mxu0 %v5130_v4  ;;  %3963 = vmatprep.mubr.msk.f32.mxu0 %vm5021_vm0, %v5020_v0 }
 0x12e   :  { %3957 = vmatprep.subr.mxu0 %v5020_v0 }
 0x12f   :  { %3958 = vmatpush3.msra.mxu0 %v5133_v6 }
 0x130   :  { %3959 = vmatprep.subr.mxu0 %v5020_v0 }
 0x131   :  { %3960 = vmatpush3.msra.mxu0 %v5137_v8 }
 0x132   :  { %3961 = vmatprep.subr.mxu0 %v5020_v0 }
 0x133   :  { %3962 = vmatpush3.msra.mxu0 %v5141_v9 }
 0x134   :  { %3966 = vmatprep.subr.mxu0 %v5020_v0 }
 0x1ec   :  { %v410_v36 = vpop.f32.mrf.mxu0 }
 0x1ed   :  { %v411_v37 = vadd.f32 1e-05, %v410_v36 }
 0x1ee   :  { %v3908_v38 = vpop.f32.mrf.mxu0 }
 0x1ef   :  { %4635 = vrsqrt.f32 %v411_v37 }
 0x1fc   :  { %v4636_v39 = vpop.eup %4635 }
 0x1fd   :  { %v415_v41 = vmul.f32 %v4636_v39, %v340_v34 }
 0x1ff   :  { %v416_v43 = vmul.f32 %v5242_v40, %v415_v41 }
 0x201   :  { %v417_v44 = vadd.f32 %v5247_v42, %v416_v43 }
 0x203   :  { %4637 = vtanh.f32 %v417_v44  ;;  %v3444_v46 = vmul.f32 -1.442695, %v417_v44 }
 0x205   :  { %4639 = vpow2.f32 %v3444_v46 }
 0x210   :  { %v4638_v45 = vpop.eup %4637 }
 0x211   :  { %427 = vrot.lane.b32.xlu0 %v4638_v45, %s5022_s3 }
 0x212   :  { %v4640_v47 = vpop.eup %4639 }
 0x213   :  { %v421_v48 = vadd.f32 1.0, %v4640_v47 }
 0x215   :  { %4641 = vrcp.f32 %v421_v48  ;;  %v635_v48 = vld [vmem:[#allocation2 + $0x4] sm:$0x3] }
 0x222   :  { %v4642_v49 = vpop.eup %4641 }
 0x223   :  { %v424_v52 = vmul.f32 0.0, %v4642_v49 }
 0x283   :  { %v428_v50 = vpop.permute.xlu0 %427 }
 0x284   :  { %v430_v51 = vmul.f32 %v4642_v49, %v428_v50 }
 0x286   :  { %432 = vrot.lane.b32.xlu0 %v430_v51, %s5023_s16 }
 0x2f8   :  { %v433_v53 = vpop.permute.xlu0 %432 }
 0x2f9   :  { %v5253_v54 = vadd.f32 %v433_v53, %v424_v52 }
 0x2fb   :  { %4643 = vtanh.f32 %v5253_v54 }
 0x308   :  { %v4644_v55 = vpop.eup %4643 }
 0x309   :  { %438 = vrot.lane.b32.xlu1 %v4644_v55, %s5022_s3 }
 0x30d   :  { %443 = vrot.lane.b32.xlu1 %v417_v44, %s5023_s16 }
 0x37b   :  { %v439_v56 = vpop.permute.xlu1 %438 }
 0x37c   :  { %v441_v57 = vmul.f32 %v4642_v49, %v439_v56 }
 0x37f   :  { %v444_v58 = vpop.permute.xlu1 %443 }
 0x380   :  { %v446_v59 = vadd.f32 %v444_v58, %v441_v57 }
 0x382   :  { %448 = vrot.lane.b32.xlu0 %v446_v59, %s5023_s16 }
 0x3f4   :  { %v449_v60 = vpop.permute.xlu0 %448 }
 0x3f5   :  { %452 = vst.msk [vmem:[#allocation3] sm:$0x3] %vm451_vm3, %v449_v60  ;;  %3918 = vmatmul.mubr.msk.f32.vlgmr.msra.gmra.mxu1 %vm269_vm4, %v449_v60 }
 0x3f6   :  { %3921 = vmatpush3.msra.mxu1 %v5143_v10  ;;  %3952 = vmatprep.mubr.msk.f32.mxu1 %vm5021_vm0, %v5020_v0 }
 0x3f7   :  { %3922 = vmatprep.subr.mxu1 %v5020_v0 }
 0x3f8   :  { %3923 = vmatpush3.msra.mxu1 %v5149_v11 }
 0x3f9   :  { %3924 = vmatprep.subr.mxu1 %v5020_v0 }
 0x3fa   :  { %3925 = vmatpush3.msra.mxu1 %v5155_v12 }
 0x3fb   :  { %3926 = vmatprep.subr.mxu1 %v5020_v0 }
 0x3fc   :  { %3927 = vmatpush3.msra.mxu1 %v5161_v13 }
 0x3fd   :  { %3928 = vmatprep.subr.mxu1 %v5020_v0 }
 0x3fe   :  { %3929 = vmatpush3.msra.mxu1 %v5167_v14 }
 0x3ff   :  { %3930 = vmatprep.subr.mxu1 %v5020_v0 }
 0x400   :  { %3931 = vmatpush3.msra.mxu1 %v5173_v15 }
 0x401   :  { %3932 = vmatprep.subr.mxu1 %v5020_v0 }
 0x402   :  { %3933 = vmatpush3.msra.mxu1 %v5179_v16 }
 0x403   :  { %3934 = vmatprep.subr.mxu1 %v5020_v0 }
 0x404   :  { %3935 = vmatpush3.msra.mxu1 %v5190_v17 }
 0x405   :  { %3936 = vmatprep.subr.mxu1 %v5020_v0 }
 0x406   :  { %3937 = vmatpush3.msra.mxu1 %v5194_v18 }
 0x407   :  { %3938 = vmatprep.subr.mxu1 %v5020_v0 }
 0x408   :  { %3939 = vmatpush3.msra.mxu1 %v5198_v19 }
 0x409   :  { %3940 = vmatprep.subr.mxu1 %v5020_v0 }
 0x40a   :  { %3941 = vmatpush3.msra.mxu1 %v5202_v20 }
 0x40b   :  { %3942 = vmatprep.subr.mxu1 %v5020_v0 }
 0x40c   :  { %3943 = vmatpush3.msra.mxu1 %v5204_v21 }
 0x40d   :  { %3944 = vmatprep.subr.mxu1 %v5020_v0 }
 0x40e   :  { %3945 = vmatpush3.msra.mxu1 %v5210_v22 }
 0x40f   :  { %3946 = vmatprep.subr.mxu1 %v5020_v0 }
 0x410   :  { %3947 = vmatpush3.msra.mxu1 %v5214_v23 }
 0x411   :  { %3948 = vmatprep.subr.mxu1 %v5020_v0 }
 0x412   :  { %3949 = vmatpush3.msra.mxu1 %v5218_v24 }
 0x413   :  { %3950 = vmatprep.subr.mxu1 %v5020_v0 }
 0x414   :  { %3951 = vmatpush3.msra.mxu1 %v5222_v25 }
 0x415   :  { %4001 = vmatprep.subr.mxu1 %v5020_v0 }
 0x4b5   :  { %v522_v62 = vpop.f32.mrf.mxu1 }
 0x4b6   :  { %v523_v63 = vadd.f32 %v522_v62, %v453_v61 }
 0x4b7   :  { %v3919_v1 = vpop.f32.mrf.mxu1 }
 0x4b8   :  { %v526_v2 = vmul.f32 %v523_v63, %v523_v63 }
 0x4ba   :  { %3953 = vmatmul.mubr.f32.vlgmr.msra.gmra.mxu1 %v526_v2 }
 0x4bb   :  { %4002 = vmatpush3.msra.mxu1 %v5130_v4  ;;  %4009 = vmatprep.mubr.msk.f32.mxu1 %vm5021_vm0, %v5020_v0 }
 0x4bc   :  { %4003 = vmatprep.subr.mxu1 %v5020_v0 }
 0x4bd   :  { %4004 = vmatpush3.msra.mxu1 %v5133_v6 }
 0x4be   :  { %4005 = vmatprep.subr.mxu1 %v5020_v0 }
 0x4bf   :  { %4006 = vmatpush3.msra.mxu1 %v5137_v8 }
 0x4c0   :  { %4007 = vmatprep.subr.mxu1 %v5020_v0 }
 0x4c1   :  { %4008 = vmatpush3.msra.mxu1 %v5141_v9 }
 0x4c2   :  { %4012 = vmatprep.subr.mxu1 %v5020_v0 }
 0x57a   :  { %v593_v3 = vpop.f32.mrf.mxu1 }
 0x57b   :  { %v594_v5 = vadd.f32 1e-05, %v593_v3 }
 0x57c   :  { %v3954_v7 = vpop.f32.mrf.mxu1 }
 0x57d   :  { %4645 = vrsqrt.f32 %v594_v5 }
 0x58a   :  { %v4646_v26 = vpop.eup %4645 }
 0x58b   :  { %v598_v27 = vmul.f32 %v4646_v26, %v523_v63 }
 0x58d   :  { %v599_v28 = vmul.f32 %v5242_v40, %v598_v27 }
 0x58f   :  { %v600_v29 = vadd.f32 %v5247_v42, %v599_v28 }
 0x591   :  { %4647 = vtanh.f32 %v600_v29  ;;  %v3446_v31 = vmul.f32 -1.442695, %v600_v29 }
 0x593   :  { %4649 = vpow2.f32 %v3446_v31 }
 0x59e   :  { %v4648_v30 = vpop.eup %4647 }
 0x59f   :  { %610 = vrot.lane.b32.xlu1 %v4648_v30, %s5022_s3 }
 0x5a0   :  { %v4650_v32 = vpop.eup %4649 }
 0x5a1   :  { %v604_v33 = vadd.f32 1.0, %v4650_v32 }
 0x5a3   :  { %4651 = vrcp.f32 %v604_v33  ;;  %v817_v33 = vld [vmem:[#allocation2 + $0x6] sm:$0x3] }
 0x5b0   :  { %v4652_v34 = vpop.eup %4651 }
 0x5b1   :  { %v607_v37 = vmul.f32 %v4652_v34, %v5253_v54 }
 0x611   :  { %v611_v35 = vpop.permute.xlu1 %610 }
 0x612   :  { %v613_v36 = vmul.f32 %v4652_v34, %v611_v35 }
 0x614   :  { %615 = vrot.lane.b32.xlu0 %v613_v36, %s5023_s16 }
 0x618   :  { %626 = vrot.lane.b32.xlu0 %v600_v29, %s5023_s16 }
 0x686   :  { %v616_v38 = vpop.permute.xlu0 %615 }
 0x687   :  { %v5311_v39 = vadd.f32 %v616_v38, %v607_v37 }
 0x689   :  { %4653 = vtanh.f32 %v5311_v39 }
 0x68a   :  { %v627_v45 = vpop.permute.xlu0 %626 }
 0x696   :  { %v4654_v41 = vpop.eup %4653 }
 0x697   :  { %621 = vrot.lane.b32.xlu1 %v4654_v41, %s5022_s3 }
 0x709   :  { %v622_v43 = vpop.permute.xlu1 %621 }
 0x70a   :  { %v624_v44 = vmul.f32 %v4652_v34, %v622_v43 }
 0x70c   :  { %v629_v46 = vadd.f32 %v627_v45, %v624_v44 }
 0x70e   :  { %631 = vrot.lane.b32.xlu1 %v629_v46, %s5023_s16 }
 0x780   :  { %v632_v47 = vpop.permute.xlu1 %631 }
 0x781   :  { %634 = vst.msk [vmem:[#allocation3 + $0x2] sm:$0x3] %vm451_vm3, %v632_v47  ;;  %3964 = vmatmul.mubr.msk.f32.vlgmr.msra.gmra.mxu0 %vm269_vm4, %v632_v47 }
 0x782   :  { %3967 = vmatpush3.msra.mxu0 %v5143_v10  ;;  %3998 = vmatprep.mubr.msk.f32.mxu0 %vm5021_vm0, %v5020_v0 }
 0x783   :  { %3968 = vmatprep.subr.mxu0 %v5020_v0 }
 0x784   :  { %3969 = vmatpush3.msra.mxu0 %v5149_v11 }
 0x785   :  { %3970 = vmatprep.subr.mxu0 %v5020_v0 }
 0x786   :  { %3971 = vmatpush3.msra.mxu0 %v5155_v12 }
 0x787   :  { %3972 = vmatprep.subr.mxu0 %v5020_v0 }
 0x788   :  { %3973 = vmatpush3.msra.mxu0 %v5161_v13 }
 0x789   :  { %3974 = vmatprep.subr.mxu0 %v5020_v0 }
 0x78a   :  { %3975 = vmatpush3.msra.mxu0 %v5167_v14 }
 0x78b   :  { %3976 = vmatprep.subr.mxu0 %v5020_v0 }
 0x78c   :  { %3977 = vmatpush3.msra.mxu0 %v5173_v15 }
 0x78d   :  { %3978 = vmatprep.subr.mxu0 %v5020_v0 }
 0x78e   :  { %3979 = vmatpush3.msra.mxu0 %v5179_v16 }
 0x78f   :  { %3980 = vmatprep.subr.mxu0 %v5020_v0 }
 0x790   :  { %3981 = vmatpush3.msra.mxu0 %v5190_v17 }
 0x791   :  { %3982 = vmatprep.subr.mxu0 %v5020_v0 }
 0x792   :  { %3983 = vmatpush3.msra.mxu0 %v5194_v18 }
 0x793   :  { %3984 = vmatprep.subr.mxu0 %v5020_v0 }
 0x794   :  { %3985 = vmatpush3.msra.mxu0 %v5198_v19 }
 0x795   :  { %3986 = vmatprep.subr.mxu0 %v5020_v0 }
 0x796   :  { %3987 = vmatpush3.msra.mxu0 %v5202_v20 }
 0x797   :  { %3988 = vmatprep.subr.mxu0 %v5020_v0 }
 0x798   :  { %3989 = vmatpush3.msra.mxu0 %v5204_v21 }
 0x799   :  { %3990 = vmatprep.subr.mxu0 %v5020_v0 }
 0x79a   :  { %3991 = vmatpush3.msra.mxu0 %v5210_v22 }
 0x79b   :  { %3992 = vmatprep.subr.mxu0 %v5020_v0 }
 0x79c   :  { %3993 = vmatpush3.msra.mxu0 %v5214_v23 }
 0x79d   :  { %3994 = vmatprep.subr.mxu0 %v5020_v0 }
 0x79e   :  { %3995 = vmatpush3.msra.mxu0 %v5218_v24 }
 0x79f   :  { %3996 = vmatprep.subr.mxu0 %v5020_v0 }
 0x7a0   :  { %3997 = vmatpush3.msra.mxu0 %v5222_v25 }
 0x7a1   :  { %4047 = vmatprep.subr.mxu0 %v5020_v0 }
 0x841   :  { %v704_v49 = vpop.f32.mrf.mxu0 }
 0x842   :  { %v705_v50 = vadd.f32 %v704_v49, %v635_v48 }
 0x843   :  { %v3965_v51 = vpop.f32.mrf.mxu0 }
 0x844   :  { %v708_v52 = vmul.f32 %v705_v50, %v705_v50 }
 0x846   :  { %3999 = vmatmul.mubr.f32.vlgmr.msra.gmra.mxu0 %v708_v52 }
 0x847   :  { %4048 = vmatpush3.msra.mxu0 %v5130_v4  ;;  %4055 = vmatprep.mubr.msk.f32.mxu0 %vm5021_vm0, %v5020_v0 }
 0x848   :  { %4049 = vmatprep.subr.mxu0 %v5020_v0 }
 0x849   :  { %4050 = vmatpush3.msra.mxu0 %v5133_v6 }
 0x84a   :  { %4051 = vmatprep.subr.mxu0 %v5020_v0 }
 0x84b   :  { %4052 = vmatpush3.msra.mxu0 %v5137_v8 }
 0x84c   :  { %4053 = vmatprep.subr.mxu0 %v5020_v0 }
 0x84d   :  { %4054 = vmatpush3.msra.mxu0 %v5141_v9 }
 0x84e   :  { %4058 = vmatprep.subr.mxu0 %v5020_v0 }
 0x906   :  { %v775_v53 = vpop.f32.mrf.mxu0 }
 0x907   :  { %v776_v54 = vadd.f32 1e-05, %v775_v53 }
 0x908   :  { %v4000_v55 = vpop.f32.mrf.mxu0 }
 0x909   :  { %4655 = vrsqrt.f32 %v776_v54 }
 0x916   :  { %v4656_v56 = vpop.eup %4655 }
 0x917   :  { %v780_v57 = vmul.f32 %v4656_v56, %v705_v50 }
 0x919   :  { %v781_v58 = vmul.f32 %v5242_v40, %v780_v57 }
 0x91b   :  { %v782_v59 = vadd.f32 %v5247_v42, %v781_v58 }
 0x91d   :  { %4657 = vtanh.f32 %v782_v59  ;;  %v3448_v61 = vmul.f32 -1.442695, %v782_v59 }
 0x91f   :  { %4659 = vpow2.f32 %v3448_v61 }
 0x92a   :  { %v4658_v60 = vpop.eup %4657 }
 0x92b   :  { %792 = vrot.lane.b32.xlu0 %v4658_v60, %s5022_s3 }
 0x92c   :  { %v4660_v62 = vpop.eup %4659 }
 0x92d   :  { %v786_v63 = vadd.f32 1.0, %v4660_v62 }
 0x92f   :  { %4661 = vrcp.f32 %v786_v63  ;;  %v999_v63 = vld [vmem:[#allocation2 + $0x8] sm:$0x3] }
 0x93c   :  { %v4662_v1 = vpop.eup %4661 }
 0x93d   :  { %v789_v5 = vmul.f32 %v4662_v1, %v5311_v39 }
 0x99d   :  { %v793_v2 = vpop.permute.xlu0 %792 }
 0x99e   :  { %v795_v3 = vmul.f32 %v4662_v1, %v793_v2 }
 0x9a0   :  { %797 = vrot.lane.b32.xlu1 %v795_v3, %s5023_s16 }
 0x9a4   :  { %808 = vrot.lane.b32.xlu1 %v782_v59, %s5023_s16 }
 0xa12   :  { %v798_v7 = vpop.permute.xlu1 %797 }
 0xa13   :  { %v5368_v26 = vadd.f32 %v798_v7, %v789_v5 }
 0xa15   :  { %4663 = vtanh.f32 %v5368_v26 }
 0xa16   :  { %v809_v30 = vpop.permute.xlu1 %808 }
 0xa22   :  { %v4664_v27 = vpop.eup %4663 }
 0xa23   :  { %803 = vrot.lane.b32.xlu0 %v4664_v27, %s5022_s3 }
 0xa95   :  { %v804_v28 = vpop.permute.xlu0 %803 }
 0xa96   :  { %v806_v29 = vmul.f32 %v4662_v1, %v804_v28 }
 0xa98   :  { %v811_v31 = vadd.f32 %v809_v30, %v806_v29 }
 0xa9a   :  { %813 = vrot.lane.b32.xlu0 %v811_v31, %s5023_s16 }
 0xb0c   :  { %v814_v32 = vpop.permute.xlu0 %813 }
 0xb0d   :  { %816 = vst.msk [vmem:[#allocation3 + $0x4] sm:$0x3] %vm451_vm3, %v814_v32  ;;  %4010 = vmatmul.mubr.msk.f32.vlgmr.msra.gmra.mxu1 %vm269_vm4, %v814_v32 }
 0xb0e   :  { %4013 = vmatpush3.msra.mxu1 %v5143_v10  ;;  %4044 = vmatprep.mubr.msk.f32.mxu1 %vm5021_vm0, %v5020_v0 }
 0xb0f   :  { %4014 = vmatprep.subr.mxu1 %v5020_v0 }
 0xb10   :  { %4015 = vmatpush3.msra.mxu1 %v5149_v11 }
 0xb11   :  { %4016 = vmatprep.subr.mxu1 %v5020_v0 }
 0xb12   :  { %4017 = vmatpush3.msra.mxu1 %v5155_v12 }
 0xb13   :  { %4018 = vmatprep.subr.mxu1 %v5020_v0 }
 0xb14   :  { %4019 = vmatpush3.msra.mxu1 %v5161_v13 }
 0xb15   :  { %4020 = vmatprep.subr.mxu1 %v5020_v0 }
 0xb16   :  { %4021 = vmatpush3.msra.mxu1 %v5167_v14 }
 0xb17   :  { %4022 = vmatprep.subr.mxu1 %v5020_v0 }
 0xb18   :  { %4023 = vmatpush3.msra.mxu1 %v5173_v15 }
 0xb19   :  { %4024 = vmatprep.subr.mxu1 %v5020_v0 }
 0xb1a   :  { %4025 = vmatpush3.msra.mxu1 %v5179_v16 }
 0xb1b   :  { %4026 = vmatprep.subr.mxu1 %v5020_v0 }
 0xb1c   :  { %4027 = vmatpush3.msra.mxu1 %v5190_v17 }
 0xb1d   :  { %4028 = vmatprep.subr.mxu1 %v5020_v0 }
 0xb1e   :  { %4029 = vmatpush3.msra.mxu1 %v5194_v18 }
 0xb1f   :  { %4030 = vmatprep.subr.mxu1 %v5020_v0 }
 0xb20   :  { %4031 = vmatpush3.msra.mxu1 %v5198_v19 }
 0xb21   :  { %4032 = vmatprep.subr.mxu1 %v5020_v0 }
 0xb22   :  { %4033 = vmatpush3.msra.mxu1 %v5202_v20 }
 0xb23   :  { %4034 = vmatprep.subr.mxu1 %v5020_v0 }
 0xb24   :  { %4035 = vmatpush3.msra.mxu1 %v5204_v21 }
 0xb25   :  { %4036 = vmatprep.subr.mxu1 %v5020_v0 }
 0xb26   :  { %4037 = vmatpush3.msra.mxu1 %v5210_v22 }
 0xb27   :  { %4038 = vmatprep.subr.mxu1 %v5020_v0 }
 0xb28   :  { %4039 = vmatpush3.msra.mxu1 %v5214_v23 }
 0xb29   :  { %4040 = vmatprep.subr.mxu1 %v5020_v0 }
 0xb2a   :  { %4041 = vmatpush3.msra.mxu1 %v5218_v24 }
 0xb2b   :  { %4042 = vmatprep.subr.mxu1 %v5020_v0 }
 0xb2c   :  { %4043 = vmatpush3.msra.mxu1 %v5222_v25 }
 0xb2d   :  { %4093 = vmatprep.subr.mxu1 %v5020_v0 }
 0xbcd   :  { %v886_v34 = vpop.f32.mrf.mxu1 }
 0xbce   :  { %v887_v35 = vadd.f32 %v886_v34, %v817_v33 }
 0xbcf   :  { %v4011_v36 = vpop.f32.mrf.mxu1 }
 0xbd0   :  { %v890_v37 = vmul.f32 %v887_v35, %v887_v35 }
 0xbd2   :  { %4045 = vmatmul.mubr.f32.vlgmr.msra.gmra.mxu1 %v890_v37 }
 0xbd3   :  { %4094 = vmatpush3.msra.mxu1 %v5130_v4  ;;  %4101 = vmatprep.mubr.msk.f32.mxu1 %vm5021_vm0, %v5020_v0 }
 0xbd4   :  { %4095 = vmatprep.subr.mxu1 %v5020_v0 }
 0xbd5   :  { %4096 = vmatpush3.msra.mxu1 %v5133_v6 }
 0xbd6   :  { %4097 = vmatprep.subr.mxu1 %v5020_v0 }
 0xbd7   :  { %4098 = vmatpush3.msra.mxu1 %v5137_v8 }
 0xbd8   :  { %4099 = vmatprep.subr.mxu1 %v5020_v0 }
 0xbd9   :  { %4100 = vmatpush3.msra.mxu1 %v5141_v9 }
 0xbda   :  { %4104 = vmatprep.subr.mxu1 %v5020_v0 }
 0xc92   :  { %v957_v38 = vpop.f32.mrf.mxu1 }
 0xc93   :  { %v958_v39 = vadd.f32 1e-05, %v957_v38 }
 0xc94   :  { %v4046_v41 = vpop.f32.mrf.mxu1 }
 0xc95   :  { %4665 = vrsqrt.f32 %v958_v39 }
 0xca2   :  { %v4666_v43 = vpop.eup %4665 }
 0xca3   :  { %v962_v44 = vmul.f32 %v4666_v43, %v887_v35 }
 0xca5   :  { %v963_v45 = vmul.f32 %v5242_v40, %v962_v44 }
 0xca7   :  { %v964_v46 = vadd.f32 %v5247_v42, %v963_v45 }
 0xca9   :  { %4667 = vtanh.f32 %v964_v46  ;;  %v3450_v48 = vmul.f32 -1.442695, %v964_v46 }
 0xcab   :  { %4669 = vpow2.f32 %v3450_v48 }
 0xcb6   :  { %v4668_v47 = vpop.eup %4667 }
 0xcb7   :  { %974 = vrot.lane.b32.xlu1 %v4668_v47, %s5022_s3 }
 0xcb8   :  { %v4670_v49 = vpop.eup %4669 }
 0xcb9   :  { %v968_v50 = vadd.f32 1.0, %v4670_v49 }
 0xcbb   :  { %4671 = vrcp.f32 %v968_v50 }
 0xcc8   :  { %v4672_v51 = vpop.eup %4671 }
 0xcc9   :  { %v971_v54 = vmul.f32 %v4672_v51, %v5368_v26 }
 0xd29   :  { %v975_v52 = vpop.permute.xlu1 %974 }
 0xd2a   :  { %v977_v53 = vmul.f32 %v4672_v51, %v975_v52 }
 0xd2c   :  { %979 = vrot.lane.b32.xlu0 %v977_v53, %s5023_s16 }
 0xd30   :  { %990 = vrot.lane.b32.xlu0 %v964_v46, %s5023_s16 }
 0xd9e   :  { %v980_v55 = vpop.permute.xlu0 %979 }
 0xd9f   :  { %v5425_v56 = vadd.f32 %v980_v55, %v971_v54 }
 0xda1   :  { %4673 = vtanh.f32 %v5425_v56 }
 0xda2   :  { %v991_v60 = vpop.permute.xlu0 %990 }
 0xdae   :  { %v4674_v57 = vpop.eup %4673 }
 0xdaf   :  { %985 = vrot.lane.b32.xlu1 %v4674_v57, %s5022_s3 }
 0xe21   :  { %v986_v58 = vpop.permute.xlu1 %985 }
 0xe22   :  { %v988_v59 = vmul.f32 %v4672_v51, %v986_v58 }
 0xe24   :  { %v993_v61 = vadd.f32 %v991_v60, %v988_v59  ;;  %v5544_v60 = vld [vmem:[#allocation13 + $0x78] sm:$0xff] }
 0xe26   :  { %995 = vrot.lane.b32.xlu1 %v993_v61, %s5023_s16  ;;  %v5550_v61 = vld [vmem:[#allocation13 + $0x70] sm:$0xff] }
 0xe98   :  { %v996_v62 = vpop.permute.xlu1 %995 }
 0xe99   :  { %998 = vst.msk [vmem:[#allocation3 + $0x6] sm:$0x3] %vm451_vm3, %v996_v62  ;;  %4056 = vmatmul.mubr.msk.f32.vlgmr.msra.gmra.mxu0 %vm269_vm4, %v996_v62  ;;  %v5554_v62 = vld [vmem:[#allocation13 + $0x68] sm:$0xff] }
 0xe9a   :  { %4059 = vmatpush3.msra.mxu0 %v5143_v10  ;;  %4090 = vmatprep.mubr.msk.f32.mxu0 %vm5021_vm0, %v5020_v0 }
 0xe9b   :  { %4060 = vmatprep.subr.mxu0 %v5020_v0 }
 0xe9c   :  { %4061 = vmatpush3.msra.mxu0 %v5149_v11 }
 0xe9d   :  { %4062 = vmatprep.subr.mxu0 %v5020_v0 }
 0xe9e   :  { %4063 = vmatpush3.msra.mxu0 %v5155_v12 }
 0xe9f   :  { %4064 = vmatprep.subr.mxu0 %v5020_v0 }
 0xea0   :  { %4065 = vmatpush3.msra.mxu0 %v5161_v13 }
 0xea1   :  { %4066 = vmatprep.subr.mxu0 %v5020_v0 }
 0xea2   :  { %4067 = vmatpush3.msra.mxu0 %v5167_v14 }
 0xea3   :  { %4068 = vmatprep.subr.mxu0 %v5020_v0 }
 0xea4   :  { %4069 = vmatpush3.msra.mxu0 %v5173_v15 }
 0xea5   :  { %4070 = vmatprep.subr.mxu0 %v5020_v0 }
 0xea6   :  { %4071 = vmatpush3.msra.mxu0 %v5179_v16 }
 0xea7   :  { %4072 = vmatprep.subr.mxu0 %v5020_v0 }
 0xea8   :  { %4073 = vmatpush3.msra.mxu0 %v5190_v17 }
 0xea9   :  { %4074 = vmatprep.subr.mxu0 %v5020_v0 }
 0xeaa   :  { %4075 = vmatpush3.msra.mxu0 %v5194_v18 }
 0xeab   :  { %4076 = vmatprep.subr.mxu0 %v5020_v0 }
 0xeac   :  { %4077 = vmatpush3.msra.mxu0 %v5198_v19 }
 0xead   :  { %4078 = vmatprep.subr.mxu0 %v5020_v0 }
 0xeae   :  { %4079 = vmatpush3.msra.mxu0 %v5202_v20 }
 0xeaf   :  { %4080 = vmatprep.subr.mxu0 %v5020_v0 }
 0xeb0   :  { %4081 = vmatpush3.msra.mxu0 %v5204_v21 }
 0xeb1   :  { %4082 = vmatprep.subr.mxu0 %v5020_v0 }
 0xeb2   :  { %4083 = vmatpush3.msra.mxu0 %v5210_v22 }
 0xeb3   :  { %4084 = vmatprep.subr.mxu0 %v5020_v0 }
 0xeb4   :  { %4085 = vmatpush3.msra.mxu0 %v5214_v23 }
 0xeb5   :  { %4086 = vmatprep.subr.mxu0 %v5020_v0 }
 0xeb6   :  { %4087 = vmatpush3.msra.mxu0 %v5218_v24 }
 0xeb7   :  { %4088 = vmatprep.subr.mxu0 %v5020_v0 }
 0xeb8   :  { %4089 = vmatpush3.msra.mxu0 %v5222_v25 }
 0xeb9   :  { %4139 = vmatprep.subr.mxu0 %v5020_v0 }
 0xf59   :  { %v1068_v1 = vpop.f32.mrf.mxu0 }
 0xf5a   :  { %v1069_v2 = vadd.f32 %v1068_v1, %v999_v63  ;;  %v5558_v63 = vld [vmem:[#allocation13 + $0x60] sm:$0xff]  ;;  %v5562_v1 = vld [vmem:[#allocation13 + $0x58] sm:$0xff] }
 0xf5b   :  { %v4057_v3 = vpop.f32.mrf.mxu0 }
 0xf5c   :  { %v1072_v5 = vmul.f32 %v1069_v2, %v1069_v2  ;;  %v5570_v3 = vld [vmem:[#allocation13 + $0x48] sm:$0xff] }
 0xf5e   :  { %4091 = vmatmul.mubr.f32.vlgmr.msra.gmra.mxu0 %v1072_v5  ;;  %v5574_v5 = vld [vmem:[#allocation13 + $0x40] sm:$0xff] }
 0xf5f   :  { %4140 = vmatpush3.msra.mxu0 %v5130_v4  ;;  %4147 = vmatprep.mubr.msk.f32.mxu0 %vm5021_vm0, %v5020_v0 }
 0xf60   :  { %4141 = vmatprep.subr.mxu0 %v5020_v0 }
 0xf61   :  { %4142 = vmatpush3.msra.mxu0 %v5133_v6 }
 0xf62   :  { %4143 = vmatprep.subr.mxu0 %v5020_v0 }
 0xf63   :  { %4144 = vmatpush3.msra.mxu0 %v5137_v8 }
 0xf64   :  { %4145 = vmatprep.subr.mxu0 %v5020_v0 }
 0xf65   :  { %4146 = vmatpush3.msra.mxu0 %v5141_v9 }
 0xf66   :  { %4150 = vmatprep.subr.mxu0 %v5020_v0 }
0x101e   :  { %v1139_v7 = vpop.f32.mrf.mxu0 }
0x101f   :  { %v1140_v26 = vadd.f32 1e-05, %v1139_v7  ;;  %v5578_v7 = vld [vmem:[#allocation13 + $0x38] sm:$0xff] }
0x1020   :  { %v4092_v4 = vpop.f32.mrf.mxu0 }
0x1021   :  { %4675 = vrsqrt.f32 %v1140_v26  ;;  %v5582_v26 = vld [vmem:[#allocation13 + $0x30] sm:$0xff]  ;;  %v5586_v4 = vld [vmem:[#allocation13 + $0x28] sm:$0xff] }
0x102e   :  { %v4676_v27 = vpop.eup %4675 }
0x102f   :  { %v1144_v28 = vmul.f32 %v4676_v27, %v1069_v2  ;;  %v5566_v2 = vld [vmem:[#allocation13 + $0x50] sm:$0xff]  ;;  %v5590_v27 = vld [vmem:[#allocation13 + $0x20] sm:$0xff] }
0x1031   :  { %v1145_v29 = vmul.f32 %v5242_v40, %v1144_v28  ;;  %v5594_v28 = vld [vmem:[#allocation13 + $0x18] sm:$0xff] }
0x1033   :  { %v1146_v6 = vadd.f32 %v5247_v42, %v1145_v29  ;;  %v5598_v29 = vld [vmem:[#allocation13 + $0x10] sm:$0xff] }
0x1035   :  { %4677 = vtanh.f32 %v1146_v6  ;;  %v3452_v31 = vmul.f32 -1.442695, %v1146_v6 }
0x1037   :  { %4679 = vpow2.f32 %v3452_v31  ;;  %v1363_v31 = vld [vmem:[#allocation2 + $0xc] sm:$0x3] }
0x1042   :  { %v4678_v30 = vpop.eup %4677 }
0x1043   :  { %1156 = vrot.lane.b32.xlu0 %v4678_v30, %s5022_s3  ;;  %v5606_v30 = vld [vmem:[#allocation13] sm:$0xff] }
0x1044   :  { %v4680_v32 = vpop.eup %4679 }
0x1045   :  { %v1150_v33 = vadd.f32 1.0, %v4680_v32 }
0x1047   :  { %4681 = vrcp.f32 %v1150_v33 }
0x1054   :  { %v4682_v34 = vpop.eup %4681 }
0x1055   :  { %v1153_v37 = vmul.f32 %v4682_v34, %v5425_v56 }
0x10b5   :  { %v1157_v35 = vpop.permute.xlu0 %1156 }
0x10b6   :  { %v1159_v36 = vmul.f32 %v4682_v34, %v1157_v35 }
0x10b8   :  { %1161 = vrot.lane.b32.xlu1 %v1159_v36, %s5023_s16  ;;  %v1753_v36 = vld [vmem:[#allocation3] sm:$0xff] }
0x10bc   :  { %1172 = vrot.lane.b32.xlu1 %v1146_v6, %s5023_s16  ;;  %v5602_v6 = vld [vmem:[#allocation13 + $0x8] sm:$0xff] }
0x112a   :  { %v1162_v38 = vpop.permute.xlu1 %1161 }
0x112b   :  { %v5482_v39 = vadd.f32 %v1162_v38, %v1153_v37 }
0x112d   :  { %4683 = vtanh.f32 %v5482_v39 }
0x112e   :  { %v1173_v45 = vpop.permute.xlu1 %1172 }
0x113a   :  { %v4684_v41 = vpop.eup %4683 }
0x113b   :  { %1167 = vrot.lane.b32.xlu0 %v4684_v41, %s5022_s3 }
0x11ad   :  { %v1168_v43 = vpop.permute.xlu0 %1167 }
0x11ae   :  { %v1170_v44 = vmul.f32 %v4682_v34, %v1168_v43 }
0x11b0   :  { %v1175_v46 = vadd.f32 %v1173_v45, %v1170_v44 }
0x11b2   :  { %1177 = vrot.lane.b32.xlu0 %v1175_v46, %s5023_s16 }
0x1224   :  { %v1178_v47 = vpop.permute.xlu0 %1177 }
0x1225   :  { %1180 = vst.msk [vmem:[#allocation3 + $0x8] sm:$0x3] %vm451_vm3, %v1178_v47  ;;  %4102 = vmatmul.mubr.msk.f32.vlgmr.msra.gmra.mxu1 %vm269_vm4, %v1178_v47 }
0x1226   :  { %4105 = vmatpush3.msra.mxu1 %v5143_v10  ;;  %4136 = vmatprep.mubr.msk.f32.mxu1 %vm5021_vm0, %v5020_v0  ;;  %v1181_v10 = vld [vmem:[#allocation2 + $0xa] sm:$0x3] }
0x1227   :  { %4106 = vmatprep.subr.mxu1 %v5020_v0 }
0x1228   :  { %4107 = vmatpush3.msra.mxu1 %v5149_v11 }
0x1229   :  { %4108 = vmatprep.subr.mxu1 %v5020_v0 }
0x122a   :  { %4109 = vmatpush3.msra.mxu1 %v5155_v12 }
0x122b   :  { %4110 = vmatprep.subr.mxu1 %v5020_v0 }
0x122c   :  { %4111 = vmatpush3.msra.mxu1 %v5161_v13 }
0x122d   :  { %4112 = vmatprep.subr.mxu1 %v5020_v0 }
0x122e   :  { %4113 = vmatpush3.msra.mxu1 %v5167_v14 }
0x122f   :  { %4114 = vmatprep.subr.mxu1 %v5020_v0 }
0x1230   :  { %4115 = vmatpush3.msra.mxu1 %v5173_v15  ;;  %v4803_v15 = vld [vmem:[#allocation7 + $0x18] sm:$0xff] }
0x1231   :  { %4116 = vmatprep.subr.mxu1 %v5020_v0 }
0x1232   :  { %4117 = vmatpush3.msra.mxu1 %v5179_v16  ;;  %v4804_v16 = vld [vmem:[#allocation7 + $0x10] sm:$0xff] }
0x1233   :  { %4118 = vmatprep.subr.mxu1 %v5020_v0 }
0x1234   :  { %4119 = vmatpush3.msra.mxu1 %v5190_v17 }
0x1235   :  { %4120 = vmatprep.subr.mxu1 %v5020_v0 }
0x1236   :  { %4121 = vmatpush3.msra.mxu1 %v5194_v18 }
0x1237   :  { %4122 = vmatprep.subr.mxu1 %v5020_v0 }
0x1238   :  { %4123 = vmatpush3.msra.mxu1 %v5198_v19 }
0x1239   :  { %4124 = vmatprep.subr.mxu1 %v5020_v0 }
0x123a   :  { %4125 = vmatpush3.msra.mxu1 %v5202_v20 }
0x123b   :  { %4126 = vmatprep.subr.mxu1 %v5020_v0 }
0x123c   :  { %4127 = vmatpush3.msra.mxu1 %v5204_v21 }
0x123d   :  { %4128 = vmatprep.subr.mxu1 %v5020_v0 }
0x123e   :  { %4129 = vmatpush3.msra.mxu1 %v5210_v22 }
0x123f   :  { %4130 = vmatprep.subr.mxu1 %v5020_v0 }
0x1240   :  { %4131 = vmatpush3.msra.mxu1 %v5214_v23 }
0x1241   :  { %4132 = vmatprep.subr.mxu1 %v5020_v0 }
0x1242   :  { %4133 = vmatpush3.msra.mxu1 %v5218_v24 }
0x1243   :  { %4134 = vmatprep.subr.mxu1 %v5020_v0 }
0x1244   :  { %4135 = vmatpush3.msra.mxu1 %v5222_v25 }
0x1245   :  { %4185 = vmatprep.subr.mxu1 %v5020_v0 }
0x12e5   :  { %v1250_v11 = vpop.f32.mrf.mxu1 }
0x12e6   :  { %v1251_v12 = vadd.f32 %v1250_v11, %v1181_v10 }
0x12e7   :  { %v4103_v13 = vpop.f32.mrf.mxu1 }
0x12e8   :  { %v1254_v14 = vmul.f32 %v1251_v12, %v1251_v12 }
0x12ea   :  { %4137 = vmatmul.mubr.f32.vlgmr.msra.gmra.mxu1 %v1254_v14 }
0x12eb   :  { %4186 = vmatpush3.msra.mxu1 %v4803_v15  ;;  %4193 = vmatprep.mubr.msk.f32.mxu1 %vm5021_vm0, %v5020_v0 }
0x12ec   :  { %4187 = vmatprep.subr.mxu1 %v5020_v0 }
0x12ed   :  { %4188 = vmatpush3.msra.mxu1 %v4804_v16 }
0x12ee   :  { %4189 = vmatprep.subr.mxu1 %v5020_v0 }
0x12ef   :  { %4190 = vmatpush3.msra.mxu1 %v5137_v8 }
0x12f0   :  { %4191 = vmatprep.subr.mxu1 %v5020_v0 }
0x12f1   :  { %4192 = vmatpush3.msra.mxu1 %v5141_v9 }
0x12f2   :  { %4196 = vmatprep.subr.mxu1 %v5020_v0 }
0x13aa   :  { %v1321_v17 = vpop.f32.mrf.mxu1 }
0x13ab   :  { %v1322_v18 = vadd.f32 1e-05, %v1321_v17 }
0x13ac   :  { %v4138_v19 = vpop.f32.mrf.mxu1 }
0x13ad   :  { %4685 = vrsqrt.f32 %v1322_v18 }
0x13ba   :  { %v4686_v20 = vpop.eup %4685 }
0x13bb   :  { %v1326_v21 = vmul.f32 %v4686_v20, %v1251_v12 }
0x13bd   :  { %v1327_v22 = vmul.f32 %v5242_v40, %v1326_v21 }
0x13bf   :  { %v1328_v23 = vadd.f32 %v5247_v42, %v1327_v22  ;;  %v1545_v22 = vld [vmem:[#allocation2 + $0xe] sm:$0x3] }
0x13c1   :  { %4687 = vtanh.f32 %v1328_v23  ;;  %v3454_v8 = vmul.f32 -1.442695, %v1328_v23 }
0x13c3   :  { %4689 = vpow2.f32 %v3454_v8 }
0x13ce   :  { %v4688_v24 = vpop.eup %4687 }
0x13cf   :  { %1338 = vrot.lane.b32.xlu1 %v4688_v24, %s5022_s3 }
0x13d0   :  { %v4690_v25 = vpop.eup %4689 }
0x13d1   :  { %v1332_v9 = vadd.f32 1.0, %v4690_v25 }
0x13d3   :  { %4691 = vrcp.f32 %v1332_v9 }
0x13e0   :  { %v4692_v48 = vpop.eup %4691 }
0x13e1   :  { %v1335_v51 = vmul.f32 %v4692_v48, %v5482_v39 }
0x1441   :  { %v1339_v49 = vpop.permute.xlu1 %1338 }
0x1442   :  { %v1341_v50 = vmul.f32 %v4692_v48, %v1339_v49 }
0x1444   :  { %1343 = vrot.lane.b32.xlu0 %v1341_v50, %s5023_s16 }
0x1448   :  { %1354 = vrot.lane.b32.xlu0 %v1328_v23, %s5023_s16 }
0x14b6   :  { %v1344_v52 = vpop.permute.xlu0 %1343 }
0x14b7   :  { %v5537_v53 = vadd.f32 %v1344_v52, %v1335_v51  ;;  %v4821_v52 = vld [vmem:[%s6196_s6] ss:$0 sm:$0xff] }
0x14b9   :  { %4693 = vtanh.f32 %v5537_v53 }
0x14ba   :  { %v1355_v57 = vpop.permute.xlu0 %1354 }
0x14c6   :  { %v4694_v54 = vpop.eup %4693 }
0x14c7   :  { %1349 = vrot.lane.b32.xlu1 %v4694_v54, %s5022_s3  ;;  %v4822_v54 = vld [vmem:[%s6197_s7] ss:$0 sm:$0xff] }
0x1539   :  { %v1350_v55 = vpop.permute.xlu1 %1349 }
0x153a   :  { %v1352_v56 = vmul.f32 %v4692_v48, %v1350_v55 }
0x153c   :  { %v1357_v58 = vadd.f32 %v1355_v57, %v1352_v56 }
0x153e   :  { %1359 = vrot.lane.b32.xlu1 %v1357_v58, %s5023_s16 }
0x15b0   :  { %v1360_v59 = vpop.permute.xlu1 %1359 }
0x15b1   :  { %1362 = vst.msk [vmem:[#allocation3 + $0xa] sm:$0x3] %vm451_vm3, %v1360_v59  ;;  %4148 = vmatmul.mubr.msk.f32.vlgmr.msra.gmra.mxu0 %vm269_vm4, %v1360_v59 }
0x15b2   :  { %4151 = vmatpush3.msra.mxu0 %v5544_v60  ;;  %4182 = vmatprep.mubr.msk.f32.mxu0 %vm5021_vm0, %v5020_v0 }
0x15b3   :  { %4152 = vmatprep.subr.mxu0 %v5020_v0 }
0x15b4   :  { %4153 = vmatpush3.msra.mxu0 %v5550_v61 }
0x15b5   :  { %4154 = vmatprep.subr.mxu0 %v5020_v0 }
0x15b6   :  { %4155 = vmatpush3.msra.mxu0 %v5554_v62 }
0x15b7   :  { %4156 = vmatprep.subr.mxu0 %v5020_v0 }
0x15b8   :  { %4157 = vmatpush3.msra.mxu0 %v5558_v63 }
0x15b9   :  { %4158 = vmatprep.subr.mxu0 %v5020_v0 }
0x15ba   :  { %4159 = vmatpush3.msra.mxu0 %v5562_v1 }
0x15bb   :  { %4160 = vmatprep.subr.mxu0 %v5020_v0 }
0x15bc   :  { %4161 = vmatpush3.msra.mxu0 %v5566_v2 }
0x15bd   :  { %4162 = vmatprep.subr.mxu0 %v5020_v0 }
0x15be   :  { %4163 = vmatpush3.msra.mxu0 %v5570_v3 }
0x15bf   :  { %4164 = vmatprep.subr.mxu0 %v5020_v0 }
0x15c0   :  { %4165 = vmatpush3.msra.mxu0 %v5574_v5 }
0x15c1   :  { %4166 = vmatprep.subr.mxu0 %v5020_v0 }
0x15c2   :  { %4167 = vmatpush3.msra.mxu0 %v5578_v7 }
0x15c3   :  { %4168 = vmatprep.subr.mxu0 %v5020_v0 }
0x15c4   :  { %4169 = vmatpush3.msra.mxu0 %v5582_v26 }
0x15c5   :  { %4170 = vmatprep.subr.mxu0 %v5020_v0 }
0x15c6   :  { %4171 = vmatpush3.msra.mxu0 %v5586_v4 }
0x15c7   :  { %4172 = vmatprep.subr.mxu0 %v5020_v0 }
0x15c8   :  { %4173 = vmatpush3.msra.mxu0 %v5590_v27 }
0x15c9   :  { %4174 = vmatprep.subr.mxu0 %v5020_v0 }
0x15ca   :  { %4175 = vmatpush3.msra.mxu0 %v5594_v28 }
0x15cb   :  { %4176 = vmatprep.subr.mxu0 %v5020_v0 }
0x15cc   :  { %4177 = vmatpush3.msra.mxu0 %v5598_v29 }
0x15cd   :  { %4178 = vmatprep.subr.mxu0 %v5020_v0 }
0x15ce   :  { %4179 = vmatpush3.msra.mxu0 %v5602_v6 }
0x15cf   :  { %4180 = vmatprep.subr.mxu0 %v5020_v0 }
0x15d0   :  { %4181 = vmatpush3.msra.mxu0 %v5606_v30 }
0x1671   :  { %v1432_v32 = vpop.f32.mrf.mxu0 }
0x1672   :  { %v1433_v33 = vadd.f32 %v1432_v32, %v1363_v31 }
0x1673   :  { %v4149_v34 = vpop.f32.mrf.mxu0 }
0x1674   :  { %v1436_v35 = vmul.f32 %v1433_v33, %v1433_v33 }
0x1676   :  { %4183 = vmatmul.mubr.f32.vlgmr.msra.gmra.mxu0 %v1436_v35 }
0x1677   :  { %4239 = vmatprep.mubr.msk.f32.mxu0 %vm269_vm4, %v1753_v36 }
0x1736   :  { %v1503_v37 = vpop.f32.mrf.mxu0 }
0x1737   :  { %v1504_v38 = vadd.f32 1e-05, %v1503_v37 }
0x1738   :  { %v4184_v39 = vpop.f32.mrf.mxu0 }
0x1739   :  { %4695 = vrsqrt.f32 %v1504_v38  ;;  %v1734_v38 = vld [vmem:[#allocation12 + $0x18] sm:$0xff]  ;;  %v1733_v39 = vld [vmem:[#allocation12 + $0x10] sm:$0xff] }
0x173a   :  { %4231 = vmatprep.subr.mxu0 %v1734_v38 }
0x173b   :  { %4232 = vmatpush3.msra.mxu0 %v1734_v38 }
0x173c   :  { %4233 = vmatprep.subr.mxu0 %v1733_v39 }
0x173d   :  { %4234 = vmatpush3.msra.mxu0 %v1733_v39 }
0x1746   :  { %v4696_v41 = vpop.eup %4695 }
0x1747   :  { %v1508_v43 = vmul.f32 %v4696_v41, %v1433_v33  ;;  %v1732_v41 = vld [vmem:[#allocation12 + $0x8] sm:$0xff] }
0x1748   :  { %4235 = vmatprep.subr.mxu0 %v1732_v41 }
0x1749   :  { %v1509_v44 = vmul.f32 %v5242_v40, %v1508_v43  ;;  %v1731_v43 = vld [vmem:[#allocation12] sm:$0xff]  ;;  %4236 = vmatpush3.msra.mxu0 %v1732_v41 }
0x174a   :  { %4237 = vmatprep.subr.mxu0 %v1731_v43 }
0x174b   :  { %v1510_v45 = vadd.f32 %v5247_v42, %v1509_v44  ;;  %4238 = vmatpush3.msra.mxu0 %v1731_v43 }
0x174c   :  { %4242 = vmatprep.subr.mxu0 %v5020_v0 }
0x174d   :  { %4697 = vtanh.f32 %v1510_v45  ;;  %v3456_v47 = vmul.f32 -1.442695, %v1510_v45 }
0x174f   :  { %4699 = vpow2.f32 %v3456_v47 }
0x175a   :  { %v4698_v46 = vpop.eup %4697 }
0x175b   :  { %1520 = vrot.lane.b32.xlu0 %v4698_v46, %s5022_s3 }
0x175c   :  { %v4700_v10 = vpop.eup %4699 }
0x175d   :  { %v1514_v11 = vadd.f32 1.0, %v4700_v10 }
0x175f   :  { %4701 = vrcp.f32 %v1514_v11  ;;  %v5705_v11 = vld [vmem:[#allocation9 + $0x18] sm:$0xff] }
0x176c   :  { %v4702_v12 = vpop.eup %4701 }
0x176d   :  { %v1517_v40 = vmul.f32 %v4702_v12, %v5537_v53 }
0x17cd   :  { %v1521_v13 = vpop.permute.xlu0 %1520 }
0x17ce   :  { %v1523_v14 = vmul.f32 %v4702_v12, %v1521_v13  ;;  %v5708_v13 = vld [vmem:[#allocation9 + $0x10] sm:$0xff] }
0x17d0   :  { %1525 = vrot.lane.b32.xlu1 %v1523_v14, %s5023_s16  ;;  %v5714_v14 = vld [vmem:[#allocation9 + $0x8] sm:$0xff] }
0x17d4   :  { %1536 = vrot.lane.b32.xlu1 %v1510_v45, %s5023_s16 }
0x1842   :  { %v1526_v15 = vpop.permute.xlu1 %1525 }
0x1843   :  { %v5616_v42 = vadd.f32 %v1526_v15, %v1517_v40  ;;  %v5718_v40 = vld [vmem:[#allocation9] sm:$0xff]  ;;  %v3464_v15 = vld [vmem:[%s6195_s5 + $0x1] ss:$0 sm:$0xff] }
0x1845   :  { %4703 = vtanh.f32 %v5616_v42 }
0x1846   :  { %v1537_v19 = vpop.permute.xlu1 %1536 }
0x1852   :  { %v4704_v16 = vpop.eup %4703 }
0x1853   :  { %1531 = vrot.lane.b32.xlu0 %v4704_v16, %s5022_s3 }
0x18c5   :  { %v1532_v17 = vpop.permute.xlu0 %1531 }
0x18c6   :  { %v1534_v18 = vmul.f32 %v4702_v12, %v1532_v17 }
0x18c8   :  { %v1539_v20 = vadd.f32 %v1537_v19, %v1534_v18 }
0x18ca   :  { %1541 = vrot.lane.b32.xlu0 %v1539_v20, %s5023_s16 }
0x193c   :  { %v1542_v21 = vpop.permute.xlu0 %1541 }
0x193d   :  { %1544 = vst.msk [vmem:[#allocation3 + $0xc] sm:$0x3] %vm451_vm3, %v1542_v21  ;;  %4194 = vmatmul.mubr.msk.f32.vlgmr.msra.gmra.mxu1 %vm269_vm4, %v1542_v21 }
0x193e   :  { %4197 = vmatpush3.msra.mxu1 %v5544_v60  ;;  %4228 = vmatprep.mubr.msk.f32.mxu1 %vm5021_vm0, %v5020_v0 }
0x193f   :  { %4198 = vmatprep.subr.mxu1 %v5020_v0 }
0x1940   :  { %4199 = vmatpush3.msra.mxu1 %v5550_v61 }
0x1941   :  { %4200 = vmatprep.subr.mxu1 %v5020_v0 }
0x1942   :  { %4201 = vmatpush3.msra.mxu1 %v5554_v62 }
0x1943   :  { %4202 = vmatprep.subr.mxu1 %v5020_v0 }
0x1944   :  { %4203 = vmatpush3.msra.mxu1 %v5558_v63 }
0x1945   :  { %4204 = vmatprep.subr.mxu1 %v5020_v0 }
0x1946   :  { %4205 = vmatpush3.msra.mxu1 %v5562_v1 }
0x1947   :  { %4206 = vmatprep.subr.mxu1 %v5020_v0 }
0x1948   :  { %4207 = vmatpush3.msra.mxu1 %v5566_v2 }
0x1949   :  { %4208 = vmatprep.subr.mxu1 %v5020_v0 }
0x194a   :  { %4209 = vmatpush3.msra.mxu1 %v5570_v3 }
0x194b   :  { %4210 = vmatprep.subr.mxu1 %v5020_v0 }
0x194c   :  { %4211 = vmatpush3.msra.mxu1 %v5574_v5 }
0x194d   :  { %4212 = vmatprep.subr.mxu1 %v5020_v0 }
0x194e   :  { %4213 = vmatpush3.msra.mxu1 %v5578_v7 }
0x194f   :  { %4214 = vmatprep.subr.mxu1 %v5020_v0 }
0x1950   :  { %4215 = vmatpush3.msra.mxu1 %v5582_v26 }
0x1951   :  { %4216 = vmatprep.subr.mxu1 %v5020_v0 }
0x1952   :  { %4217 = vmatpush3.msra.mxu1 %v5586_v4 }
0x1953   :  { %4218 = vmatprep.subr.mxu1 %v5020_v0 }
0x1954   :  { %4219 = vmatpush3.msra.mxu1 %v5590_v27 }
0x1955   :  { %4220 = vmatprep.subr.mxu1 %v5020_v0 }
0x1956   :  { %4221 = vmatpush3.msra.mxu1 %v5594_v28 }
0x1957   :  { %4222 = vmatprep.subr.mxu1 %v5020_v0 }
0x1958   :  { %4223 = vmatpush3.msra.mxu1 %v5598_v29 }
0x1959   :  { %4224 = vmatprep.subr.mxu1 %v5020_v0 }
0x195a   :  { %4225 = vmatpush3.msra.mxu1 %v5602_v6 }
0x195b   :  { %4226 = vmatprep.subr.mxu1 %v5020_v0 }
0x195c   :  { %4227 = vmatpush3.msra.mxu1 %v5606_v30 }
0x195d   :  { %4253 = vmatprep.subr.mxu1 %v5020_v0 }
0x19fd   :  { %v1614_v23 = vpop.f32.mrf.mxu1 }
0x19fe   :  { %v1615_v24 = vadd.f32 %v1614_v23, %v1545_v22 }
0x19ff   :  { %v4195_v8 = vpop.f32.mrf.mxu1 }
0x1a00   :  { %v1618_v25 = vmul.f32 %v1615_v24, %v1615_v24 }
0x1a02   :  { %4229 = vmatmul.mubr.f32.vlgmr.msra.gmra.mxu1 %v1618_v25 }
0x1a03   :  { %4254 = vmatpush3.msra.mxu1 %v5544_v60  ;;  %4285 = vmatprep.mubr.msk.f32.mxu1 %vm5021_vm0, %v5020_v0 }
0x1a04   :  { %4255 = vmatprep.subr.mxu1 %v5020_v0 }
0x1a05   :  { %4256 = vmatpush3.msra.mxu1 %v5550_v61 }
0x1a06   :  { %4257 = vmatprep.subr.mxu1 %v5020_v0 }
0x1a07   :  { %4258 = vmatpush3.msra.mxu1 %v5554_v62 }
0x1a08   :  { %4259 = vmatprep.subr.mxu1 %v5020_v0 }
0x1a09   :  { %4260 = vmatpush3.msra.mxu1 %v5558_v63 }
0x1a0a   :  { %4261 = vmatprep.subr.mxu1 %v5020_v0 }
0x1a0b   :  { %4262 = vmatpush3.msra.mxu1 %v5562_v1 }
0x1a0c   :  { %4263 = vmatprep.subr.mxu1 %v5020_v0 }
0x1a0d   :  { %4264 = vmatpush3.msra.mxu1 %v5566_v2 }
0x1a0e   :  { %4265 = vmatprep.subr.mxu1 %v5020_v0 }
0x1a0f   :  { %4266 = vmatpush3.msra.mxu1 %v5570_v3 }
0x1a10   :  { %4267 = vmatprep.subr.mxu1 %v5020_v0 }
0x1a11   :  { %4268 = vmatpush3.msra.mxu1 %v5574_v5 }
0x1a12   :  { %4269 = vmatprep.subr.mxu1 %v5020_v0 }
0x1a13   :  { %4270 = vmatpush3.msra.mxu1 %v5578_v7 }
0x1a14   :  { %4271 = vmatprep.subr.mxu1 %v5020_v0 }
0x1a15   :  { %4272 = vmatpush3.msra.mxu1 %v5582_v26 }
0x1a16   :  { %4273 = vmatprep.subr.mxu1 %v5020_v0 }
0x1a17   :  { %4274 = vmatpush3.msra.mxu1 %v5586_v4 }
0x1a18   :  { %4275 = vmatprep.subr.mxu1 %v5020_v0 }
0x1a19   :  { %4276 = vmatpush3.msra.mxu1 %v5590_v27 }
0x1a1a   :  { %4277 = vmatprep.subr.mxu1 %v5020_v0 }
0x1a1b   :  { %4278 = vmatpush3.msra.mxu1 %v5594_v28 }
0x1a1c   :  { %4279 = vmatprep.subr.mxu1 %v5020_v0 }
0x1a1d   :  { %4280 = vmatpush3.msra.mxu1 %v5598_v29 }
0x1a1e   :  { %4281 = vmatprep.subr.mxu1 %v5020_v0 }
0x1a1f   :  { %4282 = vmatpush3.msra.mxu1 %v5602_v6 }
0x1a20   :  { %4283 = vmatprep.subr.mxu1 %v5020_v0 }
0x1a21   :  { %4284 = vmatpush3.msra.mxu1 %v5606_v30 }
0x1a22   :  { %4334 = vmatprep.subr.mxu1 %v5020_v0 }
0x1ac2   :  { %v1685_v9 = vpop.f32.mrf.mxu1 }
0x1ac3   :  { %v1686_v48 = vadd.f32 1e-05, %v1685_v9 }
0x1ac4   :  { %v4230_v49 = vpop.f32.mrf.mxu1 }
0x1ac5   :  { %4705 = vrsqrt.f32 %v1686_v48  ;;  %v5751_v48 = vld [vmem:[%s6196_s6 + $0x1] ss:$0 sm:$0xff] }
0x1ad2   :  { %v4706_v50 = vpop.eup %4705 }
0x1ad3   :  { %v1690_v51 = vmul.f32 %v4706_v50, %v1615_v24  ;;  %v5756_v50 = vld [vmem:[%s6197_s7 + $0x1] ss:$0 sm:$0xff] }
0x1ad5   :  { %v1691_v53 = vmul.f32 %v4821_v52, %v1690_v51 }
0x1ad7   :  { %v1692_v55 = vadd.f32 %v4822_v54, %v1691_v53 }
0x1ad9   :  { %4707 = vtanh.f32 %v1692_v55  ;;  %v3458_v57 = vmul.f32 -1.442695, %v1692_v55 }
0x1adb   :  { %4709 = vpow2.f32 %v3458_v57 }
0x1ae6   :  { %v4708_v56 = vpop.eup %4707 }
0x1ae7   :  { %1702 = vrot.lane.b32.xlu1 %v4708_v56, %s5022_s3 }
0x1ae8   :  { %v4710_v58 = vpop.eup %4709 }
0x1ae9   :  { %v1696_v59 = vadd.f32 1.0, %v4710_v58 }
0x1aeb   :  { %4711 = vrcp.f32 %v1696_v59 }
0x1af8   :  { %v4712_v31 = vpop.eup %4711 }
0x1af9   :  { %v1699_v34 = vmul.f32 %v4712_v31, %v5616_v42 }
0x1b59   :  { %v1703_v32 = vpop.permute.xlu1 %1702 }
0x1b5a   :  { %v1705_v33 = vmul.f32 %v4712_v31, %v1703_v32 }
0x1b5c   :  { %1707 = vrot.lane.b32.xlu0 %v1705_v33, %s5023_s16 }
0x1b60   :  { %1718 = vrot.lane.b32.xlu0 %v1692_v55, %s5023_s16 }
0x1bce   :  { %v1708_v35 = vpop.permute.xlu0 %1707 }
0x1bcf   :  { %v1710_v36 = vadd.f32 %v1708_v35, %v1699_v34 }
0x1bd1   :  { %4713 = vtanh.f32 %v1710_v36 }
0x1bd2   :  { %v1719_v46 = vpop.permute.xlu0 %1718 }
0x1bde   :  { %v4714_v37 = vpop.eup %4713 }
0x1bdf   :  { %1713 = vrot.lane.b32.xlu1 %v4714_v37, %s5022_s3 }
0x1c51   :  { %v1714_v44 = vpop.permute.xlu1 %1713 }
0x1c52   :  { %v1716_v45 = vmul.f32 %v4712_v31, %v1714_v44 }
0x1c54   :  { %v1721_v47 = vadd.f32 %v1719_v46, %v1716_v45 }
0x1c56   :  { %1723 = vrot.lane.b32.xlu1 %v1721_v47, %s5023_s16 }
0x1cc8   :  { %v1724_v10 = vpop.permute.xlu1 %1723 }
0x1cc9   :  { %1726 = vst.msk [vmem:[#allocation3 + $0xe] sm:$0x3] %vm451_vm3, %v1724_v10 }
0x1cd0   :  { %v1754_v12 = vld [vmem:[#allocation3 + $0x8] sm:$0xff] }
0x1cd1   :  { %4240 = vmatmul.mubr.msk.f32.vlgmr.msra.gmra.mxu0 %vm269_vm4, %v1754_v12 }
0x1cd2   :  { %4243 = vmatpush3.msra.mxu0 %v5705_v11  ;;  %4250 = vmatprep.mubr.msk.f32.mxu0 %vm5021_vm0, %v5020_v0 }
0x1cd3   :  { %4244 = vmatprep.subr.mxu0 %v5020_v0 }
0x1cd4   :  { %4245 = vmatpush3.msra.mxu0 %v5708_v13 }
0x1cd5   :  { %4246 = vmatprep.subr.mxu0 %v5020_v0 }
0x1cd6   :  { %4247 = vmatpush3.msra.mxu0 %v5714_v14 }
0x1cd7   :  { %4248 = vmatprep.subr.mxu0 %v5020_v0 }
0x1cd8   :  { %4249 = vmatpush3.msra.mxu0 %v5718_v40 }
0x1cd9   :  { %4251 = vmatmul.mubr.f32.vlgmr.msra.gmra.mxu0 %v5020_v0  ;;  %4288 = vmatprep.subr.mxu0 %v5020_v0 }
0x1cda   :  { %4289 = vmatpush3.msra.mxu0 %v5705_v11  ;;  %4296 = vmatprep.mubr.msk.f32.mxu0 %vm5021_vm0, %v5020_v0 }
0x1cdb   :  { %4290 = vmatprep.subr.mxu0 %v5020_v0 }
0x1cdc   :  { %4291 = vmatpush3.msra.mxu0 %v5708_v13 }
0x1cdd   :  { %4292 = vmatprep.subr.mxu0 %v5020_v0 }
0x1cde   :  { %4293 = vmatpush3.msra.mxu0 %v5714_v14 }
0x1cdf   :  { %4294 = vmatprep.subr.mxu0 %v5020_v0 }
0x1ce0   :  { %4295 = vmatpush3.msra.mxu0 %v5718_v40 }
0x1ce1   :  { %4299 = vmatprep.subr.mxu0 %v5020_v0 }
0x1d91   :  { %v4241_v42 = vpop.f32.mrf.mxu0 }
0x1d92   :  { %v1839_v16 = vadd.f32 %v4241_v42, %v3464_v15 }
0x1d93   :  { %v1833_v17 = vpop.f32.mrf.mxu0 }
0x1d94   :  { %1843 = vst [vmem:[#allocation2 + $0x8] sm:$0xff] %v1839_v16  ;;  %v1834_v18 = vadd.f32 %v3464_v15, %v1833_v17 }
0x1d96   :  { %1842 = vst [vmem:[#allocation2] sm:$0xff] %v1834_v18 }
0x1d99   :  { %v1911_v19 = vpop.f32.mrf.mxu0 }
0x1d9b   :  { %v4252_v20 = vpop.f32.mrf.mxu0 }
0x1d9d   :  { %v1844_v21 = vld [vmem:[#allocation2] sm:$0x3]  ;;  %v2024_v41 = vld [vmem:[#allocation2 + $0x2] sm:$0x3] }
0x1d9e   :  { %v1912_v22 = vadd.f32 %v1911_v19, %v1844_v21 }
0x1da0   :  { %v1915_v23 = vmul.f32 %v1912_v22, %v1912_v22 }
0x1da2   :  { %4286 = vmatmul.mubr.f32.vlgmr.msra.gmra.mxu1 %v1915_v23 }
0x1da3   :  { %4335 = vmatpush3.msra.mxu1 %v5705_v11  ;;  %4342 = vmatprep.mubr.msk.f32.mxu1 %vm5021_vm0, %v5020_v0 }
0x1da4   :  { %4336 = vmatprep.subr.mxu1 %v5020_v0 }
0x1da5   :  { %4337 = vmatpush3.msra.mxu1 %v5708_v13 }
0x1da6   :  { %4338 = vmatprep.subr.mxu1 %v5020_v0 }
0x1da7   :  { %4339 = vmatpush3.msra.mxu1 %v5714_v14 }
0x1da8   :  { %4340 = vmatprep.subr.mxu1 %v5020_v0 }
0x1da9   :  { %4341 = vmatpush3.msra.mxu1 %v5718_v40 }
0x1daa   :  { %4345 = vmatprep.subr.mxu1 %v5020_v0 }
0x1e62   :  { %v1982_v24 = vpop.f32.mrf.mxu1 }
0x1e63   :  { %v1983_v8 = vadd.f32 1e-05, %v1982_v24 }
0x1e64   :  { %v4287_v25 = vpop.f32.mrf.mxu1 }
0x1e65   :  { %4715 = vrsqrt.f32 %v1983_v8 }
0x1e72   :  { %v4716_v9 = vpop.eup %4715 }
0x1e73   :  { %v1987_v49 = vmul.f32 %v4716_v9, %v1912_v22 }
0x1e75   :  { %v1988_v51 = vmul.f32 %v5751_v48, %v1987_v49 }
0x1e77   :  { %v1989_v52 = vadd.f32 %v5756_v50, %v1988_v51 }
0x1e79   :  { %4717 = vtanh.f32 %v1989_v52  ;;  %v3467_v54 = vmul.f32 -1.442695, %v1989_v52 }
0x1e7b   :  { %4719 = vpow2.f32 %v3467_v54 }
0x1e86   :  { %v4718_v53 = vpop.eup %4717 }
0x1e87   :  { %1999 = vrot.lane.b32.xlu0 %v4718_v53, %s5022_s3 }
0x1e88   :  { %v4720_v55 = vpop.eup %4719 }
0x1e89   :  { %v1993_v56 = vadd.f32 1.0, %v4720_v55 }
0x1e8b   :  { %4721 = vrcp.f32 %v1993_v56  ;;  %v2206_v56 = vld [vmem:[#allocation2 + $0x4] sm:$0x3] }
0x1e98   :  { %v4722_v57 = vpop.eup %4721 }
0x1e99   :  { %v1996_v31 = vmul.f32 0.0, %v4722_v57 }
0x1ef9   :  { %v2000_v58 = vpop.permute.xlu0 %1999 }
0x1efa   :  { %v2002_v59 = vmul.f32 %v4722_v57, %v2000_v58 }
0x1efc   :  { %2004 = vrot.lane.b32.xlu1 %v2002_v59, %s5023_s16 }
0x1f00   :  { %2015 = vrot.lane.b32.xlu1 %v1989_v52, %s5023_s16 }
0x1f6e   :  { %v2005_v32 = vpop.permute.xlu1 %2004 }
0x1f6f   :  { %v5763_v33 = vadd.f32 %v2005_v32, %v1996_v31 }
0x1f71   :  { %4723 = vtanh.f32 %v5763_v33 }
0x1f72   :  { %v2016_v37 = vpop.permute.xlu1 %2015 }
0x1f7e   :  { %v4724_v34 = vpop.eup %4723 }
0x1f7f   :  { %2010 = vrot.lane.b32.xlu0 %v4724_v34, %s5022_s3 }
0x1ff1   :  { %v2011_v35 = vpop.permute.xlu0 %2010 }
0x1ff2   :  { %v2013_v36 = vmul.f32 %v4722_v57, %v2011_v35 }
0x1ff4   :  { %v2018_v38 = vadd.f32 %v2016_v37, %v2013_v36 }
0x1ff6   :  { %2020 = vrot.lane.b32.xlu0 %v2018_v38, %s5023_s16 }
0x2068   :  { %v2021_v39 = vpop.permute.xlu0 %2020 }
0x2069   :  { %2023 = vst.msk [vmem:[#allocation3] sm:$0x3] %vm451_vm3, %v2021_v39  ;;  %4297 = vmatmul.mubr.msk.f32.vlgmr.msra.gmra.mxu0 %vm269_vm4, %v2021_v39 }
0x206a   :  { %4300 = vmatpush3.msra.mxu0 %v5544_v60  ;;  %4331 = vmatprep.mubr.msk.f32.mxu0 %vm5021_vm0, %v5020_v0 }
0x206b   :  { %4301 = vmatprep.subr.mxu0 %v5020_v0 }
0x206c   :  { %4302 = vmatpush3.msra.mxu0 %v5550_v61 }
0x206d   :  { %4303 = vmatprep.subr.mxu0 %v5020_v0 }
0x206e   :  { %4304 = vmatpush3.msra.mxu0 %v5554_v62 }
0x206f   :  { %4305 = vmatprep.subr.mxu0 %v5020_v0 }
0x2070   :  { %4306 = vmatpush3.msra.mxu0 %v5558_v63 }
0x2071   :  { %4307 = vmatprep.subr.mxu0 %v5020_v0 }
0x2072   :  { %4308 = vmatpush3.msra.mxu0 %v5562_v1 }
0x2073   :  { %4309 = vmatprep.subr.mxu0 %v5020_v0 }
0x2074   :  { %4310 = vmatpush3.msra.mxu0 %v5566_v2 }
0x2075   :  { %4311 = vmatprep.subr.mxu0 %v5020_v0 }
0x2076   :  { %4312 = vmatpush3.msra.mxu0 %v5570_v3 }
0x2077   :  { %4313 = vmatprep.subr.mxu0 %v5020_v0 }
0x2078   :  { %4314 = vmatpush3.msra.mxu0 %v5574_v5 }
0x2079   :  { %4315 = vmatprep.subr.mxu0 %v5020_v0 }
0x207a   :  { %4316 = vmatpush3.msra.mxu0 %v5578_v7 }
0x207b   :  { %4317 = vmatprep.subr.mxu0 %v5020_v0 }
0x207c   :  { %4318 = vmatpush3.msra.mxu0 %v5582_v26 }
0x207d   :  { %4319 = vmatprep.subr.mxu0 %v5020_v0 }
0x207e   :  { %4320 = vmatpush3.msra.mxu0 %v5586_v4 }
0x207f   :  { %4321 = vmatprep.subr.mxu0 %v5020_v0 }
0x2080   :  { %4322 = vmatpush3.msra.mxu0 %v5590_v27 }
0x2081   :  { %4323 = vmatprep.subr.mxu0 %v5020_v0 }
0x2082   :  { %4324 = vmatpush3.msra.mxu0 %v5594_v28 }
0x2083   :  { %4325 = vmatprep.subr.mxu0 %v5020_v0 }
0x2084   :  { %4326 = vmatpush3.msra.mxu0 %v5598_v29 }
0x2085   :  { %4327 = vmatprep.subr.mxu0 %v5020_v0 }
0x2086   :  { %4328 = vmatpush3.msra.mxu0 %v5602_v6 }
0x2087   :  { %4329 = vmatprep.subr.mxu0 %v5020_v0 }
0x2088   :  { %4330 = vmatpush3.msra.mxu0 %v5606_v30 }
0x2089   :  { %4380 = vmatprep.subr.mxu0 %v5020_v0 }
0x2129   :  { %v2093_v43 = vpop.f32.mrf.mxu0 }
0x212a   :  { %v2094_v44 = vadd.f32 %v2093_v43, %v2024_v41 }
0x212b   :  { %v4298_v45 = vpop.f32.mrf.mxu0 }
0x212c   :  { %v2097_v46 = vmul.f32 %v2094_v44, %v2094_v44 }
0x212e   :  { %4332 = vmatmul.mubr.f32.vlgmr.msra.gmra.mxu0 %v2097_v46 }
0x212f   :  { %4381 = vmatpush3.msra.mxu0 %v5705_v11  ;;  %4388 = vmatprep.mubr.msk.f32.mxu0 %vm5021_vm0, %v5020_v0 }
0x2130   :  { %4382 = vmatprep.subr.mxu0 %v5020_v0 }
0x2131   :  { %4383 = vmatpush3.msra.mxu0 %v5708_v13 }
0x2132   :  { %4384 = vmatprep.subr.mxu0 %v5020_v0 }
0x2133   :  { %4385 = vmatpush3.msra.mxu0 %v5714_v14 }
0x2134   :  { %4386 = vmatprep.subr.mxu0 %v5020_v0 }
0x2135   :  { %4387 = vmatpush3.msra.mxu0 %v5718_v40 }
0x2136   :  { %4391 = vmatprep.subr.mxu0 %v5020_v0 }
0x21ee   :  { %v2164_v47 = vpop.f32.mrf.mxu0 }
0x21ef   :  { %v2165_v10 = vadd.f32 1e-05, %v2164_v47 }
0x21f0   :  { %v4333_v12 = vpop.f32.mrf.mxu0 }
0x21f1   :  { %4725 = vrsqrt.f32 %v2165_v10 }
0x21fe   :  { %v4726_v15 = vpop.eup %4725 }
0x21ff   :  { %v2169_v42 = vmul.f32 %v4726_v15, %v2094_v44 }
0x2201   :  { %v2170_v16 = vmul.f32 %v5751_v48, %v2169_v42 }
0x2203   :  { %v2171_v17 = vadd.f32 %v5756_v50, %v2170_v16 }
0x2205   :  { %4727 = vtanh.f32 %v2171_v17  ;;  %v3469_v19 = vmul.f32 -1.442695, %v2171_v17 }
0x2207   :  { %4729 = vpow2.f32 %v3469_v19 }
0x2212   :  { %v4728_v18 = vpop.eup %4727 }
0x2213   :  { %2181 = vrot.lane.b32.xlu1 %v4728_v18, %s5022_s3 }
0x2214   :  { %v4730_v20 = vpop.eup %4729 }
0x2215   :  { %v2175_v21 = vadd.f32 1.0, %v4730_v20 }
0x2217   :  { %4731 = vrcp.f32 %v2175_v21 }
0x2224   :  { %v4732_v22 = vpop.eup %4731 }
0x2225   :  { %v2178_v8 = vmul.f32 %v4732_v22, %v5763_v33 }
0x2285   :  { %v2182_v23 = vpop.permute.xlu1 %2181 }
0x2286   :  { %v2184_v24 = vmul.f32 %v4732_v22, %v2182_v23 }
0x2288   :  { %2186 = vrot.lane.b32.xlu0 %v2184_v24, %s5023_s16 }
0x228c   :  { %2197 = vrot.lane.b32.xlu0 %v2171_v17, %s5023_s16 }
0x22fa   :  { %v2187_v25 = vpop.permute.xlu0 %2186 }
0x22fb   :  { %v5820_v9 = vadd.f32 %v2187_v25, %v2178_v8 }
0x22fd   :  { %4733 = vtanh.f32 %v5820_v9 }
0x22fe   :  { %v2198_v53 = vpop.permute.xlu0 %2197 }
0x230a   :  { %v4734_v49 = vpop.eup %4733 }
0x230b   :  { %2192 = vrot.lane.b32.xlu1 %v4734_v49, %s5022_s3 }
0x237d   :  { %v2193_v51 = vpop.permute.xlu1 %2192 }
0x237e   :  { %v2195_v52 = vmul.f32 %v4732_v22, %v2193_v51 }
0x2380   :  { %v2200_v54 = vadd.f32 %v2198_v53, %v2195_v52 }
0x2382   :  { %2202 = vrot.lane.b32.xlu1 %v2200_v54, %s5023_s16 }
0x23f4   :  { %v2203_v55 = vpop.permute.xlu1 %2202 }
0x23f5   :  { %2205 = vst.msk [vmem:[#allocation3 + $0x2] sm:$0x3] %vm451_vm3, %v2203_v55  ;;  %4343 = vmatmul.mubr.msk.f32.vlgmr.msra.gmra.mxu1 %vm269_vm4, %v2203_v55  ;;  %v5941_v55 = vld [vmem:[#allocation13 + $0x78] sm:$0xff] }
0x23f6   :  { %4346 = vmatpush3.msra.mxu1 %v5544_v60  ;;  %4377 = vmatprep.mubr.msk.f32.mxu1 %vm5021_vm0, %v5020_v0 }
0x23f7   :  { %4347 = vmatprep.subr.mxu1 %v5020_v0 }
0x23f8   :  { %4348 = vmatpush3.msra.mxu1 %v5550_v61 }
0x23f9   :  { %4349 = vmatprep.subr.mxu1 %v5020_v0 }
0x23fa   :  { %4350 = vmatpush3.msra.mxu1 %v5554_v62 }
0x23fb   :  { %4351 = vmatprep.subr.mxu1 %v5020_v0 }
0x23fc   :  { %4352 = vmatpush3.msra.mxu1 %v5558_v63 }
0x23fd   :  { %4353 = vmatprep.subr.mxu1 %v5020_v0 }
0x23fe   :  { %4354 = vmatpush3.msra.mxu1 %v5562_v1 }
0x23ff   :  { %4355 = vmatprep.subr.mxu1 %v5020_v0 }
0x2400   :  { %4356 = vmatpush3.msra.mxu1 %v5566_v2 }
0x2401   :  { %4357 = vmatprep.subr.mxu1 %v5020_v0 }
0x2402   :  { %4358 = vmatpush3.msra.mxu1 %v5570_v3 }
0x2403   :  { %4359 = vmatprep.subr.mxu1 %v5020_v0 }
0x2404   :  { %4360 = vmatpush3.msra.mxu1 %v5574_v5 }
0x2405   :  { %4361 = vmatprep.subr.mxu1 %v5020_v0 }
0x2406   :  { %4362 = vmatpush3.msra.mxu1 %v5578_v7 }
0x2407   :  { %4363 = vmatprep.subr.mxu1 %v5020_v0 }
0x2408   :  { %4364 = vmatpush3.msra.mxu1 %v5582_v26 }
0x2409   :  { %4365 = vmatprep.subr.mxu1 %v5020_v0 }
0x240a   :  { %4366 = vmatpush3.msra.mxu1 %v5586_v4 }
0x240b   :  { %4367 = vmatprep.subr.mxu1 %v5020_v0 }
0x240c   :  { %4368 = vmatpush3.msra.mxu1 %v5590_v27 }
0x240d   :  { %4369 = vmatprep.subr.mxu1 %v5020_v0 }
0x240e   :  { %4370 = vmatpush3.msra.mxu1 %v5594_v28 }
0x240f   :  { %4371 = vmatprep.subr.mxu1 %v5020_v0 }
0x2410   :  { %4372 = vmatpush3.msra.mxu1 %v5598_v29 }
0x2411   :  { %4373 = vmatprep.subr.mxu1 %v5020_v0 }
0x2412   :  { %4374 = vmatpush3.msra.mxu1 %v5602_v6 }
0x2413   :  { %4375 = vmatprep.subr.mxu1 %v5020_v0 }
0x2414   :  { %4376 = vmatpush3.msra.mxu1 %v5606_v30 }
0x2415   :  { %4426 = vmatprep.subr.mxu1 %v5020_v0 }
0x24b5   :  { %v2275_v57 = vpop.f32.mrf.mxu1 }
0x24b6   :  { %v2276_v58 = vadd.f32 %v2275_v57, %v2206_v56  ;;  %v5947_v56 = vld [vmem:[#allocation13 + $0x70] sm:$0xff]  ;;  %v5951_v57 = vld [vmem:[#allocation13 + $0x68] sm:$0xff] }
0x24b7   :  { %v4344_v59 = vpop.f32.mrf.mxu1 }
0x24b8   :  { %v2279_v31 = vmul.f32 %v2276_v58, %v2276_v58  ;;  %v5959_v59 = vld [vmem:[#allocation13 + $0x58] sm:$0xff] }
0x24ba   :  { %4378 = vmatmul.mubr.f32.vlgmr.msra.gmra.mxu1 %v2279_v31  ;;  %v5963_v31 = vld [vmem:[#allocation13 + $0x50] sm:$0xff] }
0x24bb   :  { %4427 = vmatpush3.msra.mxu1 %v5705_v11  ;;  %4434 = vmatprep.mubr.msk.f32.mxu1 %vm5021_vm0, %v5020_v0 }
0x24bc   :  { %4428 = vmatprep.subr.mxu1 %v5020_v0 }
0x24bd   :  { %4429 = vmatpush3.msra.mxu1 %v5708_v13 }
0x24be   :  { %4430 = vmatprep.subr.mxu1 %v5020_v0 }
0x24bf   :  { %4431 = vmatpush3.msra.mxu1 %v5714_v14 }
0x24c0   :  { %4432 = vmatprep.subr.mxu1 %v5020_v0 }
0x24c1   :  { %4433 = vmatpush3.msra.mxu1 %v5718_v40 }
0x24c2   :  { %4437 = vmatprep.subr.mxu1 %v5020_v0 }
0x257a   :  { %v2346_v32 = vpop.f32.mrf.mxu1 }
0x257b   :  { %v2347_v33 = vadd.f32 1e-05, %v2346_v32  ;;  %v5967_v32 = vld [vmem:[#allocation13 + $0x48] sm:$0xff] }
0x257c   :  { %v4379_v34 = vpop.f32.mrf.mxu1 }
0x257d   :  { %4735 = vrsqrt.f32 %v2347_v33  ;;  %v5971_v33 = vld [vmem:[#allocation13 + $0x40] sm:$0xff]  ;;  %v5975_v34 = vld [vmem:[#allocation13 + $0x38] sm:$0xff] }
0x258a   :  { %v4736_v35 = vpop.eup %4735 }
0x258b   :  { %v2351_v36 = vmul.f32 %v4736_v35, %v2276_v58  ;;  %v5955_v58 = vld [vmem:[#allocation13 + $0x60] sm:$0xff]  ;;  %v5979_v35 = vld [vmem:[#allocation13 + $0x30] sm:$0xff] }
0x258d   :  { %v2352_v37 = vmul.f32 %v5751_v48, %v2351_v36  ;;  %v5983_v36 = vld [vmem:[#allocation13 + $0x28] sm:$0xff] }
0x258f   :  { %v2353_v38 = vadd.f32 %v5756_v50, %v2352_v37  ;;  %v5987_v37 = vld [vmem:[#allocation13 + $0x20] sm:$0xff] }
0x2591   :  { %4737 = vtanh.f32 %v2353_v38  ;;  %v3471_v41 = vmul.f32 -1.442695, %v2353_v38 }
0x2593   :  { %4739 = vpow2.f32 %v3471_v41  ;;  %v5999_v41 = vld [vmem:[#allocation13 + $0x8] sm:$0xff] }
0x259e   :  { %v4738_v39 = vpop.eup %4737 }
0x259f   :  { %2363 = vrot.lane.b32.xlu0 %v4738_v39, %s5022_s3  ;;  %v5995_v39 = vld [vmem:[#allocation13 + $0x10] sm:$0xff] }
0x25a0   :  { %v4740_v43 = vpop.eup %4739 }
0x25a1   :  { %v2357_v44 = vadd.f32 1.0, %v4740_v43  ;;  %v6003_v43 = vld [vmem:[#allocation13] sm:$0xff] }
0x25a3   :  { %4741 = vrcp.f32 %v2357_v44  ;;  %v2570_v44 = vld [vmem:[#allocation2 + $0x8] sm:$0x3] }
0x25b0   :  { %v4742_v45 = vpop.eup %4741 }
0x25b1   :  { %v2360_v10 = vmul.f32 %v4742_v45, %v5820_v9 }
0x2611   :  { %v2364_v46 = vpop.permute.xlu0 %2363 }
0x2612   :  { %v2366_v47 = vmul.f32 %v4742_v45, %v2364_v46 }
0x2614   :  { %2368 = vrot.lane.b32.xlu1 %v2366_v47, %s5023_s16 }
0x2618   :  { %2379 = vrot.lane.b32.xlu1 %v2353_v38, %s5023_s16  ;;  %v5991_v38 = vld [vmem:[#allocation13 + $0x18] sm:$0xff] }
0x2686   :  { %v2369_v12 = vpop.permute.xlu1 %2368 }
0x2687   :  { %v5877_v15 = vadd.f32 %v2369_v12, %v2360_v10 }
0x2689   :  { %4743 = vtanh.f32 %v5877_v15 }
0x268a   :  { %v2380_v18 = vpop.permute.xlu1 %2379 }
0x2696   :  { %v4744_v42 = vpop.eup %4743 }
0x2697   :  { %2374 = vrot.lane.b32.xlu0 %v4744_v42, %s5022_s3 }
0x2709   :  { %v2375_v16 = vpop.permute.xlu0 %2374 }
0x270a   :  { %v2377_v17 = vmul.f32 %v4742_v45, %v2375_v16 }
0x270c   :  { %v2382_v19 = vadd.f32 %v2380_v18, %v2377_v17 }
0x270e   :  { %2384 = vrot.lane.b32.xlu0 %v2382_v19, %s5023_s16 }
0x2780   :  { %v2385_v20 = vpop.permute.xlu0 %2384 }
0x2781   :  { %2387 = vst.msk [vmem:[#allocation3 + $0x4] sm:$0x3] %vm451_vm3, %v2385_v20  ;;  %4389 = vmatmul.mubr.msk.f32.vlgmr.msra.gmra.mxu0 %vm269_vm4, %v2385_v20 }
0x2782   :  { %4392 = vmatpush3.msra.mxu0 %v5544_v60  ;;  %4423 = vmatprep.mubr.msk.f32.mxu0 %vm5021_vm0, %v5020_v0  ;;  %v2388_v60 = vld [vmem:[#allocation2 + $0x6] sm:$0x3] }
0x2783   :  { %4393 = vmatprep.subr.mxu0 %v5020_v0 }
0x2784   :  { %4394 = vmatpush3.msra.mxu0 %v5550_v61 }
0x2785   :  { %4395 = vmatprep.subr.mxu0 %v5020_v0 }
0x2786   :  { %4396 = vmatpush3.msra.mxu0 %v5554_v62 }
0x2787   :  { %4397 = vmatprep.subr.mxu0 %v5020_v0 }
0x2788   :  { %4398 = vmatpush3.msra.mxu0 %v5558_v63 }
0x2789   :  { %4399 = vmatprep.subr.mxu0 %v5020_v0 }
0x278a   :  { %4400 = vmatpush3.msra.mxu0 %v5562_v1 }
0x278b   :  { %4401 = vmatprep.subr.mxu0 %v5020_v0 }
0x278c   :  { %4402 = vmatpush3.msra.mxu0 %v5566_v2 }
0x278d   :  { %4403 = vmatprep.subr.mxu0 %v5020_v0 }
0x278e   :  { %4404 = vmatpush3.msra.mxu0 %v5570_v3 }
0x278f   :  { %4405 = vmatprep.subr.mxu0 %v5020_v0 }
0x2790   :  { %4406 = vmatpush3.msra.mxu0 %v5574_v5 }
0x2791   :  { %4407 = vmatprep.subr.mxu0 %v5020_v0 }
0x2792   :  { %4408 = vmatpush3.msra.mxu0 %v5578_v7 }
0x2793   :  { %4409 = vmatprep.subr.mxu0 %v5020_v0 }
0x2794   :  { %4410 = vmatpush3.msra.mxu0 %v5582_v26 }
0x2795   :  { %4411 = vmatprep.subr.mxu0 %v5020_v0 }
0x2796   :  { %4412 = vmatpush3.msra.mxu0 %v5586_v4 }
0x2797   :  { %4413 = vmatprep.subr.mxu0 %v5020_v0 }
0x2798   :  { %4414 = vmatpush3.msra.mxu0 %v5590_v27 }
0x2799   :  { %4415 = vmatprep.subr.mxu0 %v5020_v0 }
0x279a   :  { %4416 = vmatpush3.msra.mxu0 %v5594_v28 }
0x279b   :  { %4417 = vmatprep.subr.mxu0 %v5020_v0 }
0x279c   :  { %4418 = vmatpush3.msra.mxu0 %v5598_v29 }
0x279d   :  { %4419 = vmatprep.subr.mxu0 %v5020_v0 }
0x279e   :  { %4420 = vmatpush3.msra.mxu0 %v5602_v6 }
0x279f   :  { %4421 = vmatprep.subr.mxu0 %v5020_v0 }
0x27a0   :  { %4422 = vmatpush3.msra.mxu0 %v5606_v30 }
0x27a1   :  { %4472 = vmatprep.subr.mxu0 %v5020_v0 }
0x2841   :  { %v2457_v61 = vpop.f32.mrf.mxu0 }
0x2842   :  { %v2458_v62 = vadd.f32 %v2457_v61, %v2388_v60 }
0x2843   :  { %v4390_v63 = vpop.f32.mrf.mxu0 }
0x2844   :  { %v2461_v1 = vmul.f32 %v2458_v62, %v2458_v62 }
0x2846   :  { %4424 = vmatmul.mubr.f32.vlgmr.msra.gmra.mxu0 %v2461_v1 }
0x2847   :  { %4473 = vmatpush3.msra.mxu0 %v5705_v11  ;;  %4480 = vmatprep.mubr.msk.f32.mxu0 %vm5021_vm0, %v5020_v0 }
0x2848   :  { %4474 = vmatprep.subr.mxu0 %v5020_v0 }
0x2849   :  { %4475 = vmatpush3.msra.mxu0 %v5708_v13 }
0x284a   :  { %4476 = vmatprep.subr.mxu0 %v5020_v0 }
0x284b   :  { %4477 = vmatpush3.msra.mxu0 %v5714_v14 }
0x284c   :  { %4478 = vmatprep.subr.mxu0 %v5020_v0 }
0x284d   :  { %4479 = vmatpush3.msra.mxu0 %v5718_v40 }
0x284e   :  { %4483 = vmatprep.subr.mxu0 %v5020_v0 }
0x2906   :  { %v2528_v2 = vpop.f32.mrf.mxu0 }
0x2907   :  { %v2529_v3 = vadd.f32 1e-05, %v2528_v2 }
0x2908   :  { %v4425_v5 = vpop.f32.mrf.mxu0 }
0x2909   :  { %4745 = vrsqrt.f32 %v2529_v3 }
0x2916   :  { %v4746_v7 = vpop.eup %4745 }
0x2917   :  { %v2533_v26 = vmul.f32 %v4746_v7, %v2458_v62 }
0x2919   :  { %v2534_v4 = vmul.f32 %v5751_v48, %v2533_v26 }
0x291b   :  { %v2535_v27 = vadd.f32 %v5756_v50, %v2534_v4 }
0x291d   :  { %4747 = vtanh.f32 %v2535_v27  ;;  %v3473_v29 = vmul.f32 -1.442695, %v2535_v27 }
0x291f   :  { %4749 = vpow2.f32 %v3473_v29 }
0x292a   :  { %v4748_v28 = vpop.eup %4747 }
0x292b   :  { %2545 = vrot.lane.b32.xlu1 %v4748_v28, %s5022_s3 }
0x292c   :  { %v4750_v6 = vpop.eup %4749 }
0x292d   :  { %v2539_v30 = vadd.f32 1.0, %v4750_v6 }
0x292f   :  { %4751 = vrcp.f32 %v2539_v30  ;;  %v2752_v30 = vld [vmem:[#allocation2 + $0xa] sm:$0x3] }
0x293c   :  { %v4752_v21 = vpop.eup %4751 }
0x293d   :  { %v2542_v24 = vmul.f32 %v4752_v21, %v5877_v15 }
0x299d   :  { %v2546_v22 = vpop.permute.xlu1 %2545 }
0x299e   :  { %v2548_v23 = vmul.f32 %v4752_v21, %v2546_v22 }
0x29a0   :  { %2550 = vrot.lane.b32.xlu0 %v2548_v23, %s5023_s16 }
0x29a4   :  { %2561 = vrot.lane.b32.xlu0 %v2535_v27, %s5023_s16 }
0x2a12   :  { %v2551_v8 = vpop.permute.xlu0 %2550 }
0x2a13   :  { %v5934_v25 = vadd.f32 %v2551_v8, %v2542_v24 }
0x2a15   :  { %4753 = vtanh.f32 %v5934_v25 }
0x2a16   :  { %v2562_v52 = vpop.permute.xlu0 %2561 }
0x2a22   :  { %v4754_v9 = vpop.eup %4753 }
0x2a23   :  { %2556 = vrot.lane.b32.xlu1 %v4754_v9, %s5022_s3 }
0x2a95   :  { %v2557_v49 = vpop.permute.xlu1 %2556 }
0x2a96   :  { %v2559_v51 = vmul.f32 %v4752_v21, %v2557_v49 }
0x2a98   :  { %v2564_v53 = vadd.f32 %v2562_v52, %v2559_v51 }
0x2a9a   :  { %2566 = vrot.lane.b32.xlu1 %v2564_v53, %s5023_s16 }
0x2b0c   :  { %v2567_v54 = vpop.permute.xlu1 %2566 }
0x2b0d   :  { %2569 = vst.msk [vmem:[#allocation3 + $0x6] sm:$0x3] %vm451_vm3, %v2567_v54  ;;  %4435 = vmatmul.mubr.msk.f32.vlgmr.msra.gmra.mxu1 %vm269_vm4, %v2567_v54 }
0x2b0e   :  { %4438 = vmatpush3.msra.mxu1 %v5941_v55  ;;  %4469 = vmatprep.mubr.msk.f32.mxu1 %vm5021_vm0, %v5020_v0 }
0x2b0f   :  { %4439 = vmatprep.subr.mxu1 %v5020_v0 }
0x2b10   :  { %4440 = vmatpush3.msra.mxu1 %v5947_v56 }
0x2b11   :  { %4441 = vmatprep.subr.mxu1 %v5020_v0 }
0x2b12   :  { %4442 = vmatpush3.msra.mxu1 %v5951_v57 }
0x2b13   :  { %4443 = vmatprep.subr.mxu1 %v5020_v0 }
0x2b14   :  { %4444 = vmatpush3.msra.mxu1 %v5955_v58 }
0x2b15   :  { %4445 = vmatprep.subr.mxu1 %v5020_v0 }
0x2b16   :  { %4446 = vmatpush3.msra.mxu1 %v5959_v59 }
0x2b17   :  { %4447 = vmatprep.subr.mxu1 %v5020_v0 }
0x2b18   :  { %4448 = vmatpush3.msra.mxu1 %v5963_v31 }
0x2b19   :  { %4449 = vmatprep.subr.mxu1 %v5020_v0 }
0x2b1a   :  { %4450 = vmatpush3.msra.mxu1 %v5967_v32 }
0x2b1b   :  { %4451 = vmatprep.subr.mxu1 %v5020_v0 }
0x2b1c   :  { %4452 = vmatpush3.msra.mxu1 %v5971_v33 }
0x2b1d   :  { %4453 = vmatprep.subr.mxu1 %v5020_v0 }
0x2b1e   :  { %4454 = vmatpush3.msra.mxu1 %v5975_v34 }
0x2b1f   :  { %4455 = vmatprep.subr.mxu1 %v5020_v0 }
0x2b20   :  { %4456 = vmatpush3.msra.mxu1 %v5979_v35 }
0x2b21   :  { %4457 = vmatprep.subr.mxu1 %v5020_v0 }
0x2b22   :  { %4458 = vmatpush3.msra.mxu1 %v5983_v36 }
0x2b23   :  { %4459 = vmatprep.subr.mxu1 %v5020_v0 }
0x2b24   :  { %4460 = vmatpush3.msra.mxu1 %v5987_v37 }
0x2b25   :  { %4461 = vmatprep.subr.mxu1 %v5020_v0 }
0x2b26   :  { %4462 = vmatpush3.msra.mxu1 %v5991_v38 }
0x2b27   :  { %4463 = vmatprep.subr.mxu1 %v5020_v0 }
0x2b28   :  { %4464 = vmatpush3.msra.mxu1 %v5995_v39 }
0x2b29   :  { %4465 = vmatprep.subr.mxu1 %v5020_v0 }
0x2b2a   :  { %4466 = vmatpush3.msra.mxu1 %v5999_v41 }
0x2b2b   :  { %4467 = vmatprep.subr.mxu1 %v5020_v0 }
0x2b2c   :  { %4468 = vmatpush3.msra.mxu1 %v6003_v43 }
0x2b2d   :  { %4518 = vmatprep.subr.mxu1 %v5020_v0 }
0x2bcd   :  { %v2639_v45 = vpop.f32.mrf.mxu1 }
0x2bce   :  { %v2640_v46 = vadd.f32 %v2639_v45, %v2570_v44 }
0x2bcf   :  { %v4436_v47 = vpop.f32.mrf.mxu1 }
0x2bd0   :  { %v2643_v10 = vmul.f32 %v2640_v46, %v2640_v46 }
0x2bd2   :  { %4470 = vmatmul.mubr.f32.vlgmr.msra.gmra.mxu1 %v2643_v10 }
0x2bd3   :  { %4519 = vmatpush3.msra.mxu1 %v5705_v11  ;;  %4526 = vmatprep.mubr.msk.f32.mxu1 %vm5021_vm0, %v5020_v0 }
0x2bd4   :  { %4520 = vmatprep.subr.mxu1 %v5020_v0 }
0x2bd5   :  { %4521 = vmatpush3.msra.mxu1 %v5708_v13 }
0x2bd6   :  { %4522 = vmatprep.subr.mxu1 %v5020_v0 }
0x2bd7   :  { %4523 = vmatpush3.msra.mxu1 %v5714_v14 }
0x2bd8   :  { %4524 = vmatprep.subr.mxu1 %v5020_v0 }
0x2bd9   :  { %4525 = vmatpush3.msra.mxu1 %v5718_v40 }
0x2bda   :  { %4529 = vmatprep.subr.mxu1 %v5020_v0 }
0x2c92   :  { %v2710_v12 = vpop.f32.mrf.mxu1 }
0x2c93   :  { %v2711_v15 = vadd.f32 1e-05, %v2710_v12 }
0x2c94   :  { %v4471_v42 = vpop.f32.mrf.mxu1 }
0x2c95   :  { %4755 = vrsqrt.f32 %v2711_v15 }
0x2ca2   :  { %v4756_v16 = vpop.eup %4755 }
0x2ca3   :  { %v2715_v17 = vmul.f32 %v4756_v16, %v2640_v46 }
0x2ca5   :  { %v2716_v18 = vmul.f32 %v5751_v48, %v2715_v17 }
0x2ca7   :  { %v2717_v19 = vadd.f32 %v5756_v50, %v2716_v18 }
0x2ca9   :  { %4757 = vtanh.f32 %v2717_v19  ;;  %v3475_v60 = vmul.f32 -1.442695, %v2717_v19 }
0x2cab   :  { %4759 = vpow2.f32 %v3475_v60 }
0x2cb6   :  { %v4758_v20 = vpop.eup %4757 }
0x2cb7   :  { %2727 = vrot.lane.b32.xlu0 %v4758_v20, %s5022_s3 }
0x2cb8   :  { %v4760_v61 = vpop.eup %4759 }
0x2cb9   :  { %v2721_v62 = vadd.f32 1.0, %v4760_v61 }
0x2cbb   :  { %4761 = vrcp.f32 %v2721_v62 }
0x2cc8   :  { %v4762_v63 = vpop.eup %4761 }
0x2cc9   :  { %v2724_v3 = vmul.f32 %v4762_v63, %v5934_v25 }
0x2d29   :  { %v2728_v1 = vpop.permute.xlu0 %2727 }
0x2d2a   :  { %v2730_v2 = vmul.f32 %v4762_v63, %v2728_v1 }
0x2d2c   :  { %2732 = vrot.lane.b32.xlu1 %v2730_v2, %s5023_s16 }
0x2d30   :  { %2743 = vrot.lane.b32.xlu1 %v2717_v19, %s5023_s16  ;;  %v2934_v19 = vld [vmem:[#allocation2 + $0xc] sm:$0x3] }
0x2d9e   :  { %v2733_v5 = vpop.permute.xlu1 %2732 }
0x2d9f   :  { %v6023_v7 = vadd.f32 %v2733_v5, %v2724_v3 }
0x2da1   :  { %4763 = vtanh.f32 %v6023_v7 }
0x2da2   :  { %v2744_v28 = vpop.permute.xlu1 %2743 }
0x2dae   :  { %v4764_v26 = vpop.eup %4763 }
0x2daf   :  { %2738 = vrot.lane.b32.xlu0 %v4764_v26, %s5022_s3 }
0x2e21   :  { %v2739_v4 = vpop.permute.xlu0 %2738 }
0x2e22   :  { %v2741_v27 = vmul.f32 %v4762_v63, %v2739_v4  ;;  %v3298_v63 = vld [vmem:[#allocation3] sm:$0xff] }
0x2e24   :  { %v2746_v29 = vadd.f32 %v2744_v28, %v2741_v27 }
0x2e26   :  { %2748 = vrot.lane.b32.xlu0 %v2746_v29, %s5023_s16 }
0x2e98   :  { %v2749_v6 = vpop.permute.xlu0 %2748 }
0x2e99   :  { %2751 = vst.msk [vmem:[#allocation3 + $0x8] sm:$0x3] %vm451_vm3, %v2749_v6  ;;  %4481 = vmatmul.mubr.msk.f32.vlgmr.msra.gmra.mxu0 %vm269_vm4, %v2749_v6 }
0x2e9a   :  { %4484 = vmatpush3.msra.mxu0 %v5941_v55  ;;  %4515 = vmatprep.mubr.msk.f32.mxu0 %vm5021_vm0, %v5020_v0 }
0x2e9b   :  { %4485 = vmatprep.subr.mxu0 %v5020_v0 }
0x2e9c   :  { %4486 = vmatpush3.msra.mxu0 %v5947_v56 }
0x2e9d   :  { %4487 = vmatprep.subr.mxu0 %v5020_v0 }
0x2e9e   :  { %4488 = vmatpush3.msra.mxu0 %v5951_v57 }
0x2e9f   :  { %4489 = vmatprep.subr.mxu0 %v5020_v0 }
0x2ea0   :  { %4490 = vmatpush3.msra.mxu0 %v5955_v58 }
0x2ea1   :  { %4491 = vmatprep.subr.mxu0 %v5020_v0 }
0x2ea2   :  { %4492 = vmatpush3.msra.mxu0 %v5959_v59 }
0x2ea3   :  { %4493 = vmatprep.subr.mxu0 %v5020_v0 }
0x2ea4   :  { %4494 = vmatpush3.msra.mxu0 %v5963_v31 }
0x2ea5   :  { %4495 = vmatprep.subr.mxu0 %v5020_v0 }
0x2ea6   :  { %4496 = vmatpush3.msra.mxu0 %v5967_v32 }
0x2ea7   :  { %4497 = vmatprep.subr.mxu0 %v5020_v0 }
0x2ea8   :  { %4498 = vmatpush3.msra.mxu0 %v5971_v33 }
0x2ea9   :  { %4499 = vmatprep.subr.mxu0 %v5020_v0 }
0x2eaa   :  { %4500 = vmatpush3.msra.mxu0 %v5975_v34 }
0x2eab   :  { %4501 = vmatprep.subr.mxu0 %v5020_v0 }
0x2eac   :  { %4502 = vmatpush3.msra.mxu0 %v5979_v35 }
0x2ead   :  { %4503 = vmatprep.subr.mxu0 %v5020_v0 }
0x2eae   :  { %4504 = vmatpush3.msra.mxu0 %v5983_v36 }
0x2eaf   :  { %4505 = vmatprep.subr.mxu0 %v5020_v0 }
0x2eb0   :  { %4506 = vmatpush3.msra.mxu0 %v5987_v37 }
0x2eb1   :  { %4507 = vmatprep.subr.mxu0 %v5020_v0 }
0x2eb2   :  { %4508 = vmatpush3.msra.mxu0 %v5991_v38 }
0x2eb3   :  { %4509 = vmatprep.subr.mxu0 %v5020_v0 }
0x2eb4   :  { %4510 = vmatpush3.msra.mxu0 %v5995_v39 }
0x2eb5   :  { %4511 = vmatprep.subr.mxu0 %v5020_v0 }
0x2eb6   :  { %4512 = vmatpush3.msra.mxu0 %v5999_v41 }
0x2eb7   :  { %4513 = vmatprep.subr.mxu0 %v5020_v0 }
0x2eb8   :  { %4514 = vmatpush3.msra.mxu0 %v6003_v43 }
0x2eb9   :  { %4564 = vmatprep.subr.mxu0 %v5020_v0 }
0x2f59   :  { %v2821_v21 = vpop.f32.mrf.mxu0 }
0x2f5a   :  { %v2822_v22 = vadd.f32 %v2821_v21, %v2752_v30 }
0x2f5b   :  { %v4482_v23 = vpop.f32.mrf.mxu0 }
0x2f5c   :  { %v2825_v24 = vmul.f32 %v2822_v22, %v2822_v22 }
0x2f5e   :  { %4516 = vmatmul.mubr.f32.vlgmr.msra.gmra.mxu0 %v2825_v24 }
0x2f5f   :  { %4565 = vmatpush3.msra.mxu0 %v5705_v11  ;;  %4572 = vmatprep.mubr.msk.f32.mxu0 %vm5021_vm0, %v5020_v0 }
0x2f60   :  { %4566 = vmatprep.subr.mxu0 %v5020_v0 }
0x2f61   :  { %4567 = vmatpush3.msra.mxu0 %v5708_v13 }
0x2f62   :  { %4568 = vmatprep.subr.mxu0 %v5020_v0 }
0x2f63   :  { %4569 = vmatpush3.msra.mxu0 %v5714_v14 }
0x2f64   :  { %4570 = vmatprep.subr.mxu0 %v5020_v0 }
0x2f65   :  { %4571 = vmatpush3.msra.mxu0 %v5718_v40 }
0x2f66   :  { %4575 = vmatprep.subr.mxu0 %v5020_v0 }
0x301e   :  { %v2892_v8 = vpop.f32.mrf.mxu0 }
0x301f   :  { %v2893_v25 = vadd.f32 1e-05, %v2892_v8 }
0x3020   :  { %v4517_v11 = vpop.f32.mrf.mxu0 }
0x3021   :  { %4765 = vrsqrt.f32 %v2893_v25 }
0x302e   :  { %v4766_v9 = vpop.eup %4765 }
0x302f   :  { %v2897_v49 = vmul.f32 %v4766_v9, %v2822_v22 }
0x3031   :  { %v2898_v51 = vmul.f32 %v5751_v48, %v2897_v49 }
0x3033   :  { %v2899_v13 = vadd.f32 %v5756_v50, %v2898_v51 }
0x3035   :  { %4767 = vtanh.f32 %v2899_v13  ;;  %v3477_v14 = vmul.f32 -1.442695, %v2899_v13 }
0x3037   :  { %4769 = vpow2.f32 %v3477_v14 }
0x3042   :  { %v4768_v52 = vpop.eup %4767 }
0x3043   :  { %2909 = vrot.lane.b32.xlu1 %v4768_v52, %s5022_s3 }
0x3044   :  { %v4770_v53 = vpop.eup %4769 }
0x3045   :  { %v2903_v40 = vadd.f32 1.0, %v4770_v53 }
0x3047   :  { %4771 = vrcp.f32 %v2903_v40 }
0x3054   :  { %v4772_v54 = vpop.eup %4771 }
0x3055   :  { %v2906_v46 = vmul.f32 %v4772_v54, %v6023_v7 }
0x30b5   :  { %v2910_v44 = vpop.permute.xlu1 %2909 }
0x30b6   :  { %v2912_v45 = vmul.f32 %v4772_v54, %v2910_v44 }
0x30b8   :  { %2914 = vrot.lane.b32.xlu0 %v2912_v45, %s5023_s16  ;;  %v3303_v45 = vld [vmem:[#allocation15 + $0x18] sm:$0xff] }
0x30bc   :  { %2925 = vrot.lane.b32.xlu0 %v2899_v13, %s5023_s16 }
0x312a   :  { %v2915_v47 = vpop.permute.xlu0 %2914 }
0x312b   :  { %v6080_v10 = vadd.f32 %v2915_v47, %v2906_v46  ;;  %v3302_v46 = vld [vmem:[#allocation15 + $0x10] sm:$0xff]  ;;  %v3301_v47 = vld [vmem:[#allocation15 + $0x8] sm:$0xff] }
0x312d   :  { %4773 = vtanh.f32 %v6080_v10 }
0x312e   :  { %v2926_v16 = vpop.permute.xlu0 %2925 }
0x313a   :  { %v4774_v12 = vpop.eup %4773 }
0x313b   :  { %2920 = vrot.lane.b32.xlu1 %v4774_v12, %s5022_s3 }
0x31ad   :  { %v2921_v15 = vpop.permute.xlu1 %2920 }
0x31ae   :  { %v2923_v42 = vmul.f32 %v4772_v54, %v2921_v15 }
0x31b0   :  { %v2928_v17 = vadd.f32 %v2926_v16, %v2923_v42 }
0x31b2   :  { %2930 = vrot.lane.b32.xlu1 %v2928_v17, %s5023_s16 }
0x3224   :  { %v2931_v18 = vpop.permute.xlu1 %2930 }
0x3225   :  { %2933 = vst.msk [vmem:[#allocation3 + $0xa] sm:$0x3] %vm451_vm3, %v2931_v18  ;;  %4527 = vmatmul.mubr.msk.f32.vlgmr.msra.gmra.mxu1 %vm269_vm4, %v2931_v18 }
0x3226   :  { %4530 = vmatpush3.msra.mxu1 %v5941_v55  ;;  %4561 = vmatprep.mubr.msk.f32.mxu1 %vm5021_vm0, %v5020_v0 }
0x3227   :  { %4531 = vmatprep.subr.mxu1 %v5020_v0 }
0x3228   :  { %4532 = vmatpush3.msra.mxu1 %v5947_v56 }
0x3229   :  { %4533 = vmatprep.subr.mxu1 %v5020_v0 }
0x322a   :  { %4534 = vmatpush3.msra.mxu1 %v5951_v57 }
0x322b   :  { %4535 = vmatprep.subr.mxu1 %v5020_v0 }
0x322c   :  { %4536 = vmatpush3.msra.mxu1 %v5955_v58 }
0x322d   :  { %4537 = vmatprep.subr.mxu1 %v5020_v0 }
0x322e   :  { %4538 = vmatpush3.msra.mxu1 %v5959_v59 }
0x322f   :  { %4539 = vmatprep.subr.mxu1 %v5020_v0 }
0x3230   :  { %4540 = vmatpush3.msra.mxu1 %v5963_v31 }
0x3231   :  { %4541 = vmatprep.subr.mxu1 %v5020_v0 }
0x3232   :  { %4542 = vmatpush3.msra.mxu1 %v5967_v32 }
0x3233   :  { %4543 = vmatprep.subr.mxu1 %v5020_v0 }
0x3234   :  { %4544 = vmatpush3.msra.mxu1 %v5971_v33 }
0x3235   :  { %4545 = vmatprep.subr.mxu1 %v5020_v0 }
0x3236   :  { %4546 = vmatpush3.msra.mxu1 %v5975_v34 }
0x3237   :  { %4547 = vmatprep.subr.mxu1 %v5020_v0 }
0x3238   :  { %4548 = vmatpush3.msra.mxu1 %v5979_v35 }
0x3239   :  { %4549 = vmatprep.subr.mxu1 %v5020_v0 }
0x323a   :  { %4550 = vmatpush3.msra.mxu1 %v5983_v36 }
0x323b   :  { %4551 = vmatprep.subr.mxu1 %v5020_v0 }
0x323c   :  { %4552 = vmatpush3.msra.mxu1 %v5987_v37 }
0x323d   :  { %4553 = vmatprep.subr.mxu1 %v5020_v0 }
0x323e   :  { %4554 = vmatpush3.msra.mxu1 %v5991_v38 }
0x323f   :  { %4555 = vmatprep.subr.mxu1 %v5020_v0 }
0x3240   :  { %4556 = vmatpush3.msra.mxu1 %v5995_v39 }
0x3241   :  { %4557 = vmatprep.subr.mxu1 %v5020_v0 }
0x3242   :  { %4558 = vmatpush3.msra.mxu1 %v5999_v41 }
0x3243   :  { %4559 = vmatprep.subr.mxu1 %v5020_v0 }
0x3244   :  { %4560 = vmatpush3.msra.mxu1 %v6003_v43 }
0x3245   :  { %4610 = vmatprep.subr.mxu1 %v3303_v45 }
0x32e5   :  { %v3003_v20 = vpop.f32.mrf.mxu1 }
0x32e6   :  { %v3004_v60 = vadd.f32 %v3003_v20, %v2934_v19  ;;  %v3482_v19 = vld [vmem:[%s6200_s10] ss:$0 sm:$0xff]  ;;  %s5024_s10 = smov [#allocation16]  }
0x32e7   :  { %v4528_v61 = vpop.f32.mrf.mxu1  ;;  %s3423_s30 = sshll.u32 %s5024_s10, 4  ;;  %s3424_s30 = int_to_ptr.vmem [resolvable:$true] %s3423_s30 }
0x32e8   :  { %v3007_v62 = vmul.f32 %v3004_v60, %v3004_v60  ;;  %s4981_s2 = scalar_lea.vmem %s3424_s30, 256  ;;  %p4986_p8 = scmp.lt.s32.totalorder %s3424_s30, %s3424_s30 }
0x32e9   :  { %p4982_p7 = scmp.ne.s32.totalorder %s3424_s30, %s4981_s2  ;;  %p4987_p9 = scmp.lt.s32.totalorder %s4981_s2, %s4981_s2 }
0x32ea   :  { %4562 = vmatmul.mubr.f32.vlgmr.msra.gmra.mxu1 %v3007_v62 }
0x32eb   :  { %4618 = vmatprep.mubr.msk.f32.mxu1 %vm269_vm4, %v3298_v63  ;;  %4611 = vmatpush3.msra.mxu1 %v3303_v45  ;;  %p4988_p10 = por %p4987_p9, %p4986_p8 }
0x32ec   :  { %4612 = vmatprep.subr.mxu1 %v3302_v46 }
0x32ed   :  { %4613 = vmatpush3.msra.mxu1 %v3302_v46  ;;  %p4989_p11 = pnand %p4988_p10, %p4982_p7 }
0x32ee   :  { %4614 = vmatprep.subr.mxu1 %v3301_v47 }
0x32ef   :  { %4615 = vmatpush3.msra.mxu1 %v3301_v47 }
0x33aa   :  { %v3074_v1 = vpop.f32.mrf.mxu1 }
0x33ab   :  { %v3075_v2 = vadd.f32 1e-05, %v3074_v1 }
0x33ac   :  { %v4563_v3 = vpop.f32.mrf.mxu1 }
0x33ad   :  { %4775 = vrsqrt.f32 %v3075_v2 }
0x33ba   :  { %v4776_v5 = vpop.eup %4775 }
0x33bb   :  { %v3079_v7 = vmul.f32 %v4776_v5, %v3004_v60 }
0x33bd   :  { %v3080_v26 = vmul.f32 %v5751_v48, %v3079_v7 }
0x33bf   :  { %v3081_v4 = vadd.f32 %v5756_v50, %v3080_v26 }
0x33c1   :  { %4777 = vtanh.f32 %v3081_v4  ;;  %v3479_v28 = vmul.f32 -1.442695, %v3081_v4 }
0x33c3   :  { %4779 = vpow2.f32 %v3479_v28 }
0x33ce   :  { %v4778_v27 = vpop.eup %4777 }
0x33cf   :  { %3091 = vrot.lane.b32.xlu0 %v4778_v27, %s5022_s3 }
0x33d0   :  { %v4780_v29 = vpop.eup %4779 }
0x33d1   :  { %v3085_v6 = vadd.f32 1.0, %v4780_v29 }
0x33d3   :  { %4781 = vrcp.f32 %v3085_v6 }
0x33e0   :  { %v4782_v30 = vpop.eup %4781 }
0x33e1   :  { %v3088_v48 = vmul.f32 %v4782_v30, %v6080_v10  ;;  %v3300_v10 = vld [vmem:[#allocation15] sm:$0xff] }
0x33e2   :  { %4616 = vmatprep.subr.mxu1 %v3300_v10 }
0x33e3   :  { %4617 = vmatpush3.msra.mxu1 %v3300_v10 }
0x3441   :  { %v3092_v21 = vpop.permute.xlu0 %3091 }
0x3442   :  { %v3094_v22 = vmul.f32 %v4782_v30, %v3092_v21 }
0x3444   :  { %3096 = vrot.lane.b32.xlu1 %v3094_v22, %s5023_s16 }
0x3448   :  { %3107 = vrot.lane.b32.xlu1 %v3081_v4, %s5023_s16 }
0x34b6   :  { %v3097_v23 = vpop.permute.xlu1 %3096 }
0x34b7   :  { %v6127_v50 = vadd.f32 %v3097_v23, %v3088_v48 }
0x34b9   :  { %4783 = vtanh.f32 %v6127_v50 }
0x34ba   :  { %v3108_v11 = vpop.permute.xlu1 %3107 }
0x34c6   :  { %v4784_v24 = vpop.eup %4783 }
0x34c7   :  { %3102 = vrot.lane.b32.xlu0 %v4784_v24, %s5022_s3 }
0x3539   :  { %v3103_v8 = vpop.permute.xlu0 %3102 }
0x353a   :  { %v3105_v25 = vmul.f32 %v4782_v30, %v3103_v8 }
0x353c   :  { %v3110_v9 = vadd.f32 %v3108_v11, %v3105_v25 }
0x353e   :  { %3112 = vrot.lane.b32.xlu0 %v3110_v9, %s5023_s16 }
0x35b0   :  { %v3113_v49 = vpop.permute.xlu0 %3112 }
0x35b1   :  { %3115 = vst.msk [vmem:[#allocation3 + $0xc] sm:$0x3] %vm451_vm3, %v3113_v49  ;;  %4573 = vmatmul.mubr.msk.f32.vlgmr.msra.gmra.mxu0 %vm269_vm4, %v3113_v49 }
0x35b2   :  { %4576 = vmatpush3.msra.mxu0 %v5941_v55  ;;  %4607 = vmatprep.mubr.msk.f32.mxu0 %vm5021_vm0, %v5020_v0  ;;  %v3116_v55 = vld [vmem:[#allocation2 + $0xe] sm:$0x3] }
0x35b3   :  { %4577 = vmatprep.subr.mxu0 %v5020_v0 }
0x35b4   :  { %4578 = vmatpush3.msra.mxu0 %v5947_v56 }
0x35b5   :  { %4579 = vmatprep.subr.mxu0 %v5020_v0 }
0x35b6   :  { %4580 = vmatpush3.msra.mxu0 %v5951_v57 }
0x35b7   :  { %4581 = vmatprep.subr.mxu0 %v5020_v0 }
0x35b8   :  { %4582 = vmatpush3.msra.mxu0 %v5955_v58 }
0x35b9   :  { %4583 = vmatprep.subr.mxu0 %v5020_v0 }
0x35ba   :  { %4584 = vmatpush3.msra.mxu0 %v5959_v59 }
0x35bb   :  { %4585 = vmatprep.subr.mxu0 %v5020_v0 }
0x35bc   :  { %4586 = vmatpush3.msra.mxu0 %v5963_v31 }
0x35bd   :  { %4587 = vmatprep.subr.mxu0 %v5020_v0 }
0x35be   :  { %4588 = vmatpush3.msra.mxu0 %v5967_v32 }
0x35bf   :  { %4589 = vmatprep.subr.mxu0 %v5020_v0 }
0x35c0   :  { %4590 = vmatpush3.msra.mxu0 %v5971_v33 }
0x35c1   :  { %4591 = vmatprep.subr.mxu0 %v5020_v0 }
0x35c2   :  { %4592 = vmatpush3.msra.mxu0 %v5975_v34 }
0x35c3   :  { %4593 = vmatprep.subr.mxu0 %v5020_v0 }
0x35c4   :  { %4594 = vmatpush3.msra.mxu0 %v5979_v35 }
0x35c5   :  { %4595 = vmatprep.subr.mxu0 %v5020_v0 }
0x35c6   :  { %4596 = vmatpush3.msra.mxu0 %v5983_v36  ;;  %v4839_v36 = vld [vmem:[%s6196_s6 + $0x1] ss:$0 sm:$0xff] }
0x35c7   :  { %4597 = vmatprep.subr.mxu0 %v5020_v0 }
0x35c8   :  { %4598 = vmatpush3.msra.mxu0 %v5987_v37 }
0x35c9   :  { %4599 = vmatprep.subr.mxu0 %v5020_v0 }
0x35ca   :  { %4600 = vmatpush3.msra.mxu0 %v5991_v38 }
0x35cb   :  { %4601 = vmatprep.subr.mxu0 %v5020_v0 }
0x35cc   :  { %4602 = vmatpush3.msra.mxu0 %v5995_v39 }
0x35cd   :  { %4603 = vmatprep.subr.mxu0 %v5020_v0 }
0x35ce   :  { %4604 = vmatpush3.msra.mxu0 %v5999_v41 }
0x35cf   :  { %4605 = vmatprep.subr.mxu0 %v5020_v0  ;;  %v4840_v0 = vld [vmem:[%s6197_s7 + $0x1] ss:$0 sm:$0xff] }
0x35d0   :  { %4606 = vmatpush3.msra.mxu0 %v6003_v43 }
0x3671   :  { %v3185_v56 = vpop.f32.mrf.mxu0 }
0x3672   :  { %v3186_v57 = vadd.f32 %v3185_v56, %v3116_v55 }
0x3673   :  { %v4574_v58 = vpop.f32.mrf.mxu0 }
0x3674   :  { %v3189_v59 = vmul.f32 %v3186_v57, %v3186_v57 }
0x3676   :  { %4608 = vmatmul.mubr.f32.vlgmr.msra.gmra.mxu0 %v3189_v59 }
0x3736   :  { %v3256_v31 = vpop.f32.mrf.mxu0 }
0x3737   :  { %v3257_v32 = vadd.f32 1e-05, %v3256_v31 }
0x3738   :  { %v4609_v33 = vpop.f32.mrf.mxu0 }
0x3739   :  { %4785 = vrsqrt.f32 %v3257_v32 }
0x3746   :  { %v4786_v34 = vpop.eup %4785 }
0x3747   :  { %v3261_v35 = vmul.f32 %v4786_v34, %v3186_v57 }
0x3749   :  { %v3262_v37 = vmul.f32 %v4839_v36, %v3261_v35 }
0x374b   :  { %v3263_v38 = vadd.f32 %v4840_v0, %v3262_v37 }
0x374d   :  { %4787 = vtanh.f32 %v3263_v38  ;;  %v3481_v41 = vmul.f32 -1.442695, %v3263_v38 }
0x374f   :  { %4789 = vpow2.f32 %v3481_v41 }
0x375a   :  { %v4788_v39 = vpop.eup %4787 }
0x375b   :  { %3273 = vrot.lane.b32.xlu1 %v4788_v39, %s5022_s3 }
0x375c   :  { %v4790_v43 = vpop.eup %4789 }
0x375d   :  { %v3267_v51 = vadd.f32 1.0, %v4790_v43 }
0x375f   :  { %4791 = vrcp.f32 %v3267_v51 }
0x376c   :  { %v4792_v13 = vpop.eup %4791 }
0x376d   :  { %v3270_v53 = vmul.f32 %v4792_v13, %v6127_v50 }
0x37cd   :  { %v3274_v52 = vpop.permute.xlu1 %3273 }
0x37ce   :  { %v3276_v14 = vmul.f32 %v4792_v13, %v3274_v52 }
0x37d0   :  { %3278 = vrot.lane.b32.xlu0 %v3276_v14, %s5023_s16 }
0x37d4   :  { %3289 = vrot.lane.b32.xlu0 %v3263_v38, %s5023_s16 }
0x3842   :  { %v3279_v40 = vpop.permute.xlu0 %3278 }
0x3843   :  { %v3281_v54 = vadd.f32 %v3279_v40, %v3270_v53 }
0x3845   :  { %4793 = vtanh.f32 %v3281_v54 }
0x3846   :  { %v3290_v42 = vpop.permute.xlu0 %3289 }
0x3852   :  { %v4794_v44 = vpop.eup %4793 }
0x3853   :  { %3284 = vrot.lane.b32.xlu1 %v4794_v44, %s5022_s3 }
0x38c5   :  { %v3285_v12 = vpop.permute.xlu1 %3284 }
0x38c6   :  { %v3287_v15 = vmul.f32 %v4792_v13, %v3285_v12 }
0x38c8   :  { %v3292_v16 = vadd.f32 %v3290_v42, %v3287_v15 }
0x38ca   :  { %3294 = vrot.lane.b32.xlu1 %v3292_v16, %s5023_s16 }
0x393c   :  { %v3295_v17 = vpop.permute.xlu1 %3294 }
0x393d   :  { %3297 = vst.msk [vmem:[#allocation3 + $0xe] sm:$0x3] %vm451_vm3, %v3295_v17 }
0x3944   :  { %v3299_v18 = vld [vmem:[#allocation3 + $0x8] sm:$0xff] }
0x3945   :  { %4619 = vmatmul.mubr.msk.f32.vlgmr.msra.gmra.mxu1 %vm269_vm4, %v3299_v18 }
0x3a05   :  { %v4620_v20 = vpop.f32.mrf.mxu1 }
0x3a06   :  { %v3389_v60 = vadd.f32 %v4620_v20, %v3482_v19 }
0x3a07   :  { %v3383_v61 = vpop.f32.mrf.mxu1 }
0x3a08   :  { %v3384_v62 = vadd.f32 %v3482_v19, %v3383_v61  ;;  %3394 = vmax.xlane.f32.xlu1 %v3389_v60 }
0x3a0a   :  { %3392 = vmax.xlane.f32.xlu0 %v3384_v62 }
0x3a91   :  { %v3395_v63 = vpop.xlane.xlu1 %3394 }
0x3a92   :  { %v3397_v2 = vsub.f32 %v3389_v60, %v3395_v63 }
0x3a93   :  { %v3393_v1 = vpop.xlane.xlu0 %3392 }
0x3a94   :  { %v3396_v3 = vsub.f32 %v3384_v62, %v3393_v1  ;;  %v3400_v7 = vmul.f32 1.442695, %v3397_v2 }
0x3a96   :  { %v3398_v5 = vmul.f32 1.442695, %v3396_v3 }
0x3a98   :  { %4795 = vpow2.f32 %v3398_v5 }
0x3a99   :  { %4797 = vpow2.f32 %v3400_v7 }
0x3aa5   :  { %v4796_v26 = vpop.eup %4795 }
0x3aa6   :  { %3402 = vadd.xlane.f32.xlu0 %v4796_v26  ;;  %v4798_v4 = vpop.eup %4797 }
0x3aaa   :  { %3404 = vadd.xlane.f32.xlu0 %v4798_v4 }
0x3b2f   :  { %v3403_v27 = vpop.xlane.xlu0 %3402 }
0x3b30   :  { %4799 = vrcp.f32 %v3403_v27 }
0x3b33   :  { %v3405_v28 = vpop.xlane.xlu0 %3404 }
0x3b34   :  { %4801 = vrcp.f32 %v3405_v28 }
0x3b3d   :  { %v4800_v29 = vpop.eup %4799 }
0x3b3e   :  { %v3408_v6 = vmul.f32 %v4800_v29, %v3403_v27 }
0x3b40   :  { %v3410_v30 = vsub.f32 2.0, %v3408_v6 }
0x3b41   :  { %v4802_v21 = vpop.eup %4801 }
0x3b42   :  { %v3412_v22 = vmul.f32 %v4800_v29, %v3410_v30  ;;  %v3409_v48 = vmul.f32 %v4802_v21, %v3405_v28 }
0x3b44   :  { %v3411_v23 = vsub.f32 2.0, %v3409_v48  ;;  %v3414_v50 = vmul.f32 %v4796_v26, %v3412_v22 }
0x3b46   :  { %v3413_v24 = vmul.f32 %v4802_v21, %v3411_v23  ;;  %3416 = vst [vmem:[#allocation16] sm:$0xff] %v3414_v50 }
0x3b48   :  { %v3415_v8 = vmul.f32 %v4798_v4, %v3413_v24 }
0x3b4a   :  { %3417 = vst [vmem:[#allocation16 + $0x8] sm:$0xff] %v3415_v8 }
0x3b4b   :  { %4992 = shalt.err (!%p4989_p11)
}
0x3b4c   :  { %3429 = dma.vmem_to_hbm [thread:$0]  %s3424_s30, 256, %s6201_s11, [#allocation6], %s5013_s22, %s5013_s22, %s5014_s23  }
0x3b4d   :  { %5009 = dma.done.wait [#allocation6], 256  }
0x3b4e   :  { %5010 = vsyncadd [#allocation6], 4294967040 }
0x3b4f   :  { %3433 = vsyncpa [#allocation5], 1 }
0x3b50   :  { %3434 = vsyncpa [#allocation8], 1 }
0x3b51   :  { %3435 = vsyncpa [#allocation11], 1 }
0x3b52   :  { %3436 = vsyncpa [#allocation14], 1 }
0x3b53   :  { %3437 = vsyncpa [#allocation6], 1 }

</bundles_post_ra>
